<compile_context>
chip_gen: v5e
topology: v5e:2x2
jax: 0.10.0
libtpu: 0.0.40
codegen_flags: <defaults>
</compile_context>

<pallas_src>
import functools
import math

import jax
import jax.numpy as jnp
from jax import lax
from jax.experimental import pallas as pl
from jax.experimental.pallas import tpu as pltpu

_LANE = 128      # f32 lane tile
_SUBLANE = 8     # f32 sublane tile


def _silu(v):
    return v * jax.nn.sigmoid(v)


def _round_up(n, m):
    return ((n + m - 1) // m) * m


def _gram_kan_kernel(betas_ref, x_ref, wf_ref, b0_ref, lnw_ref, lnb_ref, o_ref,
                     *, degree, cout, n_pad, ln_eps, mxu_dtype):
    # x_ref:   (TB, Cin)          f32 VMEM
    # wf_ref:  (K, Cout_pad)      K = (degree+1)*Cin : [W_base^T ; G_1 ; ... ; G_d]
    # b0_ref:  (1, Cout_pad)      silu(1) * sum_l G_0[l, :]   (degree-0 folded)
    # lnw_ref/lnb_ref: (1, Cout_pad)  LayerNorm affine, zero-padded
    # betas_ref: (degree+1,)      f32 SMEM, beta(i-1, i) scalars (i >= 2)
    x = x_ref[...]
    t = jnp.tanh(x)

    # Gram recurrence in f32 on the VPU; silu is applied once to the whole slab.
    pieces = [x]                                   # base branch input
    if degree >= 1:
        p_prev2 = jnp.ones_like(t)
        p_prev1 = t
        pieces.append(p_prev1)
        for i in range(2, degree + 1):             # static unrolled loop
            p_cur = t * p_prev1 - betas_ref[i] * p_prev2
            pieces.append(p_cur)
            p_prev2, p_prev1 = p_prev1, p_cur

    slab = _silu(jnp.concatenate(pieces, axis=-1))  # (TB, K) one wide EUP pass

    # Single fused MXU call (f32 accumulate).  basis + all Gram degrees >= 1.
    y = jnp.dot(slab.astype(mxu_dtype), wf_ref[...].astype(mxu_dtype),
                preferred_element_type=jnp.float32)
    y = y + b0_ref[...]                             # degree-0 constant term

    # LayerNorm over the *true* out_channels.  Padded columns of y are exactly
    # zero (zero weight columns + zero bias), so the plain sums are correct;
    # the centered second moment only needs an exact n_pad*mean^2 correction.
    inv_c = 1.0 / float(cout)
    mean = jnp.sum(y, axis=-1, keepdims=True) * inv_c
    d = y - mean
    var = (jnp.sum(d * d, axis=-1, keepdims=True)
           - float(n_pad) * mean * mean) * inv_c
    yn = d * lax.rsqrt(var + ln_eps)
    yn = yn * lnw_ref[...] + lnb_ref[...]           # padded cols -> 0
    o_ref[...] = _silu(yn)                          # silu(0) = 0 in the pad


def gram_kan_forward(x, params, *, degree, block_b=256, ln_eps=1e-5,
                     use_bf16_matmul=False, vmem_limit_bytes=None):
    """x: (B, Cin) f32  ->  (B, Cout) f32"""
    B, cin = x.shape
    cout = params["base_weights"].shape[0]

    # beta(n, m) = (m+n)*(m-n)*n^2 / (m^2/(4n^2-1)) * beta_weights[n],
    # with n = i-1, m = i for i in [2, degree]; slots 0/1 unused.
    bw = params["beta_weights"].astype(jnp.float32)
    betas = jnp.zeros((degree + 1,), jnp.float32)
    for i in range(2, degree + 1):
        n, m = float(i - 1), float(i)
        coeff = (m + n) * (m - n) * n ** 2 / (m ** 2 / (4.0 * n ** 2 - 1.0))
        betas = betas.at[i].set(coeff * bw[i - 1])

    # Fused weight slab: [W_base^T ; G_1 ; ... ; G_degree]  -> (K, Cout)
    g = params["grams_basis_weights"]                        # (Cin, Cout, d+1)
    w_parts = [params["base_weights"].T]                     # (Cin, Cout)
    for d in range(1, degree + 1):
        w_parts.append(g[:, :, d])
    w_fused = jnp.concatenate(w_parts, axis=0)
    k_dim = w_fused.shape[0]

    # Degree-0 term: silu(p0) = silu(1) is a constant -> fold into a bias.
    silu_one = 1.0 * jax.nn.sigmoid(1.0)
    bias0 = silu_one * jnp.sum(g[:, :, 0], axis=0)           # (Cout,)

    # Lane-pad Cout to a multiple of 128 for dense, unmasked vector stores.
    cout_pad = _round_up(cout, _LANE)
    n_pad = cout_pad - cout

    def padc(a):
        return jnp.pad(a, ((0, 0), (0, n_pad))) if n_pad else a

    w_fused = padc(w_fused)
    bias0 = padc(bias0.reshape(1, cout))
    lnw = padc(params["ln_weight"].reshape(1, cout))
    lnb = padc(params["ln_bias"].reshape(1, cout))

    # Batch tiling: large tiles (multiple of 8 sublanes); pad B up if needed.
    block_b = min(int(block_b), _round_up(B, _SUBLANE))
    block_b = _round_up(block_b, _SUBLANE)
    b_pad = _round_up(B, block_b)
    xp = jnp.pad(x, ((0, b_pad - B), (0, 0))) if b_pad != B else x
    grid = (b_pad // block_b,)

    mxu_dtype = jnp.bfloat16 if use_bf16_matmul else jnp.float32
    kernel = functools.partial(
        _gram_kan_kernel, degree=degree, cout=cout, n_pad=n_pad,
        ln_eps=ln_eps, mxu_dtype=mxu_dtype)

    # Advisory cost hint for XLA scheduling around the custom call.
    cost = pl.CostEstimate(
        flops=2 * b_pad * k_dim * cout_pad,
        transcendentals=b_pad * (cin + k_dim + cout_pad),
        bytes_accessed=4 * (b_pad * cin + k_dim * cout_pad + 3 * cout_pad
                            + b_pad * cout_pad + (degree + 1)),
    )

    out = pl.pallas_call(
        kernel,
        out_shape=jax.ShapeDtypeStruct((b_pad, cout_pad), jnp.float32),
        grid=grid,
        in_specs=[
            pl.BlockSpec(memory_space=pltpu.MemorySpace.SMEM),       # betas
            pl.BlockSpec((block_b, cin), lambda i: (i, 0)),          # x tile
            pl.BlockSpec((k_dim, cout_pad), lambda i: (0, 0)),       # fused W
            pl.BlockSpec((1, cout_pad), lambda i: (0, 0)),           # bias0
            pl.BlockSpec((1, cout_pad), lambda i: (0, 0)),           # LN w
            pl.BlockSpec((1, cout_pad), lambda i: (0, 0)),           # LN b
        ],
        out_specs=pl.BlockSpec((block_b, cout_pad), lambda i: (i, 0)),
        compiler_params=pltpu.CompilerParams(
            dimension_semantics=("parallel",),
            vmem_limit_bytes=vmem_limit_bytes),
        cost_estimate=cost,
    )(betas, xp, w_fused, bias0, lnw, lnb)

    return out[:B, :cout]


def gram_kan_reference(x, params, *, degree, ln_eps=1e-5):
    """Pure-JAX reference mirroring the PyTorch forward."""
    bw = params["beta_weights"]
    basis = _silu(x) @ params["base_weights"].T
    t = jnp.tanh(x)
    p0 = jnp.ones_like(t)
    polys = [p0]
    if degree >= 1:
        p1 = t
        polys.append(p1)
        for i in range(2, degree + 1):
            n, m = float(i - 1), float(i)
            coeff = (m + n) * (m - n) * n ** 2 / (m ** 2 / (4.0 * n ** 2 - 1.0))
            p2 = t * p1 - coeff * bw[i - 1] * p0
            polys.append(p2)
            p0, p1 = p1, p2
    gb = _silu(jnp.stack(polys, axis=-1))                    # (B, Cin, d+1)
    y = jnp.einsum("bld,lod->bo", gb, params["grams_basis_weights"])
    y = y + basis
    mean = jnp.mean(y, axis=-1, keepdims=True)
    var = jnp.mean(jnp.square(y - mean), axis=-1, keepdims=True)
    yn = (y - mean) * lax.rsqrt(var + ln_eps)
    yn = yn * params["ln_weight"] + params["ln_bias"]
    return _silu(yn)


def init_params(key, in_channels, out_channels, degree):
    k1, k2, k3 = jax.random.split(key, 3)
    beta_weights = jax.random.normal(k1, (degree + 1,), jnp.float32) * (
        1.0 / (in_channels * (degree + 1.0)))
    fan_in = out_channels * (degree + 1)
    fan_out = in_channels * (degree + 1)
    bound = math.sqrt(6.0 / (fan_in + fan_out))
    grams_basis_weights = jax.random.uniform(
        k2, (in_channels, out_channels, degree + 1), jnp.float32, -bound, bound)
    bound_b = math.sqrt(6.0 / (in_channels + out_channels))
    base_weights = jax.random.uniform(
        k3, (out_channels, in_channels), jnp.float32, -bound_b, bound_b)
    return {
        "beta_weights": beta_weights,
        "grams_basis_weights": grams_basis_weights,
        "base_weights": base_weights,
        "ln_weight": jnp.ones((out_channels,), jnp.float32),
        "ln_bias": jnp.zeros((out_channels,), jnp.float32),
    }


if __name__ == "__main__":
    B, CIN, COUT, DEGREE = 512, 32, 64, 3
    key = jax.random.PRNGKey(0)
    kx, kp = jax.random.split(key)
    x = jax.random.normal(kx, (B, CIN), jnp.float32)
    params = init_params(kp, CIN, COUT, DEGREE)

    out = gram_kan_forward(x, params, degree=DEGREE, block_b=256)
    out = jax.block_until_ready(out)

    ref = gram_kan_reference(x, params, degree=DEGREE)
    assert out.shape == (B, COUT)
    err = float(jnp.max(jnp.abs(out - ref)))
    assert jnp.allclose(out, ref, atol=2e-5, rtol=2e-5), err

    print("KERNEL_OK")
</pallas_src>

<mosaic_0001>
module attributes {stable_mosaic.version = 11 : i64} {
  func.func @_gram_kan_kernel(%arg0: i32, %arg1: memref<4xf32, #tpu.memory_space<smem>>, %arg2: memref<256x32xf32, #tpu.memory_space<vmem>>, %arg3: memref<128x128xf32, #tpu.memory_space<vmem>>, %arg4: memref<1x128xf32, #tpu.memory_space<vmem>>, %arg5: memref<1x128xf32, #tpu.memory_space<vmem>>, %arg6: memref<1x128xf32, #tpu.memory_space<vmem>>, %arg7: memref<256x128xf32, #tpu.memory_space<vmem>>) attributes {dimension_semantics = [#tpu.dimension_semantics<parallel>], iteration_bounds = array<i64: 2>, scalar_prefetch = 0 : i64, scratch_operands = 0 : i64, tpu.core_type = #tpu.core_type<tc>, window_params = [{transform_indices = @transform_0, window_bounds = array<i64: 4>}, {transform_indices = @transform_1, window_bounds = array<i64: 256, 32>}, {pipeline_mode = #tpu.pipeline_mode<synchronous>, transform_indices = @transform_2, window_bounds = array<i64: 128, 128>}, {pipeline_mode = #tpu.pipeline_mode<synchronous>, transform_indices = @transform_3, window_bounds = array<i64: 1, 128>}, {pipeline_mode = #tpu.pipeline_mode<synchronous>, transform_indices = @transform_4, window_bounds = array<i64: 1, 128>}, {pipeline_mode = #tpu.pipeline_mode<synchronous>, transform_indices = @transform_5, window_bounds = array<i64: 1, 128>}, {transform_indices = @transform_6, window_bounds = array<i64: 256, 128>}]} {
    %c0 = arith.constant 0 : index
    %c0_0 = arith.constant 0 : index
    %0 = vector.load %arg2[%c0, %c0_0] : memref<256x32xf32, #tpu.memory_space<vmem>>, vector<256x32xf32>
    %1 = math.tanh %0 : vector<256x32xf32>
    %cst = arith.constant 1.000000e+00 : f32
    %2 = vector.broadcast %cst : f32 to vector<256x32xf32>
    %3 = arith.mulf %1, %1 : vector<256x32xf32>
    %c2 = arith.constant 2 : index
    %4 = memref.load %arg1[%c2] : memref<4xf32, #tpu.memory_space<smem>>
    %5 = vector.broadcast %4 : f32 to vector<256x32xf32>
    %6 = arith.mulf %5, %2 : vector<256x32xf32>
    %7 = arith.subf %3, %6 : vector<256x32xf32>
    %8 = arith.mulf %1, %7 : vector<256x32xf32>
    %c3 = arith.constant 3 : index
    %9 = memref.load %arg1[%c3] : memref<4xf32, #tpu.memory_space<smem>>
    %10 = vector.broadcast %9 : f32 to vector<256x32xf32>
    %11 = arith.mulf %10, %1 : vector<256x32xf32>
    %12 = arith.subf %8, %11 : vector<256x32xf32>
    %13 = tpu.concatenate %0, %1, %7, %12 in 1 : vector<256x32xf32>, vector<256x32xf32>, vector<256x32xf32>, vector<256x32xf32> -> vector<256x128xf32>
    %14 = arith.negf %13 : vector<256x128xf32>
    %15 = math.exp %14 : vector<256x128xf32>
    %cst_1 = arith.constant 1.000000e+00 : f32
    %16 = vector.broadcast %cst_1 : f32 to vector<256x128xf32>
    %17 = arith.addf %16, %15 : vector<256x128xf32>
    %18 = arith.divf %16, %17 : vector<256x128xf32>
    %19 = arith.mulf %13, %18 : vector<256x128xf32>
    %c0_2 = arith.constant 0 : index
    %c0_3 = arith.constant 0 : index
    %20 = vector.load %arg3[%c0_2, %c0_3] : memref<128x128xf32, #tpu.memory_space<vmem>>, vector<128x128xf32>
    %cst_4 = arith.constant dense<0.000000e+00> : vector<256x128xf32>
    %21 = tpu.matmul %19, %20, %cst_4 {dimension_numbers = #tpu.dot_dimension_numbers<[1], [0], [0], [1], [0, 0, 1, 1], [], []>} : vector<256x128xf32>, vector<128x128xf32>, vector<256x128xf32> -> vector<256x128xf32>
    %c0_5 = arith.constant 0 : index
    %c0_6 = arith.constant 0 : index
    %22 = vector.load %arg4[%c0_5, %c0_6] : memref<1x128xf32, #tpu.memory_space<vmem>>, vector<1x128xf32>
    %23 = vector.broadcast %22 : vector<1x128xf32> to vector<256x128xf32>
    %24 = arith.addf %21, %23 : vector<256x128xf32>
    %cst_7 = arith.constant dense<0.000000e+00> : vector<256xf32>
    %25 = vector.multi_reduction <add>, %24, %cst_7 [1] : vector<256x128xf32> to vector<256xf32>
    %26 = vector.shape_cast %25 : vector<256xf32> to vector<256x1xf32>
    %cst_8 = arith.constant 1.562500e-02 : f32
    %27 = vector.broadcast %cst_8 : f32 to vector<256x1xf32>
    %28 = arith.mulf %26, %27 : vector<256x1xf32>
    %29 = vector.broadcast %28 : vector<256x1xf32> to vector<256x128xf32>
    %30 = arith.subf %24, %29 : vector<256x128xf32>
    %31 = arith.mulf %30, %30 : vector<256x128xf32>
    %cst_9 = arith.constant dense<0.000000e+00> : vector<256xf32>
    %32 = vector.multi_reduction <add>, %31, %cst_9 [1] : vector<256x128xf32> to vector<256xf32>
    %33 = vector.shape_cast %32 : vector<256xf32> to vector<256x1xf32>
    %cst_10 = arith.constant 6.400000e+01 : f32
    %34 = vector.broadcast %cst_10 : f32 to vector<256x1xf32>
    %35 = arith.mulf %34, %28 : vector<256x1xf32>
    %36 = arith.mulf %35, %28 : vector<256x1xf32>
    %37 = arith.subf %33, %36 : vector<256x1xf32>
    %cst_11 = arith.constant 1.562500e-02 : f32
    %38 = vector.broadcast %cst_11 : f32 to vector<256x1xf32>
    %39 = arith.mulf %37, %38 : vector<256x1xf32>
    %cst_12 = arith.constant 9.99999974E-6 : f32
    %40 = vector.broadcast %cst_12 : f32 to vector<256x1xf32>
    %41 = arith.addf %39, %40 : vector<256x1xf32>
    %42 = math.rsqrt %41 : vector<256x1xf32>
    %43 = vector.broadcast %42 : vector<256x1xf32> to vector<256x128xf32>
    %44 = arith.mulf %30, %43 : vector<256x128xf32>
    %c0_13 = arith.constant 0 : index
    %c0_14 = arith.constant 0 : index
    %45 = vector.load %arg5[%c0_13, %c0_14] : memref<1x128xf32, #tpu.memory_space<vmem>>, vector<1x128xf32>
    %46 = vector.broadcast %45 : vector<1x128xf32> to vector<256x128xf32>
    %47 = arith.mulf %44, %46 : vector<256x128xf32>
    %c0_15 = arith.constant 0 : index
    %c0_16 = arith.constant 0 : index
    %48 = vector.load %arg6[%c0_15, %c0_16] : memref<1x128xf32, #tpu.memory_space<vmem>>, vector<1x128xf32>
    %49 = vector.broadcast %48 : vector<1x128xf32> to vector<256x128xf32>
    %50 = arith.addf %47, %49 : vector<256x128xf32>
    %51 = arith.negf %50 : vector<256x128xf32>
    %52 = math.exp %51 : vector<256x128xf32>
    %cst_17 = arith.constant 1.000000e+00 : f32
    %53 = vector.broadcast %cst_17 : f32 to vector<256x128xf32>
    %54 = arith.addf %53, %52 : vector<256x128xf32>
    %55 = arith.divf %53, %54 : vector<256x128xf32>
    %56 = arith.mulf %50, %55 : vector<256x128xf32>
    %c0_18 = arith.constant 0 : index
    %c0_19 = arith.constant 0 : index
    %57 = vector.load %arg7[%c0_18, %c0_19] : memref<256x128xf32, #tpu.memory_space<vmem>>, vector<256x128xf32>
    tpu.vector_store %arg7[%c0_18, %c0_19], %56 {strides = array<i32>} : memref<256x128xf32, #tpu.memory_space<vmem>>, vector<256x128xf32>,
    return
  }
  func.func @transform_0(%arg0: i32) -> i32 {
    %c0_i32 = arith.constant 0 : i32
    %c0_i32_0 = arith.constant 0 : i32
    return %c0_i32 : i32
  }
  func.func @transform_1(%arg0: i32) -> (i32, i32) {
    %c0_i32 = arith.constant 0 : i32
    %c0_i32_0 = arith.constant 0 : i32
    return %arg0, %c0_i32 : i32, i32
  }
  func.func @transform_2(%arg0: i32) -> (i32, i32) {
    %c0_i32 = arith.constant 0 : i32
    %c0_i32_0 = arith.constant 0 : i32
    %c0_i32_1 = arith.constant 0 : i32
    return %c0_i32, %c0_i32_0 : i32, i32
  }
  func.func @transform_3(%arg0: i32) -> (i32, i32) {
    %c0_i32 = arith.constant 0 : i32
    %c0_i32_0 = arith.constant 0 : i32
    %c0_i32_1 = arith.constant 0 : i32
    return %c0_i32, %c0_i32_0 : i32, i32
  }
  func.func @transform_4(%arg0: i32) -> (i32, i32) {
    %c0_i32 = arith.constant 0 : i32
    %c0_i32_0 = arith.constant 0 : i32
    %c0_i32_1 = arith.constant 0 : i32
    return %c0_i32, %c0_i32_0 : i32, i32
  }
  func.func @transform_5(%arg0: i32) -> (i32, i32) {
    %c0_i32 = arith.constant 0 : i32
    %c0_i32_0 = arith.constant 0 : i32
    %c0_i32_1 = arith.constant 0 : i32
    return %c0_i32, %c0_i32_0 : i32, i32
  }
  func.func @transform_6(%arg0: i32) -> (i32, i32) {
    %c0_i32 = arith.constant 0 : i32
    %c0_i32_0 = arith.constant 0 : i32
    return %arg0, %c0_i32 : i32, i32
  }
}

</mosaic_0001>

<bundles_post_ra>
// kernel: tpu_custom_call.1
= control target key start
LH: loop header
LB: loop body
LE: loop exit
PB: predicated region body
PF: predicated region fallthrough
CT: control target
= control target key end

     0   :  { %11 = vsyncpa [#allocation4], 0  ;;  %s7103_s0 = inlined_call_operand.vmem [shape: f32[4], index: 0, kind: input, shape index: {}]   ;;  %s7104_s1 = inlined_call_operand.vmem [shape: f32[512,32], index: 1, kind: input, shape index: {}]   ;;  %s7105_s2 = inlined_call_operand.vmem [shape: f32[128,128], index: 2, kind: input, shape index: {}]   ;;  %s7106_s3 = inlined_call_operand.vmem [shape: f32[1,128], index: 3, kind: input, shape index: {}]   ;;  %s7107_s4 = inlined_call_operand.vmem [shape: f32[1,128], index: 4, kind: input, shape index: {}]   ;;  %s7108_s5 = inlined_call_operand.vmem [shape: f32[1,128], index: 5, kind: input, shape index: {}]   ;;  %s7109_s6 = inlined_call_operand.hbm [shape: f32[512,128], index: 6, kind: output, shape index: {}]  }
   0x1   :  { %12 = vsyncpa [#allocation3], 0 }
   0x2   :  { %14 = vsyncpa [#allocation3 + $0x1], 0  ;;  %s4036_s21 = smov 0   ;;  %s4038_s22 = smov 0  }
   0x3   :  { %s4040_s23 = smov 0   ;;  %s4042_s24 = smov 0  }
   0x4 LB: > { %s4057_s25 = sadd.s32 4294967295, %s3993_s24   ;;  %s3321_s26 = sadd.s32 4294967294, %s3993_s24   ;;  %s3993_s24 = sphi %s4042_s24, %s7282_s24   ;;  %s3989_s23 = sphi %s4040_s23, %s7281_s23   ;;  %s3985_s22 = sphi %s4038_s22, %s7280_s22   ;;  %s3981_s21 = sphi %s4036_s21, %s7279_s21  }
   0x5   : > { %s4061_s27 = sadd.s32 1, %s3993_s24   ;;  %s158_s28 = sadd.s32 1, %s3989_s23 }
   0x6   : > { %s155_s29 = ssub.s32 %s3993_s24, %s4061_s27  ;;  %p168_p0 = scmp.ne.s32.totalorder %s3989_s23, %s3985_s22 }
   0x7   : > { %p156_p1 = scmp.eq.s32.totalorder %s155_s29, 0  ;;  %p169_p2 = scmp.eq.s32.totalorder %s4057_s25, 1 }
   0x8   : > { %p174_p3 = scmp.ne.s32.totalorder %s3985_s22, %s3981_s21  ;;  %p175_p4 = scmp.eq.s32.totalorder %s3321_s26, 1 }
   0x9   : > { %s4072_s30 = scalar_select %p156_p1, %s3989_s23, %s158_s28  }
   0xa   : > { %p4074_p5 = por %p169_p2, %p168_p0  ;;  %p4078_p6 = por %p175_p4, %p174_p3 }
   0xb   : > { %p3322_p7 = scmp.ge.s32.totalorder %s3993_s24, 1  ;;  %p182_p8 = scmp.lt.s32.totalorder %s3993_s24, 3 }
   0xc   : > { %p3464_p9 = scmp.eq.s32.totalorder %s4057_s25, 0  ;;  %s194_s11 = sshll.u32 %s7103_s0, 4  ;;  %s195_s11 = int_to_ptr.vmem [resolvable:$true] %s194_s11 }
   0xd   : > { %p183_p10 = pnand %p3322_p7, %p182_p8  ;;  %s3995_s12 = smov [#allocation2]  }
   0xf   : > { %p3456_p11 = pneg %p183_p10  ;;  %228 = sbr.rel (%p183_p10) target bundleno = 1017 (0x3f9), region = 44 }
  0x11   : > { %p3457_p12 = pnand %p3464_p9, %p3456_p11 }
  0x13   : > { %3459 = dma.vmem_to_smem (!%p3457_p12), %s195_s11, 16, %s3995_s12, [#allocation4]  }
  0x14   : > { %3972 = dma.done.wait (%p3464_p9), [#allocation4], 16  }
  0x15   : > { %3974 = vsyncadd (%p3464_p9), [#allocation4], 4294967280 }
  0x16   : > { %235 = sfence }
  0x17   : > { %s3328_s13 = sshll.u32 %s4057_s25, 5  ;;  %s3996_s18 = smov 32   ;;  %vm879_vm0 = vcmask 261120   ;;  %vm912_vm1 = vcmask 523264   ;;  %vm945_vm2 = vcmask 785408  }
  0x18   : > { %p261_p13 = scmp.lt.s32.totalorder %s3328_s13, 63  ;;  %s3330_s19 = sld [smem:[#allocation2 + $0x2]] }
  0x19   : > { %s3331_s20 = sld [smem:[#allocation2 + $0x3]]  ;;  %s3997_s26 = smov 64  }
  0x1a   : > { %s7284_s13 = smov (!%p261_p13, %s3328_s13), 63  ;;  %s3998_s28 = smov 96  }
  0x1b   : > { %s3329_s14 = sshll.u32 %s7284_s13, 3  ;;  %s257_s9 = sand.u32 1, %s3985_s22  }
  0x1c   : > { %s4092_s17 = scalar_lea.vmem %s7104_s1, %s3329_s14  ;;  %s6042_s10 = sshll.u32 %s257_s9, 8 }
  0x1d   : > { %v4095_v0 = vld [vmem:[%s4092_s17 + $0x20] sm:$0xff]  ;;  %v4098_v1 = vld [vmem:[%s4092_s17 + $0x10] sm:$0xff]  ;;  %v4107_v3 = vld [vmem:[%s4092_s17 + $0x28] sm:$0xff]  ;;  %s6088_s11 = scalar_lea.vmem [#allocation5], %s6042_s10  ;;  %s3232_s12 = scalar_lea.sflag [#allocation3], %s257_s9 }
  0x1e   : > { %v4101_v2 = vld [vmem:[%s4092_s17] sm:$0xff]  ;;  %3508 = vtanh.f32 %v4095_v0  ;;  %v4110_v4 = vld [vmem:[%s4092_s17 + $0x18] sm:$0xff]  ;;  %v4113_v5 = vld [vmem:[%s4092_s17 + $0x8] sm:$0xff]  ;;  %v4268_v56 = vstv %s3330_s19  ;;  %s3947_s19 = scalar_lea.hbm %s7109_s6, 512 }
  0x1f   : > { %3510 = vtanh.f32 %v4098_v1  ;;  %v4131_v9 = vld [vmem:[%s4092_s17 + $0x40] sm:$0xff]  ;;  %v274_v11 = vld [vmem:[%s4092_s17 + $0x38] sm:$0xff]  ;;  %v273_v13 = vld [vmem:[%s4092_s17 + $0x30] sm:$0xff]  ;;  %v4273_v60 = vstv %s3331_s20 }
  0x20   : > { %3512 = vtanh.f32 %v4101_v2  ;;  %v4149_v15 = vld [vmem:[%s4092_s17 + $0x58] sm:$0xff]  ;;  %v4154_v17 = vld [vmem:[%s4092_s17 + $0x50] sm:$0xff]  ;;  %v4159_v19 = vld [vmem:[%s4092_s17 + $0x48] sm:$0xff] }
  0x21   : > { %3514 = vtanh.f32 %v4107_v3  ;;  %v281_v21 = vld [vmem:[%s4092_s17 + $0x70] sm:$0xff]  ;;  %v280_v23 = vld [vmem:[%s4092_s17 + $0x68] sm:$0xff]  ;;  %v279_v25 = vld [vmem:[%s4092_s17 + $0x60] sm:$0xff] }
  0x22   : > { %3516 = vtanh.f32 %v4110_v4  ;;  %v4188_v27 = vld [vmem:[%s4092_s17 + $0x88] sm:$0xff]  ;;  %v4193_v29 = vld [vmem:[%s4092_s17 + $0x80] sm:$0xff]  ;;  %v282_v31 = vld [vmem:[%s4092_s17 + $0x78] sm:$0xff] }
  0x23   : > { %3518 = vtanh.f32 %v4113_v5  ;;  %v287_v33 = vld [vmem:[%s4092_s17 + $0xa0] sm:$0xff]  ;;  %v286_v35 = vld [vmem:[%s4092_s17 + $0x98] sm:$0xff]  ;;  %v4213_v37 = vld [vmem:[%s4092_s17 + $0x90] sm:$0xff] }
  0x24   : > { %v4115_v6 = vpop.eup %3508  ;;  %3520 = vtanh.f32 %v4131_v9  ;;  %v290_v39 = vld [vmem:[%s4092_s17 + $0xb8] sm:$0xff]  ;;  %v289_v41 = vld [vmem:[%s4092_s17 + $0xb0] sm:$0xff]  ;;  %v288_v43 = vld [vmem:[%s4092_s17 + $0xa8] sm:$0xff] }
  0x25   : > { %v4118_v7 = vpop.eup %3510  ;;  %535 = vrot.lane.b32.xlu2 %v4115_v6, %s3996_s18  ;;  %3522 = vtanh.f32 %v274_v11  ;;  %v4239_v45 = vld [vmem:[%s4092_s17 + $0xd0] sm:$0xff]  ;;  %v4244_v47 = vld [vmem:[%s4092_s17 + $0xc8] sm:$0xff]  ;;  %v4249_v49 = vld [vmem:[%s4092_s17 + $0xc0] sm:$0xff] }
  0x26   : > { %v4123_v8 = vpop.eup %3512  ;;  %531 = vrot.lane.b32.xlu1 %v4118_v7, %s3996_s18  ;;  %3524 = vtanh.f32 %v273_v13  ;;  %v294_v53 = vld [vmem:[%s4092_s17 + $0xd8] sm:$0xff] }
  0x27   : > { %527 = vrot.lane.b32.xlu0 %v4123_v8, %s3996_s18  ;;  %v4133_v10 = vpop.eup %3514  ;;  %3526 = vtanh.f32 %v4149_v15  ;;  %v331_v62 = vmul.f32 %v4123_v8, %v4123_v8 }
  0x28   : > { %v4136_v12 = vpop.eup %3516  ;;  %3528 = vtanh.f32 %v4154_v17 }
  0x29   : > { %v4139_v14 = vpop.eup %3518  ;;  %3530 = vtanh.f32 %v4159_v19 }
  0x2a   : > { %v4151_v16 = vpop.eup %3520  ;;  %3532 = vtanh.f32 %v281_v21 }
  0x2b   : > { %v4156_v18 = vpop.eup %3522  ;;  %3534 = vtanh.f32 %v280_v23  ;;  %v339_v63 = vmul.f32 %v4151_v16, %v4151_v16 }
  0x2c   : > { %v4161_v20 = vpop.eup %3524  ;;  %3536 = vtanh.f32 %v279_v25  ;;  %v365_v25 = vsub.f32 %v331_v62, %v4268_v56 }
  0x2d   : > { %537 = vrot.lane.b32.xlu2 %v4133_v10, %s3996_s18  ;;  %v4173_v22 = vpop.eup %3526  ;;  %3538 = vtanh.f32 %v4188_v27 }
  0x2e   : > { %533 = vrot.lane.b32.xlu1 %v4136_v12, %s3996_s18  ;;  %v4176_v24 = vpop.eup %3528  ;;  %3540 = vtanh.f32 %v4193_v29 }
  0x2f   : > { %529 = vrot.lane.b32.xlu0 %v4139_v14, %s3996_s18  ;;  %v4179_v26 = vpop.eup %3530  ;;  %3542 = vtanh.f32 %v282_v31  ;;  %v373_v31 = vsub.f32 %v339_v63, %v4268_v56 }
  0x30   : > { %v4190_v28 = vpop.eup %3532  ;;  %3544 = vtanh.f32 %v287_v33 }
  0x31   : > { %v4195_v30 = vpop.eup %3534  ;;  %3546 = vtanh.f32 %v286_v35 }
  0x32   : > { %v4198_v32 = vpop.eup %3536  ;;  %3548 = vtanh.f32 %v4213_v37 }
  0x33   : > { %v4209_v34 = vpop.eup %3538  ;;  %3550 = vtanh.f32 %v290_v39  ;;  %v405_v39 = vmul.f32 %v4151_v16, %v373_v31 }
  0x34   : > { %v3541_v36 = vpop.eup %3540  ;;  %3552 = vtanh.f32 %v289_v41  ;;  %v439_v41 = vmul.f32 %v4151_v16, %v4273_v60 }
  0x35   : > { %543 = vrot.lane.b32.xlu2 %v4151_v16, %s3996_s18  ;;  %v4215_v38 = vpop.eup %3542  ;;  %3554 = vtanh.f32 %v288_v43  ;;  %v347_v57 = vmul.f32 %v3541_v36, %v3541_v36  ;;  %v447_v23 = vmul.f32 %v3541_v36, %v4273_v60  ;;  %v348_v43 = vmul.f32 %v4209_v34, %v4209_v34 }
  0x36   : > { %541 = vrot.lane.b32.xlu1 %v4156_v18, %s3996_s18  ;;  %7144 = vst [vmem:[#allocation8_spill] sm:$0xff] %v4215_v38  ;;  %v4224_v40 = vpop.eup %3544  ;;  %3556 = vtanh.f32 %v4239_v45 }
  0x37   : > { %539 = vrot.lane.b32.xlu0 %v4161_v20, %s3996_s18  ;;  %v4227_v42 = vpop.eup %3546  ;;  %3558 = vtanh.f32 %v4244_v47  ;;  %v381_v59 = vsub.f32 %v347_v57, %v4268_v56 }
  0x38   : > { %v4230_v44 = vpop.eup %3548  ;;  %3560 = vtanh.f32 %v4249_v49 }
  0x39   : > { %v4241_v46 = vpop.eup %3550  ;;  %3562 = vtanh.f32 %v294_v53  ;;  %v413_v21 = vmul.f32 %v3541_v36, %v381_v59  ;;  %v431_v53 = vmul.f32 %v4123_v8, %v4273_v60 }
  0x3a   : > { %v4246_v48 = vpop.eup %3552 }
  0x3b   : > { %v4251_v50 = vpop.eup %3554  ;;  %v479_v35 = vsub.f32 %v413_v21, %v447_v23 }
  0x3c   : > { %v4262_v51 = vpop.eup %3556 }
  0x3d   : > { %549 = vrot.lane.b32.xlu2 %v4173_v22, %s3996_s18  ;;  %v3559_v52 = vpop.eup %3558 }
  0x3e   : > { %547 = vrot.lane.b32.xlu1 %v4176_v24, %s3996_s18  ;;  %v3561_v54 = vpop.eup %3560  ;;  %v456_v23 = vmul.f32 %v3559_v52, %v4273_v60 }
  0x3f   : > { %545 = vrot.lane.b32.xlu0 %v4179_v26, %s3996_s18  ;;  %v355_v55 = vmul.f32 %v3561_v54, %v3561_v54  ;;  %v4275_v61 = vpop.eup %3562  ;;  %v455_v13 = vmul.f32 %v3561_v54, %v4273_v60 }
  0x41   : > { %v389_v58 = vsub.f32 %v355_v55, %v4268_v56  ;;  %v382_v55 = vsub.f32 %v348_v43, %v4268_v56 }
  0x43   : > { %v421_v11 = vmul.f32 %v3561_v54, %v389_v58  ;;  %v414_v16 = vmul.f32 %v4209_v34, %v382_v55 }
  0x45   : > { %555 = vrot.lane.b32.xlu2 %v4190_v28, %s3996_s18  ;;  %v487_v33 = vsub.f32 %v421_v11, %v455_v13  ;;  %v340_v11 = vmul.f32 %v4179_v26, %v4179_v26 }
  0x46   : > { %553 = vrot.lane.b32.xlu1 %v4195_v30, %s3996_s18 }
  0x47   : > { %551 = vrot.lane.b32.xlu0 %v4198_v32, %s3996_s18 }
  0x4d   : > { %561 = vrot.lane.b32.xlu2 %v4209_v34, %s3996_s18 }
  0x4e   : > { %559 = vrot.lane.b32.xlu1 %v3541_v36, %s3996_s18  ;;  %v397_v36 = vmul.f32 %v4123_v8, %v365_v25 }
  0x4f   : > { %557 = vrot.lane.b32.xlu0 %v4215_v38, %s3996_s18 }
  0x50   : > { %v463_v57 = vsub.f32 %v397_v36, %v431_v53  ;;  %v432_v53 = vmul.f32 %v4139_v14, %v4273_v60 }
  0x55   : > { %567 = vrot.lane.b32.xlu2 %v4224_v40, %s3996_s18 }
  0x56   : > { %565 = vrot.lane.b32.xlu1 %v4227_v42, %s3996_s18 }
  0x57   : > { %563 = vrot.lane.b32.xlu0 %v4230_v44, %s3996_s18 }
  0x5d   : > { %573 = vrot.lane.b32.xlu2 %v4241_v46, %s3996_s18 }
  0x5e   : > { %571 = vrot.lane.b32.xlu1 %v4246_v48, %s3996_s18 }
  0x5f   : > { %569 = vrot.lane.b32.xlu0 %v4251_v50, %s3996_s18 }
  0x65   : > { %579 = vrot.lane.b32.xlu2 %v4262_v51, %s3996_s18 }
  0x66   : > { %577 = vrot.lane.b32.xlu1 %v3559_v52, %s3996_s18 }
  0x67   : > { %575 = vrot.lane.b32.xlu0 %v3561_v54, %s3996_s18  ;;  %v471_v54 = vsub.f32 %v405_v39, %v439_v41  ;;  %v357_v39 = vmul.f32 %v4262_v51, %v4262_v51 }
  0x6d   : > { %703 = vrot.lane.b32.xlu2 %v389_v58, %s3997_s26  ;;  %v448_v58 = vmul.f32 %v4209_v34, %v4273_v60  ;;  %v332_v34 = vmul.f32 %v4139_v14, %v4139_v14 }
  0x6e   : > { %687 = vrot.lane.b32.xlu1 %v381_v59, %s3997_s26  ;;  %v356_v59 = vmul.f32 %v3559_v52, %v3559_v52 }
  0x6f   : > { %581 = vrot.lane.b32.xlu0 %v4275_v61, %s3996_s18  ;;  %v480_v8 = vsub.f32 %v414_v16, %v448_v58 }
  0x70   : > { %v390_v63 = vsub.f32 %v356_v59, %v4268_v56  ;;  %v333_v59 = vmul.f32 %v4118_v7, %v4118_v7 }
  0x72   : > { %v422_v21 = vmul.f32 %v3559_v52, %v390_v63  ;;  %v440_v52 = vmul.f32 %v4179_v26, %v4273_v60 }
  0x75   : > { %655 = vrot.lane.b32.xlu2 %v365_v25, %s3997_s26  ;;  %v374_v25 = vsub.f32 %v340_v11, %v4268_v56 }
  0x76   : > { %831 = vrot.lane.b32.xlu1 %v487_v33, %s3998_s28  ;;  %v488_v33 = vsub.f32 %v422_v21, %v456_v23 }
  0x77   : > { %815 = vrot.lane.b32.xlu0 %v479_v35, %s3998_s28  ;;  %v349_v35 = vmul.f32 %v4230_v44, %v4230_v44  ;;  %v406_v41 = vmul.f32 %v4179_v26, %v374_v25  ;;  %v457_v26 = vmul.f32 %v4262_v51, %v4273_v60 }
  0x7d   : > { %799 = vrot.lane.b32.xlu2 %v471_v54, %s3998_s28  ;;  %v383_v54 = vsub.f32 %v349_v35, %v4268_v56 }
  0x7e   : > { %783 = vrot.lane.b32.xlu1 %v463_v57, %s3998_s28  ;;  %v472_v57 = vsub.f32 %v406_v41, %v440_v52 }
  0x7f   : > { %671 = vrot.lane.b32.xlu0 %v373_v31, %s3997_s26  ;;  %v4307_v62 = vpop.permute.xlu2 %535  ;;  %v366_v31 = vsub.f32 %v332_v34, %v4268_v56 }
  0x81   : > { %v398_v36 = vmul.f32 %v4139_v14, %v366_v31  ;;  %v415_v14 = vmul.f32 %v4230_v44, %v383_v54 }
  0x83   : > { %v464_v16 = vsub.f32 %v398_v36, %v432_v53  ;;  %v350_v36 = vmul.f32 %v4227_v42, %v4227_v42 }
  0x85   : > { %817 = vrot.lane.b32.xlu2 %v480_v8, %s3998_s28  ;;  %v449_v8 = vmul.f32 %v4230_v44, %v4273_v60  ;;  %v341_v44 = vmul.f32 %v4176_v24, %v4176_v24 }
  0x86   : > { %705 = vrot.lane.b32.xlu1 %v390_v63, %s3997_s26 }
  0x87   : > { %689 = vrot.lane.b32.xlu0 %v382_v55, %s3997_s26  ;;  %v4317_v13 = vpop.permute.xlu2 %537  ;;  %v391_v55 = vsub.f32 %v357_v39, %v4268_v56  ;;  %v481_v23 = vsub.f32 %v415_v14, %v449_v8  ;;  %v375_v52 = vsub.f32 %v341_v44, %v4268_v56  ;;  %v334_v14 = vmul.f32 %v4136_v12, %v4136_v12 }
  0x89   : > { %v423_v58 = vmul.f32 %v4262_v51, %v391_v55  ;;  %v367_v51 = vsub.f32 %v333_v59, %v4268_v56  ;;  %v368_v44 = vsub.f32 %v334_v14, %v4268_v56 }
  0x8b   : > { %v489_v21 = vsub.f32 %v423_v58, %v457_v26  ;;  %v384_v26 = vsub.f32 %v350_v36, %v4268_v56  ;;  %v434_v36 = vmul.f32 %v4136_v12, %v4273_v60 }
  0x8d   : > { %673 = vrot.lane.b32.xlu2 %v374_v25, %s3997_s26  ;;  %v399_v25 = vmul.f32 %v4118_v7, %v367_v51 }
  0x8e   : > { %657 = vrot.lane.b32.xlu1 %v366_v31, %s3997_s26  ;;  %v433_v31 = vmul.f32 %v4118_v7, %v4273_v60  ;;  %v358_v7 = vmul.f32 %v4275_v61, %v4275_v61 }
  0x8f   : > { %833 = vrot.lane.b32.xlu0 %v488_v33, %s3998_s28  ;;  %v4332_v43 = vpop.permute.xlu2 %543 }
  0x90   : > { %v465_v41 = vsub.f32 %v399_v25, %v433_v31  ;;  %v392_v58 = vsub.f32 %v358_v7, %v4268_v56 }
  0x92   : > { %v424_v8 = vmul.f32 %v4275_v61, %v392_v58 }
  0x95   : > { %691 = vrot.lane.b32.xlu2 %v383_v54, %s3997_s26  ;;  %v407_v54 = vmul.f32 %v4176_v24, %v375_v52 }
  0x96   : > { %801 = vrot.lane.b32.xlu1 %v472_v57, %s3998_s28 }
  0x97   : > { %785 = vrot.lane.b32.xlu0 %v464_v16, %s3998_s28  ;;  %v4350_v63 = vpop.permute.xlu2 %549 }
  0x98   : > { %v4352_v11 = vpop.permute.xlu1 %531 }
  0x99   : > { %v4354_v34 = vpop.permute.xlu0 %527 }
  0x9d   : > { %835 = vrot.lane.b32.xlu2 %v489_v21, %s3998_s28 }
  0x9e   : > { %819 = vrot.lane.b32.xlu1 %v481_v23, %s3998_s28  ;;  %v450_v23 = vmul.f32 %v4227_v42, %v4273_v60 }
  0x9f   : > { %707 = vrot.lane.b32.xlu0 %v391_v55, %s3997_s26  ;;  %v4365_v33 = vpop.permute.xlu2 %555  ;;  %v441_v55 = vmul.f32 %v4176_v24, %v4273_v60  ;;  %v458_v24 = vmul.f32 %v4275_v61, %v4273_v60  ;;  %v400_v61 = vmul.f32 %v4136_v12, %v368_v44 }
  0xa0   : > { %7145 = vst [vmem:[#allocation9_spill] sm:$0xff] %v4365_v33  ;;  %v4367_v35 = vpop.permute.xlu1 %533 }
  0xa1   : > { %v4369_v39 = vpop.permute.xlu0 %529  ;;  %v473_v59 = vsub.f32 %v407_v54, %v441_v55  ;;  %v342_v54 = vmul.f32 %v4173_v22, %v4173_v22 }
  0xa3   : > { %v376_v14 = vsub.f32 %v342_v54, %v4268_v56 }
  0xa5   : > { %787 = vrot.lane.b32.xlu2 %v465_v41, %s3998_s28  ;;  %v490_v41 = vsub.f32 %v424_v8, %v458_v24  ;;  %v351_v8 = vmul.f32 %v4224_v40, %v4224_v40 }
  0xa6   : > { %675 = vrot.lane.b32.xlu1 %v375_v52, %s3997_s26  ;;  %v295_v52 = vld [vmem:[%s4092_s17 + $0xe0] sm:$0xff] }
  0xa7   : > { %659 = vrot.lane.b32.xlu0 %v367_v51, %s3997_s26  ;;  %v4379_v53 = vpop.permute.xlu2 %561  ;;  %v416_v51 = vmul.f32 %v4227_v42, %v384_v26  ;;  %3564 = vtanh.f32 %v295_v52 }
  0xa8   : > { %v4384_v57 = vpop.permute.xlu1 %541 }
  0xa9   : > { %7146 = vst [vmem:[#allocation10_spill] sm:$0xff] %v4384_v57  ;;  %v4386_v16 = vpop.permute.xlu0 %539  ;;  %v482_v7 = vsub.f32 %v416_v51, %v450_v23  ;;  %v408_v51 = vmul.f32 %v4173_v22, %v376_v14  ;;  %v442_v23 = vmul.f32 %v4173_v22, %v4273_v60  ;;  %v1628_v57 = vld [vmem:[%s7105_s2 + $0x50] sm:$0xff] }
  0xaa   : > { %7147 = vst [vmem:[#allocation11_spill] sm:$0xff] %v4386_v16  ;;  %v1622_v16 = vld [vmem:[%s7105_s2 + $0x20] sm:$0xff] }
  0xad   : > { %709 = vrot.lane.b32.xlu2 %v392_v58, %s3997_s26 }
  0xae   : > { %693 = vrot.lane.b32.xlu1 %v384_v26, %s3997_s26  ;;  %v466_v26 = vsub.f32 %v400_v61, %v434_v36  ;;  %v474_v61 = vsub.f32 %v408_v51, %v442_v23  ;;  %v335_v36 = vmul.f32 %v4115_v6, %v4115_v6 }
  0xaf   : > { %803 = vrot.lane.b32.xlu0 %v473_v59, %s3998_s28  ;;  %v4398_v21 = vpop.permute.xlu2 %567  ;;  %v3565_v59 = vpop.eup %3564 }
  0xb0   : > { %7148 = vst [vmem:[#allocation12_spill] sm:$0xff] %v4398_v21  ;;  %v4403_v25 = vpop.permute.xlu1 %547  ;;  %v359_v12 = vmul.f32 %v3565_v59, %v3565_v59  ;;  %v459_v22 = vmul.f32 %v3565_v59, %v4273_v60  ;;  %v369_v23 = vsub.f32 %v335_v36, %v4268_v56  ;;  %v435_v36 = vmul.f32 %v4115_v6, %v4273_v60 }
  0xb1   : > { %v4405_v31 = vpop.permute.xlu0 %545 }
  0xb2   : > { %v393_v52 = vsub.f32 %v359_v12, %v4268_v56  ;;  %v451_v12 = vmul.f32 %v4224_v40, %v4273_v60 }
  0xb4   : > { %v425_v54 = vmul.f32 %v3565_v59, %v393_v52 }
  0xb5   : > { %661 = vrot.lane.b32.xlu2 %v368_v44, %s3997_s26 }
  0xb6   : > { %837 = vrot.lane.b32.xlu1 %v490_v41, %s3998_s28 }
  0xb7   : > { %821 = vrot.lane.b32.xlu0 %v482_v7, %s3998_s28  ;;  %v4415_v42 = vpop.permute.xlu2 %573  ;;  %v385_v7 = vsub.f32 %v351_v8, %v4268_v56 }
  0xb8   : > { %7149 = vst [vmem:[#allocation13_spill] sm:$0xff] %v4415_v42  ;;  %v4419_v55 = vpop.permute.xlu1 %553  ;;  %v1626_v42 = vld [vmem:[%s7105_s2 + $0x40] sm:$0xff] }
  0xb9   : > { %7150 = vst [vmem:[#allocation14_spill] sm:$0xff] %v4419_v55  ;;  %v4421_v58 = vpop.permute.xlu0 %551 }
  0xba   : > { %7151 = vst [vmem:[#allocation15_spill] sm:$0xff] %v4421_v58  ;;  %v452_v58 = vmul.f32 %v4251_v50, %v4273_v60 }
  0xbd   : > { %789 = vrot.lane.b32.xlu2 %v466_v26, %s3998_s28 }
  0xbe   : > { %583 = vrot.lane.b32.xlu1 %v3565_v59, %s3996_s18  ;;  %v491_v59 = vsub.f32 %v425_v54, %v459_v22  ;;  %v1631_v54 = vld [vmem:[%s7105_s2 + $0x68] sm:$0xff] }
  0xbf   : > { %677 = vrot.lane.b32.xlu0 %v376_v14, %s3997_s26  ;;  %v4429_v24 = vpop.permute.xlu2 %579  ;;  %v417_v14 = vmul.f32 %v4224_v40, %v385_v7  ;;  %v401_v40 = vmul.f32 %v4115_v6, %v369_v23  ;;  %v1630_v6 = vld [vmem:[%s7105_s2 + $0x60] sm:$0xff] }
  0xc0   : > { %v4434_v44 = vpop.permute.xlu1 %559 }
  0xc1   : > { %v4436_v41 = vpop.permute.xlu0 %557 }
  0xc2   : > { %7152 = vst [vmem:[#allocation16_spill] sm:$0xff] %v4436_v41  ;;  %v296_v41 = vld [vmem:[%s4092_s17 + $0xe8] sm:$0xff] }
  0xc3   : > { %3566 = vtanh.f32 %v296_v41 }
  0xc5   : > { %711 = vrot.lane.b32.xlu2 %v393_v52, %s3997_s26  ;;  %v1633_v52 = vld [vmem:[%s7105_s2 + $0x78] sm:$0xff] }
  0xc6   : > { %695 = vrot.lane.b32.xlu1 %v385_v7, %s3997_s26  ;;  %3403 = vmatpush.msra.mxu2 %v1633_v52  ;;  %v1632_v7 = vld [vmem:[%s7105_s2 + $0x70] sm:$0xff] }
  0xc7   : > { %805 = vrot.lane.b32.xlu0 %v474_v61, %s3998_s28  ;;  %v4446_v26 = vpop.permute.xlu2 %703  ;;  %3404 = vmatpush.msra.mxu3 %v1633_v52  ;;  %v483_v61 = vsub.f32 %v417_v14, %v451_v12  ;;  %v343_v14 = vmul.f32 %v4198_v32, %v4198_v32 }
  0xc8   : > { %v4451_v8 = vpop.permute.xlu1 %565  ;;  %1638 = vmatpush.msra.mxu0 %v1633_v52  ;;  %3402 = vmatpush.msra.mxu1 %v1633_v52  ;;  %v1629_v52 = vld [vmem:[%s7105_s2 + $0x58] sm:$0xff] }
  0xc9   : > { %7153 = vst [vmem:[#allocation17_spill] sm:$0xff] %v4451_v8  ;;  %v4453_v51 = vpop.permute.xlu0 %563  ;;  %3406 = vmatpush.msra.mxu2 %v1632_v7  ;;  %3407 = vmatpush.msra.mxu3 %v1632_v7 }
  0xca   : > { %1639 = vmatpush.msra.mxu0 %v1632_v7  ;;  %3405 = vmatpush.msra.mxu1 %v1632_v7 }
  0xcb   : > { %3409 = vmatpush.msra.mxu2 %v1631_v54  ;;  %3410 = vmatpush.msra.mxu3 %v1631_v54 }
  0xcc   : > { %1640 = vmatpush.msra.mxu0 %v1631_v54  ;;  %3408 = vmatpush.msra.mxu1 %v1631_v54 }
  0xcd   : > { %663 = vrot.lane.b32.xlu2 %v369_v23, %s3997_s26  ;;  %3412 = vmatpush.msra.mxu2 %v1630_v6  ;;  %v467_v23 = vsub.f32 %v401_v40, %v435_v36  ;;  %v1627_v40 = vld [vmem:[%s7105_s2 + $0x48] sm:$0xff]  ;;  %v352_v36 = vmul.f32 %v4251_v50, %v4251_v50 }
  0xce   : > { %839 = vrot.lane.b32.xlu1 %v491_v59, %s3998_s28  ;;  %3413 = vmatpush.msra.mxu3 %v1630_v6  ;;  %v3567_v59 = vpop.eup %3566 }
  0xcf   : > { %823 = vrot.lane.b32.xlu0 %v483_v61, %s3998_s28  ;;  %v4472_v22 = vpop.permute.xlu2 %655  ;;  %3415 = vmatpush.msra.mxu2 %v1629_v52  ;;  %v377_v61 = vsub.f32 %v343_v14, %v4268_v56  ;;  %v360_v7 = vmul.f32 %v3567_v59, %v3567_v59 }
  0xd0   : > { %v4479_v41 = vpop.permute.xlu1 %571  ;;  %3416 = vmatpush.msra.mxu3 %v1629_v52  ;;  %1641 = vmatpush.msra.mxu0 %v1630_v6 }
  0xd1   : > { %7154 = vst [vmem:[#allocation18_spill] sm:$0xff] %v4479_v41  ;;  %v4481_v12 = vpop.permute.xlu0 %569  ;;  %3418 = vmatpush.msra.mxu2 %v1628_v57  ;;  %v409_v14 = vmul.f32 %v4198_v32, %v377_v61  ;;  %3411 = vmatpush.msra.mxu1 %v1630_v6  ;;  %v394_v55 = vsub.f32 %v360_v7, %v4268_v56  ;;  %v1624_v6 = vld [vmem:[%s7105_s2 + $0x30] sm:$0xff] }
  0xd2   : > { %7155 = vst [vmem:[#allocation19_spill] sm:$0xff] %v4481_v12  ;;  %3419 = vmatpush.msra.mxu3 %v1628_v57  ;;  %1642 = vmatpush.msra.mxu0 %v1629_v52  ;;  %v336_v7 = vmul.f32 %v4133_v10, %v4133_v10 }
  0xd3   : > { %3421 = vmatpush.msra.mxu2 %v1627_v40  ;;  %3414 = vmatpush.msra.mxu1 %v1629_v52  ;;  %v426_v52 = vmul.f32 %v3567_v59, %v394_v55 }
  0xd4   : > { %3422 = vmatpush.msra.mxu3 %v1627_v40  ;;  %1643 = vmatpush.msra.mxu0 %v1628_v57 }
  0xd5   : > { %791 = vrot.lane.b32.xlu2 %v467_v23, %s3998_s28  ;;  %v443_v23 = vmul.f32 %v4198_v32, %v4273_v60  ;;  %3424 = vmatpush.msra.mxu2 %v1626_v42  ;;  %v386_v32 = vsub.f32 %v352_v36, %v4268_v56  ;;  %v1623_v36 = vld [vmem:[%s7105_s2 + $0x28] sm:$0xff] }
  0xd6   : > { %585 = vrot.lane.b32.xlu1 %v3567_v59, %s3996_s18  ;;  %3425 = vmatpush.msra.mxu3 %v1626_v42 }
  0xd7   : > { %679 = vrot.lane.b32.xlu0 %v377_v61, %s3997_s26  ;;  %v4498_v54 = vpop.permute.xlu2 %799  ;;  %v1625_v61 = vld [vmem:[%s7105_s2 + $0x38] sm:$0xff]  ;;  %v475_v12 = vsub.f32 %v409_v14, %v443_v23  ;;  %3417 = vmatpush.msra.mxu1 %v1628_v57  ;;  %v460_v14 = vmul.f32 %v3567_v59, %v4273_v60  ;;  %v418_v23 = vmul.f32 %v4251_v50, %v386_v32 }
  0xd8   : > { %v4506_v33 = vpop.permute.xlu1 %577  ;;  %3427 = vmatpush.msra.mxu2 %v1625_v61  ;;  %3428 = vmatpush.msra.mxu3 %v1625_v61  ;;  %v1621_v59 = vld [vmem:[%s7105_s2 + $0x18] sm:$0xff] }
  0xd9   : > { %v576_v41 = vpop.permute.xlu0 %575  ;;  %1644 = vmatpush.msra.mxu0 %v1627_v40  ;;  %3420 = vmatpush.msra.mxu1 %v1627_v40  ;;  %v492_v50 = vsub.f32 %v426_v52, %v460_v14  ;;  %v484_v38 = vsub.f32 %v418_v23, %v452_v58  ;;  %v4545_v40 = vld [vmem:[%s7105_s2 + $0x10] sm:$0xff]  ;;  %v4558_v58 = vld [vmem:[%s7105_s2 + $0x8] sm:$0xff] }
  0xda   : > { %3430 = vmatpush.msra.mxu2 %v1624_v6  ;;  %3431 = vmatpush.msra.mxu3 %v1624_v6  ;;  %v904_v8 = vsel %vm879_vm0, %v4249_v49, %v576_v41 }
  0xdb   : > { %1645 = vmatpush.msra.mxu0 %v1626_v42  ;;  %3423 = vmatpush.msra.mxu1 %v1626_v42  ;;  %v436_v42 = vmul.f32 %v4133_v10, %v4273_v60  ;;  %v937_v49 = vsel %vm912_vm1, %v904_v8, %v4446_v26  ;;  %v896_v26 = vsel %vm879_vm0, %v4193_v29, %v4434_v44 }
  0xdc   : > { %3433 = vmatpush.msra.mxu2 %v1623_v36  ;;  %3434 = vmatpush.msra.mxu3 %v1623_v36 }
  0xdd   : > { %713 = vrot.lane.b32.xlu2 %v394_v55, %s3997_s26  ;;  %1646 = vmatpush.msra.mxu0 %v1625_v61 }
  0xde   : > { %697 = vrot.lane.b32.xlu1 %v386_v32, %s3997_s26  ;;  %3436 = vmatpush.msra.mxu2 %v1622_v16  ;;  %v297_v32 = vld [vmem:[%s4092_s17 + $0xf0] sm:$0xff] }
  0xdf   : > { %807 = vrot.lane.b32.xlu0 %v475_v12, %s3998_s28  ;;  %v4525_v57 = vpop.permute.xlu2 %817  ;;  %v370_v12 = vsub.f32 %v336_v7, %v4268_v56  ;;  %3437 = vmatpush.msra.mxu3 %v1622_v16  ;;  %3568 = vtanh.f32 %v297_v32  ;;  %v4598_v32 = vsel %vm879_vm0, %v4107_v3, %v4317_v13  ;;  %v4612_v3 = vsel %vm879_vm0, %v4149_v15, %v4350_v63 }
  0xe0   : > { %v688_v21 = vpop.permute.xlu1 %687  ;;  %3439 = vmatpush.msra.mxu2 %v1621_v59  ;;  %3426 = vmatpush.msra.mxu1 %v1625_v61  ;;  %v4572_v61 = vld [vmem:[%s7105_s2] sm:$0xff]  ;;  %v337_v13 = vmul.f32 %v4161_v20, %v4161_v20  ;;  %v345_v63 = vmul.f32 %v4190_v28, %v4190_v28 }
  0xe1   : > { %v4533_v55 = vpop.permute.xlu0 %581  ;;  %3440 = vmatpush.msra.mxu3 %v1621_v59  ;;  %v402_v7 = vmul.f32 %v4133_v10, %v370_v12  ;;  %1647 = vmatpush.msra.mxu0 %v1624_v6  ;;  %v344_v10 = vmul.f32 %v4195_v30, %v4195_v30 }
  0xe2   : > { %3442 = vmatpush.msra.mxu2 %v4545_v40  ;;  %3429 = vmatpush.msra.mxu1 %v1624_v6 }
  0xe3   : > { %3443 = vmatpush.msra.mxu3 %v4545_v40  ;;  %1648 = vmatpush.msra.mxu0 %v1623_v36  ;;  %v468_v23 = vsub.f32 %v402_v7, %v436_v42  ;;  %v298_v42 = vld [vmem:[%s4092_s17 + $0xf8] sm:$0xff] }
  0xe4   : > { %3445 = vmatpush.msra.mxu2 %v4558_v58  ;;  %3432 = vmatpush.msra.mxu1 %v1623_v36  ;;  %v4593_v36 = vsel %vm879_vm0, %v4095_v0, %v4307_v62  ;;  %v444_v0 = vmul.f32 %v4195_v30, %v4273_v60  ;;  %v880_v62 = vsel %vm879_vm0, %v4101_v2, %v4354_v34 }
  0xe5   : > { %665 = vrot.lane.b32.xlu2 %v370_v12, %s3997_s26  ;;  %3446 = vmatpush.msra.mxu3 %v4558_v58  ;;  %v3569_v6 = vpop.eup %3568  ;;  %v378_v12 = vsub.f32 %v344_v10, %v4268_v56  ;;  %v4632_v2 = vsel %vm879_vm0, %v4098_v1, %v4352_v11  ;;  %v4637_v34 = vsel %vm879_vm0, %v4110_v4, %v4367_v35 }
  0xe6   : > { %841 = vrot.lane.b32.xlu1 %v492_v50, %s3998_s28  ;;  %1649 = vmatpush.msra.mxu0 %v1622_v16  ;;  %v353_v50 = vmul.f32 %v4246_v48, %v4246_v48  ;;  %v361_v7 = vmul.f32 %v3569_v6, %v3569_v6 }
  0xe7   : > { %825 = vrot.lane.b32.xlu0 %v484_v38, %s3998_s28  ;;  %v4561_v41 = vpop.permute.xlu2 %673  ;;  %v929_v38 = vsel %vm912_vm1, %v896_v26, %v688_v21  ;;  %3448 = vmatpush.msra.mxu2 %v4572_v61 }
  0xe8   : > { %v832_v8 = vpop.permute.xlu1 %831  ;;  %3449 = vmatpush.msra.mxu3 %v4572_v61  ;;  %3435 = vmatpush.msra.mxu1 %v1622_v16  ;;  %v888_v16 = vsel %vm879_vm0, %v4131_v9, %v4332_v43  ;;  %v387_v15 = vsub.f32 %v353_v50, %v4268_v56  ;;  %v395_v10 = vsub.f32 %v361_v7, %v4268_v56 }
  0xe9   : > { %v4576_v52 = vsel %vm945_vm2, %v937_v49, %v832_v8  ;;  %v816_v14 = vpop.permute.xlu0 %815  ;;  %1650 = vmatpush.msra.mxu0 %v1621_v59  ;;  %v410_v49 = vmul.f32 %v4195_v30, %v378_v12  ;;  %v913_v30 = vsel %vm912_vm1, %v880_v62, %v4472_v22 }
  0xea   : > { %v3356_v29 = vmul.f32 -1.442695, %v4576_v52  ;;  %v4582_v44 = vsel %vm945_vm2, %v929_v38, %v816_v14  ;;  %3438 = vmatpush.msra.mxu1 %v1621_v59  ;;  %v4647_v11 = vmul.f32 %v4246_v48, %v387_v15  ;;  %v453_v38 = vmul.f32 %v4246_v48, %v4273_v60 }
  0xeb   : > { %v3348_v21 = vmul.f32 -1.442695, %v4582_v44  ;;  %1651 = vmatpush.msra.mxu0 %v4545_v40  ;;  %v476_v1 = vsub.f32 %v410_v49, %v444_v0  ;;  %v371_v14 = vsub.f32 %v337_v13, %v4268_v56  ;;  %v427_v48 = vmul.f32 %v3569_v6, %v395_v10 }
  0xec   : > { %3570 = vpow2.f32 %v3356_v29  ;;  %3441 = vmatpush.msra.mxu1 %v4545_v40  ;;  %v898_v0 = vsel %vm879_vm0, %v4213_v37, %v4453_v51 }
  0xed   : > { %3572 = vpow2.f32 %v3348_v21  ;;  %793 = vrot.lane.b32.xlu2 %v468_v23, %s3998_s28  ;;  %1652 = vmatpush.msra.mxu0 %v4558_v58  ;;  %v4663_v21 = vsub.f32 %v345_v63, %v4268_v56 }
  0xee   : > { %587 = vrot.lane.b32.xlu1 %v3569_v6, %s3996_s18  ;;  %3574 = vtanh.f32 %v298_v42  ;;  %3444 = vmatpush.msra.mxu1 %v4558_v58  ;;  %v4692_v42 = vsel %vm879_vm0, %v4113_v5, %v4369_v39  ;;  %v889_v5 = vsel %vm879_vm0, %v4159_v19, %v4405_v31  ;;  %v485_v19 = vsub.f32 %v4647_v11, %v453_v38 }
  0xef   : > { %681 = vrot.lane.b32.xlu0 %v378_v12, %s3997_s26  ;;  %v4618_v9 = vpop.permute.xlu2 %691  ;;  %1653 = vmatpush.msra.mxu0 %v4572_v61  ;;  %v461_v12 = vmul.f32 %v3569_v6, %v4273_v60  ;;  %v4683_v7 = vmul.f32 %v4190_v28, %v4663_v21  ;;  %v4687_v6 = vmul.f32 %v4190_v28, %v4273_v60 }
  0xf0   : > { %v784_v43 = vpop.permute.xlu1 %783  ;;  %3447 = vmatpush.msra.mxu1 %v4572_v61  ;;  %v4679_v61 = vmul.f32 %v4161_v20, %v4273_v60  ;;  %v4705_v28 = vsel %vm879_vm0, %v4154_v17, %v4403_v25  ;;  %v905_v17 = vsel %vm879_vm0, %v4244_v47, %v4506_v33 }
  0xf1   : > { %v672_v22 = vpop.permute.xlu0 %671  ;;  %v4640_v59 = vsel %vm945_vm2, %v913_v30, %v784_v43  ;;  %v493_v31 = vsub.f32 %v427_v48, %v461_v12  ;;  %v477_v37 = vsub.f32 %v4683_v7, %v4687_v6  ;;  %v4867_v7 = vmul.f32 %v4156_v18, %v4273_v60 }
  0xf2   : > { %v3571_v26 = vpop.eup %3570  ;;  %v921_v40 = vsel %vm912_vm1, %v888_v16, %v672_v22  ;;  %v3332_v8 = vmul.f32 -1.442695, %v4640_v59  ;;  %v897_v16 = vsel %vm879_vm0, %v4188_v27, %v4379_v53  ;;  %v4713_v27 = vsel %vm879_vm0, %v4239_v45, %v4429_v24 }
  0xf3   : > { %v3573_v4 = vpop.eup %3572  ;;  %v4650_v35 = vadd.f32 1.0, %v3571_v26  ;;  %v4658_v23 = vsel %vm945_vm2, %v921_v40, %v4498_v54  ;;  %v4671_v54 = vmul.f32 %v4161_v20, %v371_v14  ;;  %v354_v53 = vmul.f32 %v4241_v46, %v4241_v46 }
  0xf4   : > { %v4660_v29 = vadd.f32 1.0, %v3573_v4  ;;  %3576 = vpow2.f32 %v3332_v8  ;;  %v3340_v58 = vmul.f32 -1.442695, %v4658_v23  ;;  %v4673_v50 = vpop.eup %3574  ;;  %v4726_v45 = vsel %vm912_vm1, %v889_v5, %v4561_v41 }
  0xf5   : > { %3578 = vrcp.f32 %v4650_v35  ;;  %715 = vrot.lane.b32.xlu2 %v395_v10, %s3997_s26  ;;  %v362_v49 = vmul.f32 %v4673_v50, %v4673_v50  ;;  %v469_v13 = vsub.f32 %v4671_v54, %v4679_v61  ;;  %v1475_v47 = vand.u32 2147483647, %v4650_v35 }
  0xf6   : > { %3580 = vrcp.f32 %v4660_v29  ;;  %699 = vrot.lane.b32.xlu1 %v387_v15, %s3997_s26  ;;  %v1477_v63 = vand.u32 2147483648, %v4650_v35  ;;  %v4746_v22 = vsub.f32 %v354_v53, %v4268_v56  ;;  %v4751_v40 = vsel %vm912_vm1, %v898_v0, %v4618_v9 }
  0xf7   : > { %809 = vrot.lane.b32.xlu0 %v476_v1, %s3998_s28  ;;  %v4698_v20 = vpop.permute.xlu2 %835  ;;  %3582 = vpow2.f32 %v3340_v58  ;;  %v4737_v33 = vsub.f32 %v362_v49, %v4268_v56  ;;  %vm1471_vm3 = vweird.f32 %v4650_v35  ;;  %v1355_v8 = vand.u32 2147483647, %v4660_v29 }
  0xf8   : > { %v706_v39 = vpop.permute.xlu1 %705  ;;  %v1357_v1 = vand.u32 2147483648, %v4660_v29  ;;  %vm1351_vm4 = vweird.f32 %v4660_v29  ;;  %vm4766_vm5 = vcmp.eq.f32.partialorder %v1475_v47, 8.507059e+37  ;;  %v1478_v12 = vor.u32 1.1754944e-38, %v1477_v63 }
  0xf9   : > { %v690_v25 = vpop.permute.xlu0 %689  ;;  %v938_v54 = vsel %vm912_vm1, %v905_v17, %v706_v39  ;;  %v4774_v49 = vmul.f32 %v4241_v46, %v4746_v22  ;;  %vm4779_vm8 = vcmp.eq.f32.partialorder %v1355_v8, 8.507059e+37  ;;  %v4789_v17 = vmul.f32 %v4241_v46, %v4273_v60 }
  0xfa   : > { %v3577_v62 = vpop.eup %3576  ;;  %v930_v24 = vsel %vm912_vm1, %v897_v16, %v690_v25  ;;  %v1358_v0 = vor.u32 1.1754944e-38, %v1357_v1 }
  0xfb   : > { %v3579_v51 = vpop.eup %3578  ;;  %v4733_v30 = vadd.f32 1.0, %v3577_v62  ;;  %v4741_v41 = vsel %vm945_vm2, %v930_v24, %v4525_v57  ;;  %v338_v62 = vmul.f32 %v4156_v18, %v4156_v18 }
  0xfc   : > { %v3581_v43 = vpop.eup %3580  ;;  %v1467_v15 = vmul.f32 %v3579_v51, %v4650_v35  ;;  %v3349_v10 = vmul.f32 -1.442695, %v4741_v41  ;;  %vm1472_vm6 = vweird.f32 %v3579_v51  ;;  %v4802_v35 = vmul.f32 %v4673_v50, %v4273_v60 }
  0xfd   : > { %v3583_v26 = vpop.eup %3582  ;;  %3584 = vrcp.f32 %v4733_v30  ;;  %667 = vrot.lane.b32.xlu2 %v371_v14, %s3997_s26  ;;  %v1347_v57 = vmul.f32 %v3581_v43, %v4660_v29  ;;  %vm1352_vm7 = vweird.f32 %v3581_v43  ;;  %vm1473_vm9 = vmor %vm1471_vm3, %vm1472_vm6  ;;  %vm1111_vm11 = vweird.f32 %v4733_v30 }
  0xfe   : > { %843 = vrot.lane.b32.xlu1 %v493_v31, %s3998_s28  ;;  %v1468_v11 = vsub.f32 1.0, %v1467_v15  ;;  %v4760_v4 = vadd.f32 1.0, %v3583_v26  ;;  %3586 = vpow2.f32 %v3349_v10  ;;  %vm1353_vm10 = vmor %vm1351_vm4, %vm1352_vm7  ;;  %v4798_v15 = vmul.f32 %v4673_v50, %v4737_v33 }
  0xff   : > { %827 = vrot.lane.b32.xlu0 %v485_v19, %s3998_s28  ;;  %v4763_v9 = vpop.permute.xlu2 %787  ;;  %v1348_v38 = vsub.f32 1.0, %v1347_v57 }
 0x100   : > { %v658_v58 = vpop.permute.xlu1 %657  ;;  %v1469_v48 = vmul.f32 %v3579_v51, %v1468_v11  ;;  %3588 = vrcp.f32 %v4760_v4  ;;  %v1115_v11 = vand.u32 2147483647, %v4733_v30  ;;  %vm1231_vm3 = vweird.f32 %v4760_v4 }
 0x101   : > { %v834_v61 = vpop.permute.xlu0 %833  ;;  %v1349_v16 = vmul.f32 %v3581_v43, %v1348_v38 }
 0x102   : > { %v4777_v5 = vsel %vm945_vm2, %v938_v54, %v834_v61  ;;  %v1470_v25 = vadd.f32 %v3579_v51, %v1469_v48  ;;  %vm1116_vm15 = vcmp.eq.f32.partialorder %v1115_v11, 8.507059e+37 }
 0x103   : > { %v3585_v19 = vpop.eup %3584  ;;  %v3357_v31 = vmul.f32 -1.442695, %v4777_v5  ;;  %v1350_v39 = vadd.f32 %v3581_v43, %v1349_v16 }
 0x104   : > { %v1474_v24 = vsel %vm1473_vm9, %v3579_v51, %v1470_v25  ;;  %v1107_v47 = vmul.f32 %v3585_v19, %v4733_v30  ;;  %v3587_v63 = vpop.eup %3586  ;;  %v1117_v51 = vand.u32 2147483648, %v4733_v30  ;;  %vm1112_vm12 = vweird.f32 %v3585_v19 }
 0x105   : > { %3590 = vpow2.f32 %v3357_v31  ;;  %795 = vrot.lane.b32.xlu2 %v469_v13, %s3998_s28  ;;  %v1354_v46 = vsel %vm1353_vm10, %v3581_v43, %v1350_v39  ;;  %v1479_v29 = vsel %vm4766_vm5, %v1478_v12, %v1474_v24  ;;  %v4813_v1 = vadd.f32 1.0, %v3587_v63  ;;  %vm1113_vm13 = vmor %vm1111_vm11, %vm1112_vm12 }
 0x106   : > { %v3589_v10 = vpop.eup %3588  ;;  %589 = vrot.lane.b32.xlu1 %v4673_v50, %s3996_s18  ;;  %v1359_v26 = vsel %vm4779_vm8, %v1358_v0, %v1354_v46  ;;  %v1610_v57 = vmul.f32 %v1479_v29, %v4576_v52  ;;  %v1108_v8 = vsub.f32 1.0, %v1107_v47  ;;  %v7160_v52 = vld [vmem:[#allocation8_spill] sm:$0xff]  ;;  %v1118_v54 = vor.u32 1.1754944e-38, %v1117_v51 }
 0x107   : > { %683 = vrot.lane.b32.xlu0 %v4663_v21, %s3997_s26  ;;  %v1602_v13 = vmul.f32 %v1359_v26, %v4582_v44  ;;  %v4818_v43 = vpop.permute.xlu2 %709  ;;  %v1227_v50 = vmul.f32 %v3589_v10, %v4760_v4  ;;  %3592 = vrcp.f32 %v4813_v1  ;;  %v346_v48 = vmul.f32 %v7160_v52, %v7160_v52 }
 0x108   : > { %1726 = vmatmul.f32.vlgmr.msra.gmra.mxu3 %v1610_v57  ;;  %v802_v38 = vpop.permute.xlu1 %801  ;;  %v1109_v14 = vmul.f32 %v3585_v19, %v1108_v8  ;;  %v914_v44 = vsel %vm912_vm1, %v4692_v42, %v658_v58  ;;  %v1237_v25 = vand.u32 2147483648, %v4760_v4  ;;  %vm1232_vm14 = vweird.f32 %v3589_v10 }
 0x109   : > { %1702 = vmatmul.f32.vlgmr.msra.gmra.mxu2 %v1602_v13  ;;  %v786_v21 = vpop.permute.xlu0 %785  ;;  %v4830_v12 = vsel %vm945_vm2, %v4726_v45, %v802_v38  ;;  %v1228_v61 = vsub.f32 1.0, %v1227_v50  ;;  %v1235_v45 = vand.u32 2147483647, %v4760_v4  ;;  %vm1233_vm4 = vmor %vm1231_vm3, %vm1232_vm14  ;;  %v372_v29 = vsub.f32 %v338_v62, %v4268_v56 }
 0x10a   : > { %v4833_v16 = vsel %vm945_vm2, %v914_v44, %v786_v21  ;;  %v3341_v53 = vmul.f32 -1.442695, %v4830_v12  ;;  %v1110_v0 = vadd.f32 %v3585_v19, %v1109_v14  ;;  %v486_v51 = vsub.f32 %v4774_v49, %v4789_v17 }
 0x10b   : > { %v3591_v31 = vpop.eup %3590  ;;  %v3333_v39 = vmul.f32 -1.442695, %v4833_v16  ;;  %v1229_v42 = vmul.f32 %v3589_v10, %v1228_v61  ;;  %vm1236_vm5 = vcmp.eq.f32.partialorder %v1235_v45, 8.507059e+37  ;;  %v494_v57 = vsub.f32 %v4798_v15, %v4802_v35 }
 0x10c   : > { %v4842_v58 = vadd.f32 1.0, %v3591_v31  ;;  %3594 = vpow2.f32 %v3341_v53  ;;  %v1114_v24 = vsel %vm1113_vm13, %v3585_v19, %v1110_v0  ;;  %v1238_v19 = vor.u32 1.1754944e-38, %v1237_v25 }
 0x10d   : > { %3596 = vpow2.f32 %v3333_v39  ;;  %717 = vrot.lane.b32.xlu2 %v4737_v33, %s3997_s26  ;;  %v1119_v47 = vsel %vm1116_vm15, %v1118_v54, %v1114_v24  ;;  %v1230_v63 = vadd.f32 %v3589_v10, %v1229_v42  ;;  %v3593_v46 = vpop.eup %3592  ;;  %v4863_v62 = vmul.f32 %v4156_v18, %v372_v29  ;;  %v3892_v42 = vld [vmem:[%s4092_s17 + $0xd8] sm:$0xff] }
 0x10e   : > { %3598 = vrcp.f32 %v4842_v58  ;;  %701 = vrot.lane.b32.xlu1 %v4746_v22, %s3997_s26  ;;  %v1586_v30 = vmul.f32 %v1119_v47, %v4640_v59  ;;  %v1362_v22 = vmul.f32 %v3593_v46, %v4813_v1  ;;  %v1370_v18 = vand.u32 2147483647, %v4813_v1 }
 0x10f   : > { %811 = vrot.lane.b32.xlu0 %v477_v37, %s3998_s28  ;;  %v662_v33 = vpop.permute.xlu2 %661  ;;  %v1234_v4 = vsel %vm1233_vm4, %v3589_v10, %v1230_v63  ;;  %v4875_v10 = vsub.f32 %v346_v48, %v4268_v56  ;;  %v1372_v13 = vand.u32 2147483648, %v4813_v1  ;;  %vm1367_vm6 = vweird.f32 %v3593_v46 }
 0x110   : > { %1654 = vmatmul.f32.vlgmr.msra.gmra.mxu0 %v1586_v30  ;;  %v820_v59 = vpop.permute.xlu1 %819  ;;  %v1239_v26 = vsel %vm1236_vm5, %v1238_v19, %v1234_v4  ;;  %v1363_v17 = vsub.f32 1.0, %v1362_v22  ;;  %v1490_v14 = vand.u32 2147483647, %v4842_v58  ;;  %vm1366_vm7 = vweird.f32 %v4813_v1 }
 0x111   : > { %v708_v6 = vpop.permute.xlu0 %707  ;;  %v4871_v37 = vsel %vm945_vm2, %v4751_v40, %v820_v59  ;;  %v1594_v49 = vmul.f32 %v1239_v26, %v4658_v23  ;;  %vm1368_vm8 = vmor %vm1366_vm7, %vm1367_vm6  ;;  %v1492_v21 = vand.u32 2147483648, %v4842_v58  ;;  %v916_v61 = vsel %vm912_vm1, %v4637_v34, %v662_v33 }
 0x112   : > { %v3595_v8 = vpop.eup %3594  ;;  %v939_v15 = vsel %vm912_vm1, %v4713_v27, %v708_v6  ;;  %v3350_v35 = vmul.f32 -1.442695, %v4871_v37  ;;  %v1364_v40 = vmul.f32 %v3593_v46, %v1363_v17  ;;  %v470_v27 = vsub.f32 %v4863_v62, %v4867_v7 }
 0x113   : > { %v3597_v11 = vpop.eup %3596  ;;  %v4882_v50 = vadd.f32 1.0, %v3595_v8  ;;  %1678 = vmatmul.f32.vlgmr.msra.gmra.mxu1 %v1594_v49  ;;  %v4886_v56 = vsel %vm945_vm2, %v939_v15, %v4698_v20  ;;  %v1373_v20 = vor.u32 1.1754944e-38, %v1372_v13  ;;  %vm1371_vm9 = vcmp.eq.f32.partialorder %v1370_v18, 8.507059e+37 }
 0x114   : > { %v3599_v23 = vpop.eup %3598  ;;  %v4888_v38 = vadd.f32 1.0, %v3597_v11  ;;  %3600 = vpow2.f32 %v3350_v35  ;;  %v1365_v48 = vadd.f32 %v3593_v46, %v1364_v40  ;;  %v3358_v54 = vmul.f32 -1.442695, %v4886_v56 }
 0x115   : > { %3602 = vrcp.f32 %v4882_v50  ;;  %669 = vrot.lane.b32.xlu2 %v372_v29, %s3997_s26  ;;  %v1482_v44 = vmul.f32 %v3599_v23, %v4842_v58  ;;  %vm1486_vm10 = vweird.f32 %v4842_v58  ;;  %vm4908_vm11 = vcmp.eq.f32.partialorder %v1490_v14, 8.507059e+37 }
 0x116   : > { %3604 = vrcp.f32 %v4888_v38  ;;  %845 = vrot.lane.b32.xlu1 %v494_v57, %s3998_s28  ;;  %v1369_v0 = vsel %vm1368_vm8, %v3593_v46, %v1365_v48  ;;  %vm1487_vm12 = vweird.f32 %v3599_v23  ;;  %v1493_v46 = vor.u32 1.1754944e-38, %v1492_v21 }
 0x117   : > { %829 = vrot.lane.b32.xlu0 %v486_v51, %s3998_s28  ;;  %v790_v53 = vpop.permute.xlu2 %789  ;;  %v1483_v1 = vsub.f32 1.0, %v1482_v44  ;;  %v1374_v39 = vsel %vm1371_vm9, %v1373_v20, %v1369_v0  ;;  %v1130_v30 = vand.u32 2147483647, %v4888_v38  ;;  %v1132_v19 = vand.u32 2147483648, %v4888_v38  ;;  %vm1488_vm14 = vmor %vm1486_vm10, %vm1487_vm12 }
 0x118   : > { %v4905_v25 = vsel %vm945_vm2, %v916_v61, %v790_v53  ;;  %v676_v31 = vpop.permute.xlu1 %675  ;;  %v1603_v24 = vmul.f32 %v1374_v39, %v4741_v41  ;;  %3606 = vpow2.f32 %v3358_v54  ;;  %vm1126_vm13 = vweird.f32 %v4888_v38 }
 0x119   : > { %v660_v45 = vpop.permute.xlu0 %659  ;;  %v3335_v34 = vmul.f32 -1.442695, %v4905_v25  ;;  %v1484_v47 = vmul.f32 %v3599_v23, %v1483_v1  ;;  %v412_v41 = vmul.f32 %v7160_v52, %v4875_v10  ;;  %vm1246_vm15 = vweird.f32 %v4882_v50 }
 0x11a   : > { %v3601_v63 = vpop.eup %3600  ;;  %1705 = vmatmul.f32.gmra.mxu2 %v1603_v24  ;;  %v1250_v59 = vand.u32 2147483647, %v4882_v50  ;;  %v446_v26 = vmul.f32 %v7160_v52, %v4273_v60  ;;  %v915_v57 = vsel %vm912_vm1, %v4632_v2, %v660_v45  ;;  %vm4935_vm3 = vcmp.eq.f32.partialorder %v1130_v30, 8.507059e+37 }
 0x11b   : > { %v3603_v29 = vpop.eup %3602  ;;  %v4916_v33 = vadd.f32 1.0, %v3601_v63  ;;  %3608 = vpow2.f32 %v3335_v34  ;;  %v1485_v4 = vadd.f32 %v3599_v23, %v1484_v47  ;;  %v1252_v60 = vand.u32 2147483648, %v4882_v50  ;;  %v3893_v47 = vld [vmem:[%s4092_s17 + $0x98] sm:$0xff]  ;;  %v7167_v63 = vld [vmem:[#allocation17_spill] sm:$0xff] }
 0x11c   : > { %v3605_v51 = vpop.eup %3604  ;;  %v1242_v22 = vmul.f32 %v3603_v29, %v4882_v50  ;;  %v1133_v8 = vor.u32 1.1754944e-38, %v1132_v19  ;;  %v478_v15 = vsub.f32 %v412_v41, %v446_v26  ;;  %v923_v18 = vsel %vm912_vm1, %v4705_v28, %v676_v31 }
 0x11d   : > { %3610 = vrcp.f32 %v4916_v33  ;;  %v1489_v62 = vsel %vm1488_vm14, %v3599_v23, %v1485_v4  ;;  %v1122_v7 = vmul.f32 %v3605_v51, %v4888_v38  ;;  %vm1247_vm4 = vweird.f32 %v3603_v29 }
 0x11e   : > { %797 = vrot.lane.b32.xlu1 %v470_v27, %s3998_s28  ;;  %v1494_v58 = vsel %vm4908_vm11, %v1493_v46, %v1489_v62  ;;  %v1243_v49 = vsub.f32 1.0, %v1242_v22  ;;  %v3607_v35 = vpop.eup %3606  ;;  %v4949_v40 = vsel %vm945_vm2, %v915_v57, %v4763_v9  ;;  %vm1127_vm5 = vweird.f32 %v3605_v51  ;;  %813 = vrot.lane.b32.xlu2 %v478_v15, %s3998_s28  ;;  %vm1248_vm7 = vmor %vm1246_vm15, %vm1247_vm4 }
 0x11f   : > { %685 = vrot.lane.b32.xlu0 %v4875_v10, %s3997_s26  ;;  %v4942_v52 = vpop.permute.xlu2 %711  ;;  %v1611_v2 = vmul.f32 %v1494_v58, %v4777_v5  ;;  %v1123_v17 = vsub.f32 1.0, %v1122_v7  ;;  %vm4951_vm6 = vcmp.eq.f32.partialorder %v1250_v59, 8.507059e+37  ;;  %v4955_v14 = vadd.f32 1.0, %v3607_v35  ;;  %vm1128_vm8 = vmor %vm1126_vm13, %vm1127_vm5  ;;  %v7170_v5 = vld [vmem:[#allocation12_spill] sm:$0xff] }
 0x120   : > { %v694_v13 = vpop.permute.xlu1 %693  ;;  %v1244_v11 = vmul.f32 %v3603_v29, %v1243_v49  ;;  %v1253_v44 = vor.u32 1.1754944e-38, %v1252_v60  ;;  %v3334_v61 = vmul.f32 -1.442695, %v4949_v40  ;;  %v1385_v1 = vand.u32 2147483647, %v4916_v33 }
 0x121   : > { %v3609_v23 = vpop.eup %3608  ;;  %v804_v10 = vpop.permute.xlu0 %803  ;;  %1729 = vmatmul.f32.gmra.mxu3 %v1611_v2  ;;  %v1124_v27 = vmul.f32 %v3605_v51, %v1123_v17  ;;  %3612 = vrcp.f32 %v4955_v14  ;;  %v1387_v39 = vand.u32 2147483648, %v4916_v33  ;;  %v907_v45 = vsel %vm879_vm0, %v3892_v42, %v4533_v55 }
 0x122   : > { %v4958_v28 = vadd.f32 1.0, %v3609_v23  ;;  %v4961_v48 = vsel %vm945_vm2, %v923_v18, %v804_v10  ;;  %v1245_v9 = vadd.f32 %v3603_v29, %v1244_v11  ;;  %v899_v46 = vsel %vm879_vm0, %v3893_v47, %v7167_v63 }
 0x123   : > { %v3611_v20 = vpop.eup %3610  ;;  %v3342_v21 = vmul.f32 -1.442695, %v4961_v48  ;;  %v1125_v54 = vadd.f32 %v3605_v51, %v1124_v27  ;;  %v940_v30 = vsel %vm912_vm1, %v907_v45, %v4818_v43  ;;  %vm1381_vm9 = vweird.f32 %v4916_v33  ;;  %v3894_v27 = vld [vmem:[%s4092_s17 + $0xa0] sm:$0xff] }
 0x124   : > { %3614 = vrcp.f32 %v4958_v28  ;;  %v1249_v53 = vsel %vm1248_vm7, %v3603_v29, %v1245_v9  ;;  %v1377_v0 = vmul.f32 %v3611_v20, %v4916_v33  ;;  %vm1382_vm10 = vweird.f32 %v3611_v20 }
 0x125   : > { %3616 = vpow2.f32 %v3342_v21  ;;  %v1129_v31 = vsel %vm1128_vm8, %v3605_v51, %v1125_v54  ;;  %v1254_v50 = vsel %vm4951_vm6, %v1253_v44, %v1249_v53  ;;  %vm4991_vm11 = vcmp.eq.f32.partialorder %v1385_v1, 8.507059e+37  ;;  %vm1383_vm12 = vmor %vm1381_vm9, %vm1382_vm10 }
 0x126   : > { %v1134_v38 = vsel %vm4935_vm3, %v1133_v8, %v1129_v31  ;;  %v1595_v34 = vmul.f32 %v1254_v50, %v4830_v12  ;;  %v1378_v24 = vsub.f32 1.0, %v1377_v0  ;;  %3618 = vpow2.f32 %v3334_v61 }
 0x127   : > { %v664_v19 = vpop.permute.xlu2 %663  ;;  %v1587_v29 = vmul.f32 %v1134_v38, %v4833_v16  ;;  %v3613_v41 = vpop.eup %3612  ;;  %v932_v51 = vsel %vm912_vm1, %v899_v46, %v694_v13  ;;  %v1388_v16 = vor.u32 1.1754944e-38, %v1387_v39  ;;  %v1505_v59 = vand.u32 2147483647, %v4955_v14 }
 0x128   : > { %1681 = vmatmul.f32.gmra.mxu1 %v1595_v34  ;;  %v838_v4 = vpop.permute.xlu1 %837  ;;  %v1379_v55 = vmul.f32 %v3611_v20, %v1378_v24  ;;  %v1497_v58 = vmul.f32 %v3613_v41, %v4955_v14  ;;  %v1507_v60 = vand.u32 2147483648, %v4955_v14  ;;  %v1160_v17 = vand.u32 2147483647, %v4958_v28 }
 0x129   : > { %v822_v22 = vpop.permute.xlu0 %821  ;;  %1657 = vmatmul.f32.gmra.mxu0 %v1587_v29  ;;  %v4997_v43 = vsel %vm945_vm2, %v940_v30, %v838_v4  ;;  %vm1502_vm13 = vweird.f32 %v3613_v41  ;;  %v5026_v9 = vsel %vm879_vm0, %v3894_v27, %v7170_v5  ;;  %v917_v44 = vsel %vm912_vm1, %v4593_v36, %v664_v19 }
 0x12a   : > { %v5000_v26 = vpop.eup %3614  ;;  %v5003_v57 = vsel %vm945_vm2, %v932_v51, %v822_v22  ;;  %v3359_v62 = vmul.f32 -1.442695, %v4997_v43  ;;  %v1380_v7 = vadd.f32 %v3611_v20, %v1379_v55  ;;  %v1498_v35 = vsub.f32 1.0, %v1497_v58 }
 0x12b   : > { %v3617_v6 = vpop.eup %3616  ;;  %v3351_v49 = vmul.f32 -1.442695, %v5003_v57  ;;  %v1152_v2 = vmul.f32 %v5000_v26, %v4958_v28  ;;  %vm1501_vm14 = vweird.f32 %v4955_v14  ;;  %vm5031_vm15 = vcmp.eq.f32.partialorder %v1505_v59, 8.507059e+37 }
 0x12c   : > { %v5015_v8 = vadd.f32 1.0, %v3617_v6  ;;  %3620 = vpow2.f32 %v3359_v62  ;;  %v1384_v15 = vsel %vm1383_vm12, %v3611_v20, %v1380_v7  ;;  %v3619_v18 = vpop.eup %3618  ;;  %v1499_v23 = vmul.f32 %v3613_v41, %v1498_v35  ;;  %vm1503_vm4 = vmor %vm1501_vm14, %vm1502_vm13 }
 0x12d   : > { %3622 = vpow2.f32 %v3351_v49  ;;  %v1389_v13 = vsel %vm4991_vm11, %v1388_v16, %v1384_v15  ;;  %v1153_v33 = vsub.f32 1.0, %v1152_v2  ;;  %v5021_v10 = vadd.f32 1.0, %v3619_v18 }
 0x12e   : > { %3624 = vrcp.f32 %v5015_v8  ;;  %v1604_v11 = vmul.f32 %v1389_v13, %v4871_v37  ;;  %v1500_v61 = vadd.f32 %v3613_v41, %v1499_v23  ;;  %vm1156_vm3 = vweird.f32 %v4958_v28 }
 0x12f   : > { %v792_v20 = vpop.permute.xlu2 %791  ;;  %3626 = vrcp.f32 %v5021_v10  ;;  %v1508_v14 = vor.u32 1.1754944e-38, %v1507_v60  ;;  %v1154_v0 = vmul.f32 %v5000_v26, %v1153_v33  ;;  %v1162_v1 = vand.u32 2147483648, %v4958_v28 }
 0x130   : > { %v5036_v37 = vsel %vm945_vm2, %v917_v44, %v792_v20  ;;  %1708 = vmatmul.f32.gmra.mxu2 %v1604_v11  ;;  %v584_v54 = vpop.permute.xlu1 %583  ;;  %v1504_v50 = vsel %vm1503_vm4, %v3613_v41, %v1500_v61  ;;  %v1265_v39 = vand.u32 2147483647, %v5015_v8  ;;  %vm1157_vm5 = vweird.f32 %v5000_v26  ;;  %v3895_v41 = vld [vmem:[%s4092_s17 + $0xe0] sm:$0xff] }
 0x131   : > { %v678_v53 = vpop.permute.xlu0 %677  ;;  %v3336_v36 = vmul.f32 -1.442695, %v5036_v37  ;;  %vm5046_vm6 = vcmp.eq.f32.partialorder %v1160_v17, 8.507059e+37  ;;  %v1509_v34 = vsel %vm5031_vm15, %v1508_v14, %v1504_v50  ;;  %v1267_v24 = vand.u32 2147483648, %v5015_v8  ;;  %vm5081_vm10 = vmor %vm1156_vm3, %vm1157_vm5 }
 0x132   : > { %v3621_v31 = vpop.eup %3620  ;;  %v1612_v46 = vmul.f32 %v1509_v34, %v4886_v56  ;;  %v1145_v30 = vand.u32 2147483647, %v5021_v10  ;;  %v1147_v19 = vand.u32 2147483648, %v5021_v10  ;;  %vm1261_vm7 = vweird.f32 %v5015_v8 }
 0x133   : > { %v3623_v45 = vpop.eup %3622  ;;  %v5050_v38 = vadd.f32 1.0, %v3621_v31  ;;  %3628 = vpow2.f32 %v3336_v36  ;;  %v1155_v4 = vadd.f32 %v5000_v26, %v1154_v0  ;;  %v924_v12 = vsel %vm912_vm1, %v4612_v3, %v678_v53  ;;  %v7183_v53 = vld [vmem:[#allocation11_spill] sm:$0xff] }
 0x134   : > { %v3625_v47 = vpop.eup %3624  ;;  %v5055_v63 = vadd.f32 1.0, %v3623_v45  ;;  %v908_v56 = vsel %vm879_vm0, %v3895_v41, %v584_v54  ;;  %1732 = vmatmul.f32.gmra.mxu3 %v1612_v46  ;;  %vm1141_vm8 = vweird.f32 %v5021_v10  ;;  %vm5073_vm9 = vcmp.eq.f32.partialorder %v1265_v39, 8.507059e+37 }
 0x135   : > { %3630 = vrcp.f32 %v5050_v38  ;;  %v1257_v29 = vmul.f32 %v3625_v47, %v5015_v8  ;;  %v3627_v55 = vpop.eup %3626  ;;  %v1268_v62 = vor.u32 1.1754944e-38, %v1267_v24  ;;  %vm5085_vm11 = vcmp.eq.f32.partialorder %v1145_v30, 8.507059e+37 }
 0x136   : > { %3632 = vrcp.f32 %v5055_v63  ;;  %v1137_v22 = vmul.f32 %v3627_v55, %v5021_v10  ;;  %v1148_v6 = vor.u32 1.1754944e-38, %v1147_v19  ;;  %vm1262_vm12 = vweird.f32 %v3625_v47 }
 0x137   : > { %v5070_v51 = vpop.permute.xlu2 %713  ;;  %v1258_v16 = vsub.f32 1.0, %v1257_v29  ;;  %v1159_v49 = vsel %vm5081_vm10, %v5000_v26, %v1155_v4  ;;  %v1163_v28 = vor.u32 1.1754944e-38, %v1162_v1  ;;  %v1400_v35 = vand.u32 2147483647, %v5055_v63  ;;  %vm1263_vm15 = vmor %vm1261_vm7, %vm1262_vm12 }
 0x138   : > { %v696_v7 = vpop.permute.xlu1 %695  ;;  %v1138_v17 = vsub.f32 1.0, %v1137_v22  ;;  %vm1142_vm13 = vweird.f32 %v3627_v55  ;;  %v941_v33 = vsel %vm912_vm1, %v908_v56, %v4942_v52  ;;  %vm1396_vm14 = vweird.f32 %v5055_v63 }
 0x139   : > { %v3629_v60 = vpop.eup %3628  ;;  %v806_v2 = vpop.permute.xlu0 %805  ;;  %v1259_v15 = vmul.f32 %v3625_v47, %v1258_v16  ;;  %v5103_v5 = vsel %vm5046_vm6, %v1163_v28, %v1159_v49  ;;  %v1402_v52 = vand.u32 2147483648, %v5055_v63  ;;  %vm1516_vm3 = vweird.f32 %v5050_v38  ;;  %vm1143_vm5 = vmor %vm1141_vm8, %vm1142_vm13 }
 0x13a   : > { %v5093_v18 = vadd.f32 1.0, %v3629_v60  ;;  %v5096_v13 = vsel %vm945_vm2, %v924_v12, %v806_v2  ;;  %v1139_v26 = vmul.f32 %v3627_v55, %v1138_v17  ;;  %vm5114_vm4 = vcmp.eq.f32.partialorder %v1400_v35, 8.507059e+37 }
 0x13b   : > { %v3631_v11 = vpop.eup %3630  ;;  %v3343_v23 = vmul.f32 -1.442695, %v5096_v13  ;;  %v1260_v27 = vadd.f32 %v3625_v47, %v1259_v15  ;;  %v933_v36 = vsel %vm912_vm1, %v5026_v9, %v696_v7  ;;  %v1520_v0 = vand.u32 2147483647, %v5050_v38 }
 0x13c   : > { %v3633_v44 = vpop.eup %3632  ;;  %3634 = vrcp.f32 %v5093_v18  ;;  %v1512_v20 = vmul.f32 %v3631_v11, %v5050_v38  ;;  %v1140_v21 = vadd.f32 %v3627_v55, %v1139_v26  ;;  %v1522_v42 = vand.u32 2147483648, %v5050_v38 }
 0x13d   : > { %3636 = vpow2.f32 %v3343_v23  ;;  %v1264_v54 = vsel %vm1263_vm15, %v3625_v47, %v1260_v27  ;;  %v1392_v61 = vmul.f32 %v3633_v44, %v5055_v63  ;;  %v1403_v34 = vor.u32 1.1754944e-38, %v1402_v52 }
 0x13e   : > { %v1269_v8 = vsel %vm5073_vm9, %v1268_v62, %v1264_v54  ;;  %v1513_v14 = vsub.f32 1.0, %v1512_v20  ;;  %v1144_v1 = vsel %vm1143_vm5, %v3627_v55, %v1140_v21  ;;  %vm1517_vm6 = vweird.f32 %v3631_v11 }
 0x13f   : > { %v666_v31 = vpop.permute.xlu2 %665  ;;  %v1596_v50 = vmul.f32 %v1269_v8, %v4961_v48  ;;  %v1393_v39 = vsub.f32 1.0, %v1392_v61  ;;  %v1149_v9 = vsel %vm5085_vm11, %v1148_v6, %v1144_v1  ;;  %vm1397_vm7 = vweird.f32 %v3633_v44  ;;  %vm1518_vm9 = vmor %vm1516_vm3, %vm1517_vm6  ;;  %v3896_v61 = vld [vmem:[%s4092_s17 + $0x30] sm:$0xff]  ;;  %v3897_v8 = vld [vmem:[%s4092_s17 + $0x60] sm:$0xff] }
 0x140   : > { %v840_v45 = vpop.permute.xlu1 %839  ;;  %v1514_v10 = vmul.f32 %v3631_v11, %v1513_v14  ;;  %v1588_v24 = vmul.f32 %v1149_v9, %v4949_v40  ;;  %vm1521_vm8 = vcmp.eq.f32.partialorder %v1520_v0, 8.507059e+37  ;;  %v1523_v41 = vor.u32 1.1754944e-38, %v1522_v42  ;;  %vm1398_vm10 = vmor %vm1396_vm14, %vm1397_vm7  ;;  %v7184_v14 = vld [vmem:[#allocation15_spill] sm:$0xff] }
 0x141   : > { %v824_v47 = vpop.permute.xlu0 %823  ;;  %1684 = vmatmul.f32.gmra.mxu1 %v1596_v50  ;;  %v5132_v46 = vsel %vm945_vm2, %v941_v33, %v840_v45  ;;  %v1394_v30 = vmul.f32 %v3633_v44, %v1393_v39  ;;  %v918_v16 = vsel %vm912_vm1, %v4598_v32, %v666_v31  ;;  %v1177_v6 = vand.u32 2147483648, %v5093_v18  ;;  %v3898_v50 = vld [vmem:[%s4092_s17 + $0xa8] sm:$0xff]  ;;  %v7185_v39 = vld [vmem:[#allocation19_spill] sm:$0xff] }
 0x142   : > { %v3635_v48 = vpop.eup %3634  ;;  %v5135_v19 = vsel %vm945_vm2, %v933_v36, %v824_v47  ;;  %v3360_v29 = vmul.f32 -1.442695, %v5132_v46  ;;  %v1515_v4 = vadd.f32 %v3631_v11, %v1514_v10  ;;  %1660 = vmatmul.f32.gmra.mxu0 %v1588_v24  ;;  %v1175_v63 = vand.u32 2147483647, %v5093_v18  ;;  %v3899_v10 = vld [vmem:[%s4092_s17 + $0xe8] sm:$0xff] }
 0x143   : > { %v3637_v55 = vpop.eup %3636  ;;  %v3352_v12 = vmul.f32 -1.442695, %v5135_v19  ;;  %v1395_v40 = vadd.f32 %v3633_v44, %v1394_v30  ;;  %v1167_v56 = vmul.f32 %v3635_v48, %v5093_v18  ;;  %vm1172_vm11 = vweird.f32 %v3635_v48 }
 0x144   : > { %v5143_v22 = vadd.f32 1.0, %v3637_v55  ;;  %3638 = vpow2.f32 %v3360_v29  ;;  %v1519_v59 = vsel %vm1518_vm9, %v3631_v11, %v1515_v4  ;;  %v1589_v15 = vmul.f32 %v5103_v5, %v4905_v25 }
 0x145   : > { %3640 = vpow2.f32 %v3352_v12  ;;  %v1399_v62 = vsel %vm1398_vm10, %v3633_v44, %v1395_v40  ;;  %v1524_v3 = vsel %vm1521_vm8, %v1523_v41, %v1519_v59  ;;  %v1168_v7 = vsub.f32 1.0, %v1167_v56 }
 0x146   : > { %3642 = vrcp.f32 %v5143_v22  ;;  %v1404_v38 = vsel %vm5114_vm4, %v1403_v34, %v1399_v62  ;;  %v1613_v58 = vmul.f32 %v1524_v3, %v4997_v43  ;;  %vm1171_vm12 = vweird.f32 %v5093_v18 }
 0x147   : > { %v794_v32 = vpop.permute.xlu2 %793  ;;  %v1605_v49 = vmul.f32 %v1404_v38, %v5003_v57  ;;  %v1169_v60 = vmul.f32 %v3635_v48, %v1168_v7  ;;  %vm1173_vm13 = vmor %vm1171_vm12, %vm1172_vm11  ;;  %v1178_v33 = vor.u32 1.1754944e-38, %v1177_v6  ;;  %vm1176_vm14 = vcmp.eq.f32.partialorder %v1175_v63, 8.507059e+37 }
 0x148   : > { %v5158_v2 = vsel %vm945_vm2, %v918_v16, %v794_v32  ;;  %1735 = vmatmul.f32.gmra.mxu3 %v1613_v58  ;;  %v586_v17 = vpop.permute.xlu1 %585  ;;  %v1280_v21 = vand.u32 2147483647, %v5143_v22  ;;  %v1282_v54 = vand.u32 2147483648, %v5143_v22  ;;  %v5179_v36 = vsel %vm879_vm0, %v3896_v61, %v7183_v53 }
 0x149   : > { %v680_v28 = vpop.permute.xlu0 %679  ;;  %v3337_v43 = vmul.f32 -1.442695, %v5158_v2  ;;  %1711 = vmatmul.f32.gmra.mxu2 %v1605_v49  ;;  %v1170_v35 = vadd.f32 %v3635_v48, %v1169_v60  ;;  %v892_v0 = vsel %vm879_vm0, %v3897_v8, %v7184_v14  ;;  %v909_v24 = vsel %vm879_vm0, %v3899_v10, %v586_v17 }
 0x14a   : > { %v3639_v57 = vpop.eup %3638  ;;  %1663 = vmatmul.f32.gmra.mxu0 %v1589_v15  ;;  %v925_v42 = vsel %vm912_vm1, %v892_v0, %v680_v28  ;;  %vm1276_vm3 = vweird.f32 %v5143_v22  ;;  %vm1281_vm4 = vcmp.eq.f32.partialorder %v1280_v21, 8.507059e+37  ;;  %v1283_v4 = vor.u32 1.1754944e-38, %v1282_v54 }
 0x14b   : > { %v3641_v11 = vpop.eup %3640  ;;  %v5164_v23 = vadd.f32 1.0, %v3639_v57  ;;  %3644 = vpow2.f32 %v3337_v43  ;;  %v1174_v26 = vsel %vm1173_vm13, %v3635_v48, %v1170_v35 }
 0x14c   : > { %v3643_v25 = vpop.eup %3642  ;;  %v5166_v27 = vadd.f32 1.0, %v3641_v11  ;;  %v1179_v5 = vsel %vm1176_vm14, %v1178_v33, %v1174_v26 }
 0x14d   : > { %3646 = vrcp.f32 %v5164_v23  ;;  %v1272_v18 = vmul.f32 %v3643_v25, %v5143_v22  ;;  %v1590_v52 = vmul.f32 %v1179_v5, %v5036_v37  ;;  %v901_v37 = vsel %vm879_vm0, %v3898_v50, %v7185_v39 }
 0x14e   : > { %3648 = vrcp.f32 %v5166_v27  ;;  %vm1277_vm15 = vweird.f32 %v3643_v25  ;;  %v1415_v12 = vand.u32 2147483647, %v5166_v27  ;;  %v1417_v40 = vand.u32 2147483648, %v5166_v27 }
 0x14f   : > { %v5171_v44 = vpop.permute.xlu2 %715  ;;  %v1273_v20 = vsub.f32 1.0, %v1272_v18  ;;  %vm1278_vm5 = vmor %vm1276_vm3, %vm1277_vm15  ;;  %v942_v22 = vsel %vm912_vm1, %v909_v24, %v5070_v51  ;;  %vm1411_vm6 = vweird.f32 %v5166_v27  ;;  %v1535_v3 = vand.u32 2147483647, %v5164_v23 }
 0x150   : > { %v698_v1 = vpop.permute.xlu1 %697  ;;  %vm1531_vm7 = vweird.f32 %v5164_v23  ;;  %v1537_v6 = vand.u32 2147483648, %v5164_v23  ;;  %vm5209_vm8 = vcmp.eq.f32.partialorder %v1415_v12, 8.507059e+37  ;;  %v1418_v51 = vor.u32 1.1754944e-38, %v1417_v40  ;;  %v7188_v12 = vld [vmem:[#allocation14_spill] sm:$0xff] }
 0x151   : > { %v3645_v31 = vpop.eup %3644  ;;  %v808_v9 = vpop.permute.xlu0 %807  ;;  %v1274_v45 = vmul.f32 %v3643_v25, %v1273_v20  ;;  %v934_v63 = vsel %vm912_vm1, %v901_v37, %v698_v1  ;;  %vm1536_vm11 = vcmp.eq.f32.partialorder %v1535_v3, 8.507059e+37  ;;  %v7189_v3 = vld [vmem:[#allocation18_spill] sm:$0xff] }
 0x152   : > { %v5188_v34 = vadd.f32 1.0, %v3645_v31  ;;  %v5193_v47 = vsel %vm945_vm2, %v925_v42, %v808_v9  ;;  %1666 = vmatmul.f32.gmra.mxu0 %v1590_v52 }
 0x153   : > { %v3647_v30 = vpop.eup %3646  ;;  %v3344_v48 = vmul.f32 -1.442695, %v5193_v47  ;;  %v1275_v29 = vadd.f32 %v3643_v25, %v1274_v45 }
 0x154   : > { %v3649_v55 = vpop.eup %3648  ;;  %3650 = vrcp.f32 %v5188_v34  ;;  %v1527_v41 = vmul.f32 %v3647_v30, %v5164_v23  ;;  %vm1532_vm9 = vweird.f32 %v3647_v30  ;;  %v1190_v20 = vand.u32 2147483647, %v5188_v34 }
 0x155   : > { %3652 = vpow2.f32 %v3344_v48  ;;  %v1279_v56 = vsel %vm1278_vm5, %v3643_v25, %v1275_v29  ;;  %v1407_v16 = vmul.f32 %v3649_v55, %v5166_v27  ;;  %vm1412_vm10 = vweird.f32 %v3649_v55  ;;  %vm1533_vm12 = vmor %vm1531_vm7, %vm1532_vm9 }
 0x156   : > { %v1284_v59 = vsel %vm1281_vm4, %v1283_v4, %v1279_v56  ;;  %v1528_v62 = vsub.f32 1.0, %v1527_v41  ;;  %v1538_v25 = vor.u32 1.1754944e-38, %v1537_v6  ;;  %vm1413_vm13 = vmor %vm1411_vm6, %vm1412_vm10  ;;  %v1192_v8 = vand.u32 2147483648, %v5188_v34 }
 0x157   : > { %v668_v7 = vpop.permute.xlu2 %667  ;;  %v1597_v38 = vmul.f32 %v1284_v59, %v5096_v13  ;;  %v1408_v58 = vsub.f32 1.0, %v1407_v16  ;;  %vm1186_vm15 = vweird.f32 %v5188_v34  ;;  %vm1191_vm4 = vcmp.eq.f32.partialorder %v1190_v20, 8.507059e+37 }
 0x158   : > { %v842_v32 = vpop.permute.xlu1 %841  ;;  %v1529_v60 = vmul.f32 %v3647_v30, %v1528_v62  ;;  %v919_v27 = vsel %vm912_vm1, %v5179_v36, %v668_v7  ;;  %v1193_v36 = vor.u32 1.1754944e-38, %v1192_v8  ;;  %v3901_v62 = vld [vmem:[%s4092_s17 + $0xb0] sm:$0xff] }
 0x159   : > { %v826_v17 = vpop.permute.xlu0 %825  ;;  %1687 = vmatmul.f32.gmra.mxu1 %v1597_v38  ;;  %v5215_v15 = vsel %vm945_vm2, %v942_v22, %v842_v32  ;;  %v1409_v13 = vmul.f32 %v3649_v55, %v1408_v58  ;;  %v902_v7 = vsel %vm879_vm0, %v3901_v62, %v7189_v3  ;;  %v3902_v58 = vld [vmem:[%s4092_s17 + $0xf0] sm:$0xff] }
 0x15a   : > { %v3651_v28 = vpop.eup %3650  ;;  %v5218_v43 = vsel %vm945_vm2, %v934_v63, %v826_v17  ;;  %v3361_v35 = vmul.f32 -1.442695, %v5215_v15  ;;  %v1530_v57 = vadd.f32 %v3647_v30, %v1529_v60 }
 0x15b   : > { %v3653_v33 = vpop.eup %3652  ;;  %v3353_v11 = vmul.f32 -1.442695, %v5218_v43  ;;  %v1410_v26 = vadd.f32 %v3649_v55, %v1409_v13  ;;  %v1182_v5 = vmul.f32 %v3651_v28, %v5188_v34  ;;  %vm1187_vm14 = vweird.f32 %v3651_v28 }
 0x15c   : > { %v5226_v18 = vadd.f32 1.0, %v3653_v33  ;;  %3654 = vpow2.f32 %v3361_v35  ;;  %v1534_v52 = vsel %vm1533_vm12, %v3647_v30, %v1530_v57  ;;  %vm1188_vm3 = vmor %vm1186_vm15, %vm1187_vm14 }
 0x15d   : > { %3656 = vpow2.f32 %v3353_v11  ;;  %v1414_v21 = vsel %vm1413_vm13, %v3649_v55, %v1410_v26  ;;  %v1539_v54 = vsel %vm1536_vm11, %v1538_v25, %v1534_v52  ;;  %v1183_v61 = vsub.f32 1.0, %v1182_v5  ;;  %v3900_v55 = vld [vmem:[%s4092_s17 + $0x68] sm:$0xff] }
 0x15e   : > { %3658 = vrcp.f32 %v5226_v18  ;;  %v1419_v23 = vsel %vm5209_vm8, %v1418_v51, %v1414_v21  ;;  %v1614_v53 = vmul.f32 %v1539_v54, %v5132_v46  ;;  %v1295_v4 = vand.u32 2147483647, %v5226_v18 }
 0x15f   : > { %v796_v14 = vpop.permute.xlu2 %795  ;;  %v1606_v0 = vmul.f32 %v1419_v23, %v5135_v19  ;;  %v1184_v1 = vmul.f32 %v3651_v28, %v1183_v61  ;;  %v893_v40 = vsel %vm879_vm0, %v3900_v55, %v7188_v12  ;;  %v1297_v56 = vand.u32 2147483648, %v5226_v18 }
 0x160   : > { %v5240_v31 = vsel %vm945_vm2, %v919_v27, %v796_v14  ;;  %1738 = vmatmul.f32.gmra.mxu3 %v1614_v53  ;;  %v588_v50 = vpop.permute.xlu1 %587  ;;  %vm1291_vm6 = vweird.f32 %v5226_v18  ;;  %vm1296_vm7 = vcmp.eq.f32.partialorder %v1295_v4, 8.507059e+37 }
 0x161   : > { %v682_v39 = vpop.permute.xlu0 %681  ;;  %v3338_v37 = vmul.f32 -1.442695, %v5240_v31  ;;  %1714 = vmatmul.f32.gmra.mxu2 %v1606_v0  ;;  %v1185_v46 = vadd.f32 %v3651_v28, %v1184_v1  ;;  %v910_v6 = vsel %vm879_vm0, %v3902_v58, %v588_v50  ;;  %v1298_v17 = vor.u32 1.1754944e-38, %v1297_v56  ;;  %v3903_v58 = vld [vmem:[%s4092_s17 + $0x70] sm:$0xff] }
 0x162   : > { %v3655_v42 = vpop.eup %3654  ;;  %v926_v16 = vsel %vm912_vm1, %v893_v40, %v682_v39  ;;  %v943_v57 = vsel %vm912_vm1, %v910_v6, %v5171_v44  ;;  %v7192_v6 = vld [vmem:[#allocation9_spill] sm:$0xff] }
 0x163   : > { %v3657_v9 = vpop.eup %3656  ;;  %v5244_v19 = vadd.f32 1.0, %v3655_v42  ;;  %3660 = vpow2.f32 %v3338_v37  ;;  %v1189_v45 = vsel %vm1188_vm3, %v3651_v28, %v1185_v46 }
 0x164   : > { %v3659_v10 = vpop.eup %3658  ;;  %v5246_v24 = vadd.f32 1.0, %v3657_v9  ;;  %v1194_v30 = vsel %vm1191_vm4, %v1193_v36, %v1189_v45 }
 0x165   : > { %3662 = vrcp.f32 %v5244_v19  ;;  %v1591_v48 = vmul.f32 %v1194_v30, %v5158_v2  ;;  %v1287_v34 = vmul.f32 %v3659_v10, %v5226_v18  ;;  %vm1292_vm5 = vweird.f32 %v3659_v10 }
 0x166   : > { %3664 = vrcp.f32 %v5246_v24  ;;  %vm1293_vm8 = vmor %vm1291_vm6, %vm1292_vm5  ;;  %v1430_v13 = vand.u32 2147483647, %v5246_v24  ;;  %vm1426_vm9 = vweird.f32 %v5246_v24  ;;  %v1432_v26 = vand.u32 2147483648, %v5246_v24 }
 0x167   : > { %1669 = vmatmul.f32.gmra.mxu0 %v1591_v48  ;;  %v1288_v29 = vsub.f32 1.0, %v1287_v34  ;;  %vm1546_vm10 = vweird.f32 %v5244_v19  ;;  %v1552_v52 = vand.u32 2147483648, %v5244_v19  ;;  %v1550_v54 = vand.u32 2147483647, %v5244_v19  ;;  %v718_v62 = vpop.permute.xlu2 %717 }
 0x168   : > { %v700_v41 = vpop.permute.xlu1 %699  ;;  %vm5281_vm11 = vcmp.eq.f32.partialorder %v1430_v13, 8.507059e+37  ;;  %v1433_v0 = vor.u32 1.1754944e-38, %v1432_v26 }
 0x169   : > { %v3661_v22 = vpop.eup %3660  ;;  %v810_v2 = vpop.permute.xlu0 %809  ;;  %v1289_v59 = vmul.f32 %v3659_v10, %v1288_v29  ;;  %v935_v61 = vsel %vm912_vm1, %v902_v7, %v700_v41  ;;  %v1553_v46 = vor.u32 1.1754944e-38, %v1552_v52  ;;  %vm1551_vm3 = vcmp.eq.f32.partialorder %v1550_v54, 8.507059e+37 }
 0x16a   : > { %v5261_v38 = vadd.f32 1.0, %v3661_v22  ;;  %v5266_v32 = vsel %vm945_vm2, %v926_v16, %v810_v2 }
 0x16b   : > { %v3663_v49 = vpop.eup %3662  ;;  %v3345_v51 = vmul.f32 -1.442695, %v5266_v32  ;;  %v1290_v60 = vadd.f32 %v3659_v10, %v1289_v59 }
 0x16c   : > { %v3665_v63 = vpop.eup %3664  ;;  %3666 = vrcp.f32 %v5261_v38  ;;  %v1542_v28 = vmul.f32 %v3663_v49, %v5244_v19  ;;  %vm1547_vm12 = vweird.f32 %v3663_v49  ;;  %v1207_v34 = vand.u32 2147483648, %v5261_v38 }
 0x16d   : > { %3668 = vpow2.f32 %v3345_v51  ;;  %v1294_v35 = vsel %vm1293_vm8, %v3659_v10, %v1290_v60  ;;  %v1422_v33 = vmul.f32 %v3665_v63, %v5246_v24  ;;  %vm1427_vm13 = vweird.f32 %v3665_v63  ;;  %vm1548_vm14 = vmor %vm1546_vm10, %vm1547_vm12 }
 0x16e   : > { %v1299_v11 = vsel %vm1296_vm7, %v1298_v17, %v1294_v35  ;;  %v1543_v25 = vsub.f32 1.0, %v1542_v28  ;;  %vm1428_vm15 = vmor %vm1426_vm9, %vm1427_vm13  ;;  %v1205_v24 = vand.u32 2147483647, %v5261_v38  ;;  %vm1201_vm5 = vweird.f32 %v5261_v38  ;;  %v3904_v35 = vld [vmem:[%s4092_s17 + $0xf8] sm:$0xff] }
 0x16f   : > { %v1598_v5 = vmul.f32 %v1299_v11, %v5193_v47  ;;  %v1423_v18 = vsub.f32 1.0, %v1422_v33  ;;  %v1208_v56 = vor.u32 1.1754944e-38, %v1207_v34 }
 0x170   : > { %v844_v20 = vpop.permute.xlu1 %843  ;;  %v1544_v44 = vmul.f32 %v3663_v49, %v1543_v25  ;;  %vm1206_vm7 = vcmp.eq.f32.partialorder %v1205_v24, 8.507059e+37 }
 0x171   : > { %v828_v23 = vpop.permute.xlu0 %827  ;;  %1690 = vmatmul.f32.gmra.mxu1 %v1598_v5  ;;  %v5288_v47 = vsel %vm945_vm2, %v943_v57, %v844_v20  ;;  %v1424_v53 = vmul.f32 %v3665_v63, %v1423_v18  ;;  %v3905_v5 = vld [vmem:[%s4092_s17 + $0xb8] sm:$0xff]  ;;  %v7193_v18 = vld [vmem:[#allocation13_spill] sm:$0xff] }
 0x172   : > { %v3667_v8 = vpop.eup %3666  ;;  %v5291_v27 = vsel %vm945_vm2, %v935_v61, %v828_v23  ;;  %v3362_v14 = vmul.f32 -1.442695, %v5288_v47  ;;  %v1545_v1 = vadd.f32 %v3663_v49, %v1544_v44  ;;  %v903_v52 = vsel %vm879_vm0, %v3905_v5, %v7193_v18 }
 0x173   : > { %v3669_v50 = vpop.eup %3668  ;;  %v3354_v39 = vmul.f32 -1.442695, %v5291_v27  ;;  %v1425_v37 = vadd.f32 %v3665_v63, %v1424_v53  ;;  %v1197_v42 = vmul.f32 %v3667_v8, %v5261_v38  ;;  %vm1202_vm4 = vweird.f32 %v3667_v8 }
 0x174   : > { %v1087_v36 = vadd.f32 1.0, %v3669_v50  ;;  %3670 = vpow2.f32 %v3362_v14  ;;  %v1549_v9 = vsel %vm1548_vm14, %v3663_v49, %v1545_v1  ;;  %vm1203_vm6 = vmor %vm1201_vm5, %vm1202_vm4  ;;  %v894_v49 = vsel %vm879_vm0, %v3903_v58, %v7192_v6  ;;  %v670_v14 = vpop.permute.xlu2 %669 }
 0x175   : > { %3672 = vpow2.f32 %v3354_v39  ;;  %v1429_v45 = vsel %vm1428_vm15, %v3665_v63, %v1425_v37  ;;  %v1554_v10 = vsel %vm1551_vm3, %v1553_v46, %v1549_v9  ;;  %v1198_v30 = vsub.f32 1.0, %v1197_v42  ;;  %v5339_v46 = vld [vmem:[%s7106_s3] ss:$0 sm:$0xff] }
 0x176   : > { %3674 = vrcp.f32 %v1087_v36  ;;  %v1434_v48 = vsel %vm5281_vm11, %v1433_v0, %v1429_v45  ;;  %v1615_v19 = vmul.f32 %v1554_v10, %v5215_v15  ;;  %v1310_v60 = vand.u32 2147483647, %v1087_v36 }
 0x177   : > { %v1607_v29 = vmul.f32 %v1434_v48, %v5218_v43  ;;  %v1199_v4 = vmul.f32 %v3667_v8, %v1198_v30  ;;  %v1312_v63 = vand.u32 2147483648, %v1087_v36  ;;  %vm1306_vm9 = vweird.f32 %v1087_v36 }
 0x178   : > { %1741 = vmatmul.f32.gmra.mxu3 %v1615_v19  ;;  %v590_v55 = vpop.permute.xlu1 %589  ;;  %vm1311_vm11 = vcmp.eq.f32.partialorder %v1310_v60, 8.507059e+37  ;;  %v3907_v60 = vld [vmem:[%s4092_s17 + $0x78] sm:$0xff] }
 0x179   : > { %v684_v12 = vpop.permute.xlu0 %683  ;;  %1717 = vmatmul.f32.gmra.mxu2 %v1607_v29  ;;  %v1200_v40 = vadd.f32 %v3667_v8, %v1199_v4  ;;  %v1313_v20 = vor.u32 1.1754944e-38, %v1312_v63  ;;  %v7195_v63 = vld [vmem:[#allocation16_spill] sm:$0xff] }
 0x17a   : > { %v3671_v41 = vpop.eup %3670  ;;  %v927_v17 = vsel %vm912_vm1, %v894_v49, %v684_v12 }
 0x17b   : > { %v3673_v15 = vpop.eup %3672  ;;  %v5308_v22 = vadd.f32 1.0, %v3671_v41  ;;  %v1204_v16 = vsel %vm1203_vm6, %v3667_v8, %v1200_v40 }
 0x17c   : > { %v3675_v43 = vpop.eup %3674  ;;  %v5310_v2 = vadd.f32 1.0, %v3673_v15  ;;  %v1209_v59 = vsel %vm1206_vm7, %v1208_v56, %v1204_v16  ;;  %v814_v58 = vpop.permute.xlu2 %813 }
 0x17d   : > { %3676 = vrcp.f32 %v5308_v22  ;;  %v1592_v3 = vmul.f32 %v1209_v59, %v5240_v31  ;;  %v1302_v7 = vmul.f32 %v3675_v43, %v1087_v36  ;;  %vm1307_vm8 = vweird.f32 %v3675_v43 }
 0x17e   : > { %3678 = vrcp.f32 %v5310_v2  ;;  %v911_v31 = vsel %vm879_vm0, %v3904_v35, %v590_v55  ;;  %vm1308_vm10 = vmor %vm1306_vm9, %vm1307_vm8  ;;  %vm1441_vm12 = vweird.f32 %v5310_v2  ;;  %v1447_v53 = vand.u32 2147483648, %v5310_v2 }
 0x17f   : > { %1672 = vmatmul.f32.gmra.mxu0 %v1592_v3  ;;  %v1303_v38 = vsub.f32 1.0, %v1302_v7  ;;  %v944_v54 = vsel %vm912_vm1, %v911_v31, %v718_v62  ;;  %v1565_v50 = vand.u32 2147483647, %v5308_v22  ;;  %v1567_v39 = vand.u32 2147483648, %v5308_v22  ;;  %v3906_v3 = vld [vmem:[%s4092_s17 + $0x38] sm:$0xff]  ;;  %s3401_s17 = sshll.u32 %s4057_s25, 8 }
 0x180   : > { %v702_v51 = vpop.permute.xlu1 %701  ;;  %v1445_v42 = vand.u32 2147483647, %v5310_v2  ;;  %vm1561_vm13 = vweird.f32 %v5308_v22  ;;  %v1448_v19 = vor.u32 1.1754944e-38, %v1447_v53  ;;  %s3243_s29 = scalar_lea.hbm %s7109_s6, %s3401_s17  ;;  %s3244_s25 = sshll.u32 %s6088_s11, 4  ;;  %s3245_s25 = int_to_ptr.vmem [resolvable:$true] %s3244_s25 }
 0x181   : > { %v812_v13 = vpop.permute.xlu0 %811  ;;  %v1304_v28 = vmul.f32 %v3675_v43, %v1303_v38  ;;  %v936_v9 = vsel %vm912_vm1, %v903_v52, %v702_v51  ;;  %vm1566_vm4 = vcmp.eq.f32.partialorder %v1565_v50, 8.507059e+37  ;;  %v1568_v12 = vor.u32 1.1754944e-38, %v1567_v39  ;;  %s3246_s10 = sshll.u32 %s3243_s29, 4  ;;  %s3247_s10 = int_to_ptr.hbm [resolvable:$true] %s3246_s10 }
 0x182   : > { %v5322_v57 = vsel %vm945_vm2, %v927_v17, %v812_v13  ;;  %vm1446_vm6 = vcmp.eq.f32.partialorder %v1445_v42, 8.507059e+37  ;;  %v895_v17 = vsel %vm879_vm0, %v3907_v60, %v7195_v63  ;;  %s3941_s13 = sshra.s32 %s3247_s10, 4  ;;  %s3942_s13 = int_to_ptr.hbm [resolvable:$true] %s3941_s13 }
 0x183   : > { %v3677_v33 = vpop.eup %3676  ;;  %v3346_v11 = vmul.f32 -1.442695, %v5322_v57  ;;  %v1305_v26 = vadd.f32 %v3675_v43, %v1304_v28  ;;  %s3943_s14 = scalar_lea.hbm %s3942_s13, 256  ;;  %p3948_p3 = scmp.lt.s32.totalorder %s3942_s13, %s7109_s6 }
 0x184   : > { %v3679_v25 = vpop.eup %3678  ;;  %v1557_v21 = vmul.f32 %v3677_v33, %v5308_v22  ;;  %vm1562_vm14 = vweird.f32 %v3677_v33  ;;  %p3944_p0 = scmp.ne.s32.totalorder %s3942_s13, %s3943_s14  ;;  %p3949_p4 = scmp.lt.s32.totalorder %s3947_s19, %s3943_s14 }
 0x185   : > { %3680 = vpow2.f32 %v3346_v11  ;;  %v1309_v44 = vsel %vm1308_vm10, %v3675_v43, %v1305_v26  ;;  %v1437_v61 = vmul.f32 %v3679_v25, %v5310_v2  ;;  %vm1442_vm15 = vweird.f32 %v3679_v25  ;;  %vm1563_vm3 = vmor %vm1561_vm13, %vm1562_vm14  ;;  %v7194_v2 = vld [vmem:[#allocation10_spill] sm:$0xff] }
 0x186   : > { %v1314_v23 = vsel %vm1311_vm11, %v1313_v20, %v1309_v44  ;;  %v1558_v8 = vsub.f32 1.0, %v1557_v21  ;;  %vm1443_vm5 = vmor %vm1441_vm12, %vm1442_vm15  ;;  %v887_v7 = vsel %vm879_vm0, %v3906_v3, %v7194_v2  ;;  %p3945_p1 = pnand %p3944_p0, %p4074_p5  ;;  %p3950_p7 = por %p3949_p4, %p3948_p3 }
 0x187   : > { %v1599_v0 = vmul.f32 %v1314_v23, %v5266_v32  ;;  %v1438_v1 = vsub.f32 1.0, %v1437_v61  ;;  %v920_v6 = vsel %vm912_vm1, %v887_v7, %v670_v14 }
 0x188   : > { %v846_v37 = vpop.permute.xlu1 %845  ;;  %v1559_v36 = vmul.f32 %v3677_v33, %v1558_v8  ;;  %p3946_p2 = pneg %p3945_p1 }
 0x189   : > { %v830_v32 = vpop.permute.xlu0 %829  ;;  %1693 = vmatmul.f32.gmra.mxu1 %v1599_v0  ;;  %v5345_v45 = vsel %vm945_vm2, %v944_v54, %v846_v37  ;;  %v1439_v10 = vmul.f32 %v3679_v25, %v1438_v1 }
 0x18a   : > { %v5348_v30 = vsel %vm945_vm2, %v936_v9, %v830_v32  ;;  %v3363_v48 = vmul.f32 -1.442695, %v5345_v45  ;;  %v1560_v34 = vadd.f32 %v3677_v33, %v1559_v36  ;;  %p3951_p8 = pnand %p3950_p7, %p3946_p2 }
 0x18b   : > { %v3681_v29 = vpop.eup %3680  ;;  %v3355_v4 = vmul.f32 -1.442695, %v5348_v30  ;;  %v1727_v24 = vpop.f32.mrf.mxu3  ;;  %v1440_v55 = vadd.f32 %v3679_v25, %v1439_v10 }
 0x18c   : > { %v5355_v40 = vadd.f32 1.0, %v3681_v29  ;;  %3682 = vpow2.f32 %v3363_v48  ;;  %v5358_v41 = vadd.f32 %v5339_v46, %v1727_v24  ;;  %v1564_v56 = vsel %vm1563_vm3, %v3677_v33, %v1560_v34  ;;  %v1703_v26 = vpop.f32.mrf.mxu2 }
 0x18d   : > { %3684 = vpow2.f32 %v3355_v4  ;;  %v1655_v15 = vpop.f32.mrf.mxu0  ;;  %v1444_v16 = vsel %vm1443_vm5, %v3679_v25, %v1440_v55  ;;  %v1569_v22 = vsel %vm1566_vm4, %v1568_v12, %v1564_v56  ;;  %v5393_v21 = vadd.f32 %v5339_v46, %v1703_v26 }
 0x18e   : > { %3686 = vrcp.f32 %v5355_v40  ;;  %v5365_v43 = vadd.f32 %v5339_v46, %v1655_v15  ;;  %1799 = vadd.xlane.f32.xlu2 %v5358_v41  ;;  %v1449_v59 = vsel %vm1446_vm6, %v1448_v19, %v1444_v16  ;;  %v1616_v62 = vmul.f32 %v1569_v22, %v5288_v47 }
 0x18f   : > { %v1608_v38 = vmul.f32 %v1449_v59, %v5291_v27  ;;  %v1327_v54 = vand.u32 2147483648, %v5355_v40  ;;  %v1325_v23 = vand.u32 2147483647, %v5355_v40 }
 0x190   : > { %v1679_v49 = vpop.f32.mrf.mxu1  ;;  %1751 = vadd.xlane.f32.xlu0 %v5365_v43  ;;  %1744 = vmatmul.f32.gmra.mxu3 %v1616_v62  ;;  %v798_v51 = vpop.permute.xlu1 %797 }
 0x191   : > { %v5379_v47 = vadd.f32 %v5339_v46, %v1679_v49  ;;  %v686_v13 = vpop.permute.xlu0 %685  ;;  %1720 = vmatmul.f32.gmra.mxu2 %v1608_v38  ;;  %v5382_v28 = vsel %vm945_vm2, %v920_v6, %v798_v51  ;;  %v1328_v50 = vor.u32 1.1754944e-38, %v1327_v54  ;;  %vm1326_vm7 = vcmp.eq.f32.partialorder %v1325_v23, 8.507059e+37 }
 0x192   : > { %v3683_v27 = vpop.eup %3682  ;;  %v928_v35 = vsel %vm912_vm1, %v895_v17, %v686_v13  ;;  %v3339_v31 = vmul.f32 -1.442695, %v5382_v28  ;;  %vm1321_vm1 = vweird.f32 %v5355_v40 }
 0x193   : > { %v3685_v33 = vpop.eup %3684  ;;  %v1105_v11 = vadd.f32 1.0, %v3683_v27  ;;  %v5387_v25 = vsel %vm945_vm2, %v928_v35, %v814_v58  ;;  %1767 = vadd.xlane.f32.xlu1 %v5379_v47 }
 0x194   : > { %v3687_v5 = vpop.eup %3686  ;;  %v1097_v18 = vadd.f32 1.0, %v3685_v33  ;;  %3688 = vpow2.f32 %v3339_v31  ;;  %v3347_v52 = vmul.f32 -1.442695, %v5387_v25 }
 0x195   : > { %3690 = vrcp.f32 %v1105_v11  ;;  %v1317_v20 = vmul.f32 %v3687_v5, %v5355_v40  ;;  %vm1322_vm0 = vweird.f32 %v3687_v5  ;;  %v1582_v29 = vand.u32 2147483648, %v1105_v11 }
 0x196   : > { %3692 = vrcp.f32 %v1097_v18  ;;  %vm1323_vm2 = vmor %vm1321_vm1, %vm1322_vm0  ;;  %v1462_v34 = vand.u32 2147483648, %v1097_v18  ;;  %v1580_v24 = vand.u32 2147483647, %v1105_v11  ;;  %v1460_v12 = vand.u32 2147483647, %v1097_v18 }
 0x197   : > { %3694 = vpow2.f32 %v3347_v52  ;;  %v1318_v44 = vsub.f32 1.0, %v1317_v20  ;;  %vm1576_vm10 = vweird.f32 %v1105_v11  ;;  %vm1456_vm11 = vweird.f32 %v1097_v18 }
 0x198   : > { %1783 = vadd.xlane.f32.xlu0 %v5393_v21  ;;  %v1583_v16 = vor.u32 1.1754944e-38, %v1582_v29  ;;  %vm1581_vm14 = vcmp.eq.f32.partialorder %v1580_v24, 8.507059e+37  ;;  %vm1461_vm15 = vcmp.eq.f32.partialorder %v1460_v12, 8.507059e+37 }
 0x199   : > { %v1319_v61 = vmul.f32 %v3687_v5, %v1318_v44 }
 0x19a   : > { %v3689_v53 = vpop.eup %3688 }
 0x19b   : > { %v3691_v8 = vpop.eup %3690  ;;  %v5398_v14 = vadd.f32 1.0, %v3689_v53  ;;  %v1320_v0 = vadd.f32 %v3687_v5, %v1319_v61 }
 0x19c   : > { %v3693_v1 = vpop.eup %3692  ;;  %v1572_v39 = vmul.f32 %v3691_v8, %v1105_v11  ;;  %vm1577_vm8 = vweird.f32 %v3691_v8 }
 0x19d   : > { %v3695_v37 = vpop.eup %3694  ;;  %3696 = vrcp.f32 %v5398_v14  ;;  %v1324_v42 = vsel %vm1323_vm2, %v3687_v5, %v1320_v0  ;;  %v1452_v36 = vmul.f32 %v3693_v1, %v1097_v18  ;;  %vm1457_vm9 = vweird.f32 %v3693_v1  ;;  %vm1578_vm12 = vmor %vm1576_vm10, %vm1577_vm8  ;;  %v1706_v5 = vpop.f32.mrf.mxu2 }
 0x19e   : > { %v5402_v9 = vadd.f32 1.0, %v3695_v37  ;;  %v1329_v32 = vsel %vm1326_vm7, %v1328_v50, %v1324_v42  ;;  %v1573_v10 = vsub.f32 1.0, %v1572_v39  ;;  %vm1458_vm13 = vmor %vm1456_vm11, %vm1457_vm9  ;;  %v1222_v17 = vand.u32 2147483648, %v5398_v14 }
 0x19f   : > { %v1600_v48 = vmul.f32 %v1329_v32, %v5322_v57  ;;  %v1453_v19 = vsub.f32 1.0, %v1452_v36  ;;  %v1463_v57 = vor.u32 1.1754944e-38, %v1462_v34  ;;  %v1220_v35 = vand.u32 2147483647, %v5398_v14 }
 0x1a0   : > { %3698 = vrcp.f32 %v5402_v9  ;;  %v1574_v4 = vmul.f32 %v3691_v8, %v1573_v10  ;;  %vm1216_vm4 = vweird.f32 %v5398_v14  ;;  %v1223_v33 = vor.u32 1.1754944e-38, %v1222_v17 }
 0x1a1   : > { %1696 = vmatmul.f32.gmra.mxu1 %v1600_v48  ;;  %v1454_v55 = vmul.f32 %v3693_v1, %v1453_v19  ;;  %v1340_v26 = vand.u32 2147483647, %v5402_v9  ;;  %vm1221_vm0 = vcmp.eq.f32.partialorder %v1220_v35, 8.507059e+37  ;;  %vm1336_vm1 = vweird.f32 %v5402_v9 }
 0x1a2   : > { %v1575_v40 = vadd.f32 %v3691_v8, %v1574_v4  ;;  %v5426_v61 = vadd.f32 %v5339_v46, %v1706_v5 }
 0x1a3   : > { %v3697_v56 = vpop.eup %3696  ;;  %v1455_v15 = vadd.f32 %v3693_v1, %v1454_v55  ;;  %vm1341_vm7 = vcmp.eq.f32.partialorder %v1340_v26, 8.507059e+37 }
 0x1a4   : > { %v1579_v22 = vsel %vm1578_vm12, %v3691_v8, %v1575_v40  ;;  %v1212_v59 = vmul.f32 %v3697_v56, %v5398_v14  ;;  %vm1217_vm3 = vweird.f32 %v3697_v56 }
 0x1a5   : > { %v1682_v62 = vpop.f32.mrf.mxu1  ;;  %v1459_v3 = vsel %vm1458_vm13, %v3693_v1, %v1455_v15  ;;  %v1584_v2 = vsel %vm1581_vm14, %v1583_v16, %v1579_v22  ;;  %vm1218_vm5 = vmor %vm1216_vm4, %vm1217_vm3  ;;  %v1730_v22 = vpop.f32.mrf.mxu3 }
 0x1a6   : > { %v3699_v7 = vpop.eup %3698  ;;  %v1658_v38 = vpop.f32.mrf.mxu0  ;;  %v5408_v58 = vadd.f32 %v5339_v46, %v1682_v62  ;;  %v1464_v6 = vsel %vm1461_vm15, %v1463_v57, %v1459_v3  ;;  %v1617_v49 = vmul.f32 %v1584_v2, %v5345_v45  ;;  %v1213_v51 = vsub.f32 1.0, %v1212_v59 }
 0x1a7   : > { %v5412_v60 = vadd.f32 %v5339_v46, %v1658_v38  ;;  %v1609_v63 = vmul.f32 %v1464_v6, %v5348_v30  ;;  %v1332_v13 = vmul.f32 %v3699_v7, %v5402_v9  ;;  %v1342_v30 = vand.u32 2147483648, %v5402_v9 }
 0x1a8   : > { %1769 = vadd.xlane.f32.xlu2 %v5408_v58  ;;  %1747 = vmatmul.f32.gmra.mxu3 %v1617_v49  ;;  %v1214_v27 = vmul.f32 %v3697_v56, %v1213_v51  ;;  %vm1337_vm6 = vweird.f32 %v3699_v7 }
 0x1a9   : > { %1753 = vadd.xlane.f32.xlu1 %v5412_v60  ;;  %1723 = vmatmul.f32.gmra.mxu2 %v1609_v63  ;;  %v1333_v45 = vsub.f32 1.0, %v1332_v13  ;;  %vm1338_vm2 = vmor %vm1336_vm1, %vm1337_vm6  ;;  %v1343_v54 = vor.u32 1.1754944e-38, %v1342_v30 }
 0x1aa   : > { %v1215_v31 = vadd.f32 %v3697_v56, %v1214_v27 }
 0x1ab   : > { %v1334_v11 = vmul.f32 %v3699_v7, %v1333_v45 }
 0x1ac   : > { %v1219_v18 = vsel %vm1218_vm5, %v3697_v56, %v1215_v31 }
 0x1ad   : > { %v1224_v52 = vsel %vm1221_vm0, %v1223_v33, %v1219_v18  ;;  %v1335_v20 = vadd.f32 %v3699_v7, %v1334_v11  ;;  %v5507_v33 = vadd.f32 %v5339_v46, %v1730_v22 }
 0x1ae   : > { %v1593_v44 = vmul.f32 %v1224_v52, %v5382_v28 }
 0x1af   : > { %v1339_v23 = vsel %vm1338_vm2, %v3699_v7, %v1335_v20 }
 0x1b0   : > { %1675 = vmatmul.f32.gmra.mxu0 %v1593_v44  ;;  %v1344_v53 = vsel %vm1341_vm7, %v1343_v54, %v1339_v23 }
 0x1b1   : > { %1785 = vadd.xlane.f32.xlu1 %v5426_v61  ;;  %v1601_v8 = vmul.f32 %v1344_v53, %v5387_v25 }
 0x1b3   : > { %1699 = vmatmul.f32.gmra.mxu1 %v1601_v8  ;;  %v1709_v50 = vpop.f32.mrf.mxu2 }
 0x1b4   : > { %v5439_v39 = vadd.f32 %v5339_v46, %v1709_v50 }
 0x1b7   : > { %v1733_v3 = vpop.f32.mrf.mxu3 }
 0x1b8   : > { %v5491_v6 = vadd.f32 %v5339_v46, %v1733_v3 }
 0x1be   : > { %v1685_v14 = vpop.f32.mrf.mxu1 }
 0x1bf   : > { %v5431_v0 = vadd.f32 %v5339_v46, %v1685_v14  ;;  %v1661_v1 = vpop.f32.mrf.mxu0 }
 0x1c0   : > { %v5434_v28 = vadd.f32 %v5339_v46, %v1661_v1 }
 0x1c1   : > { %1771 = vadd.xlane.f32.xlu0 %v5431_v0 }
 0x1c2   : > { %1755 = vadd.xlane.f32.xlu2 %v5434_v28 }
 0x1c7   : > { %v1664_v37 = vpop.f32.mrf.mxu0 }
 0x1c8   : > { %v5447_v36 = vadd.f32 %v5339_v46, %v1664_v37 }
 0x1ca   : > { %1787 = vadd.xlane.f32.xlu2 %v5439_v39 }
 0x1cb   : > { %v1736_v38 = vpop.f32.mrf.mxu3 }
 0x1cc   : > { %v1712_v25 = vpop.f32.mrf.mxu2  ;;  %v5516_v18 = vadd.f32 %v5339_v46, %v1736_v38 }
 0x1cd   : > { %v5443_v42 = vadd.f32 %v5339_v46, %v1712_v25 }
 0x1cf   : > { %1789 = vadd.xlane.f32.xlu0 %v5443_v42  ;;  %v1667_v9 = vpop.f32.mrf.mxu0 }
 0x1d0   : > { %v5451_v32 = vadd.f32 %v5339_v46, %v1667_v9 }
 0x1d2   : > { %1757 = vadd.xlane.f32.xlu2 %v5447_v36 }
 0x1d6   : > { %v1688_v10 = vpop.f32.mrf.mxu1 }
 0x1d7   : > { %v5454_v48 = vadd.f32 %v5339_v46, %v1688_v10  ;;  %1759 = vadd.xlane.f32.xlu0 %v5451_v32 }
 0x1d9   : > { %1773 = vadd.xlane.f32.xlu1 %v5454_v48 }
 0x1e3   : > { %v1739_v49 = vpop.f32.mrf.mxu3 }
 0x1e4   : > { %v1715_v19 = vpop.f32.mrf.mxu2  ;;  %v1670_v29 = vpop.f32.mrf.mxu0  ;;  %v5525_v54 = vadd.f32 %v5339_v46, %v1739_v49 }
 0x1e5   : > { %v5459_v34 = vadd.f32 %v5339_v46, %v1715_v19  ;;  %v5463_v4 = vadd.f32 %v5339_v46, %v1670_v29 }
 0x1e7   : > { %1791 = vadd.xlane.f32.xlu1 %v5459_v34 }
 0x1ee   : > { %v1691_v24 = vpop.f32.mrf.mxu1 }
 0x1ef   : > { %v5466_v55 = vadd.f32 %v5339_v46, %v1691_v24  ;;  %1761 = vadd.xlane.f32.xlu1 %v5463_v4 }
 0x1f1   : > { %1775 = vadd.xlane.f32.xlu2 %v5466_v55 }
 0x1fb   : > { %v1742_v31 = vpop.f32.mrf.mxu3 }
 0x1fc   : > { %v1718_v12 = vpop.f32.mrf.mxu2  ;;  %v1673_v56 = vpop.f32.mrf.mxu0  ;;  %v5510_v11 = vadd.f32 %v5339_v46, %v1742_v31 }
 0x1fd   : > { %v5471_v40 = vadd.f32 %v5339_v46, %v1718_v12  ;;  %v5475_v15 = vadd.f32 %v5339_v46, %v1673_v56 }
 0x1ff   : > { %1793 = vadd.xlane.f32.xlu2 %v5471_v40 }
 0x201   : > { %v1800_v27 = vpop.xlane.xlu2 %1799 }
 0x202   : > { %v5527_v53 = vmul.f32 0.015625, %v1800_v27 }
 0x203   : > { %v1752_v30 = vpop.xlane.xlu0 %1751 }
 0x204   : > { %v5512_v26 = vmul.f32 0.015625, %v1752_v30  ;;  %v5540_v25 = vsub.f32 %v5358_v41, %v5527_v53 }
 0x206   : > { %v1694_v16 = vpop.f32.mrf.mxu1  ;;  %v1768_v52 = vpop.xlane.xlu1 %1767  ;;  %v5522_v44 = vsub.f32 %v5365_v43, %v5512_v26  ;;  %v1903_v24 = vmul.f32 %v5540_v25, %v5540_v25 }
 0x207   : > { %v5478_v57 = vadd.f32 %v5339_v46, %v1694_v16  ;;  %1763 = vadd.xlane.f32.xlu2 %v5475_v15  ;;  %v5546_v10 = vmul.f32 0.015625, %v1768_v52 }
 0x208   : > { %v1879_v8 = vmul.f32 %v5522_v44, %v5522_v44 }
 0x209   : > { %1777 = vadd.xlane.f32.xlu0 %v5478_v57  ;;  %v5562_v56 = vsub.f32 %v5379_v47, %v5546_v10 }
 0x20b   : > { %v1784_v23 = vpop.xlane.xlu0 %1783  ;;  %v1887_v3 = vmul.f32 %v5562_v56, %v5562_v56 }
 0x20c   : > { %v5532_v1 = vmul.f32 0.015625, %v1784_v23 }
 0x20e   : > { %v5544_v9 = vsub.f32 %v5393_v21, %v5532_v1 }
 0x210   : > { %v1895_v41 = vmul.f32 %v5544_v9, %v5544_v9 }
 0x213   : > { %v1745_v20 = vpop.f32.mrf.mxu3 }
 0x214   : > { %v1721_v59 = vpop.f32.mrf.mxu2  ;;  %v5535_v50 = vadd.f32 %v5339_v46, %v1745_v20 }
 0x215   : > { %v5483_v62 = vadd.f32 %v5339_v46, %v1721_v59 }
 0x217   : > { %1795 = vadd.xlane.f32.xlu0 %v5483_v62 }
 0x21b   : > { %v1770_v5 = vpop.xlane.xlu2 %1769 }
 0x21c   : > { %v1754_v37 = vpop.xlane.xlu1 %1753  ;;  %v5551_v29 = vmul.f32 0.015625, %v1770_v5 }
 0x21d   : > { %v5556_v12 = vmul.f32 0.015625, %v1754_v37 }
 0x21e   : > { %v1697_v2 = vpop.f32.mrf.mxu1  ;;  %v5566_v16 = vsub.f32 %v5408_v58, %v5551_v29 }
 0x21f   : > { %v5487_v7 = vadd.f32 %v5339_v46, %v1697_v2  ;;  %v5570_v22 = vsub.f32 %v5412_v60, %v5556_v12 }
 0x220   : > { %v1888_v47 = vmul.f32 %v5566_v16, %v5566_v16 }
 0x221   : > { %1779 = vadd.xlane.f32.xlu1 %v5487_v7  ;;  %v1880_v58 = vmul.f32 %v5570_v22, %v5570_v22 }
 0x229   : > { %1803 = vadd.xlane.f32.xlu1 %v5491_v6 }
 0x22b   : > { %v1748_v43 = vpop.f32.mrf.mxu3 }
 0x22c   : > { %v1724_v51 = vpop.f32.mrf.mxu2  ;;  %v5549_v19 = vadd.f32 %v5339_v46, %v1748_v43 }
 0x22d   : > { %v1676_v63 = vpop.f32.mrf.mxu0  ;;  %v5498_v13 = vadd.f32 %v5339_v46, %v1724_v51 }
 0x22e   : > { %v5495_v17 = vadd.f32 %v5339_v46, %v1676_v63 }
 0x230   : > { %v1700_v35 = vpop.f32.mrf.mxu1  ;;  %1765 = vadd.xlane.f32.xlu0 %v5495_v17 }
 0x231   : > { %v5502_v45 = vadd.f32 %v5339_v46, %v1700_v35  ;;  %1797 = vadd.xlane.f32.xlu1 %v5498_v13  ;;  %v1786_v46 = vpop.xlane.xlu1 %1785 }
 0x232   : > { %v5572_v59 = vmul.f32 0.015625, %v1786_v46 }
 0x233   : > { %1781 = vadd.xlane.f32.xlu2 %v5502_v45 }
 0x234   : > { %v5584_v38 = vsub.f32 %v5426_v61, %v5572_v59  ;;  %v1772_v5 = vpop.xlane.xlu0 %1771 }
 0x235   : > { %v1756_v14 = vpop.xlane.xlu2 %1755 }
 0x236   : > { %v5590_v51 = vmul.f32 0.015625, %v1756_v14  ;;  %v1896_v63 = vmul.f32 %v5584_v38, %v5584_v38 }
 0x238   : > { %1801 = vadd.xlane.f32.xlu0 %v5507_v33  ;;  %v5600_v61 = vsub.f32 %v5434_v28, %v5590_v51 }
 0x239   : > { %1809 = vadd.xlane.f32.xlu1 %v5510_v11 }
 0x23a   : > { %v1881_v31 = vmul.f32 %v5600_v61, %v5600_v61 }
 0x23b   : > { %1805 = vadd.xlane.f32.xlu2 %v5516_v18 }
 0x23d   : > { %v1788_v21 = vpop.xlane.xlu2 %1787 }
 0x23e   : > { %v5576_v2 = vmul.f32 0.015625, %v1788_v21 }
 0x240   : > { %1807 = vadd.xlane.f32.xlu0 %v5525_v54  ;;  %v5588_v60 = vsub.f32 %v5439_v39, %v5576_v2 }
 0x241   : > { %1911 = vadd.xlane.f32.xlu1 %v1879_v8 }
 0x242   : > { %v1897_v35 = vmul.f32 %v5588_v60, %v5588_v60  ;;  %v1790_v20 = vpop.xlane.xlu0 %1789 }
 0x243   : > { %1811 = vadd.xlane.f32.xlu2 %v5535_v50 }
 0x245   : > { %v1758_v49 = vpop.xlane.xlu2 %1757 }
 0x246   : > { %v5594_v27 = vmul.f32 0.015625, %v1758_v49 }
 0x248   : > { %1813 = vadd.xlane.f32.xlu0 %v5549_v19  ;;  %v5604_v39 = vsub.f32 %v5447_v36, %v5594_v27 }
 0x249   : > { %1959 = vadd.xlane.f32.xlu1 %v1903_v24 }
 0x24a   : > { %7196 = vst [vmem:[#allocation8_spill] sm:$0xff] %v5604_v39  ;;  %v1882_v30 = vmul.f32 %v5604_v39, %v5604_v39  ;;  %v1760_v8 = vpop.xlane.xlu0 %1759 }
 0x24b   : > { %1943 = vadd.xlane.f32.xlu2 %v1895_v41 }
 0x24c   : > { %v1774_v52 = vpop.xlane.xlu1 %1773 }
 0x250   : > { %1927 = vadd.xlane.f32.xlu0 %v1887_v3 }
 0x251   : > { %1929 = vadd.xlane.f32.xlu1 %v1888_v47  ;;  %v5620_v47 = vmul.f32 0.015625, %v1774_v52 }
 0x253   : > { %1913 = vadd.xlane.f32.xlu2 %v1880_v58  ;;  %7198 = vst [vmem:[#allocation12_spill] sm:$0xff] %v5620_v47 }
 0x258   : > { %1945 = vadd.xlane.f32.xlu0 %v1896_v63 }
 0x259   : > { %1947 = vadd.xlane.f32.xlu1 %v1897_v35  ;;  %v5630_v35 = vsub.f32 %v5454_v48, %v5620_v47  ;;  %v1975_v47 = vmul.f32 64.0, %v5512_v26 }
 0x25a   : > { %v1792_v23 = vpop.xlane.xlu1 %1791 }
 0x25b   : > { %7199 = vst [vmem:[#allocation11_spill] sm:$0xff] %v5630_v35 }
 0x260   : > { %1915 = vadd.xlane.f32.xlu0 %v1881_v31 }
 0x261   : > { %1917 = vadd.xlane.f32.xlu1 %v1882_v30  ;;  %v5634_v30 = vmul.f32 0.015625, %v1792_v23 }
 0x262   : > { %v1762_v14 = vpop.xlane.xlu1 %1761 }
 0x263   : > { %7200 = vst [vmem:[#allocation15_spill] sm:$0xff] %v5634_v30 }
 0x264   : > { %v1776_v28 = vpop.xlane.xlu2 %1775 }
 0x272   : > { %v1794_v43 = vpop.xlane.xlu2 %1793 }
 0x27a   : > { %v1764_v46 = vpop.xlane.xlu2 %1763 }
 0x27c   : > { %v5610_v37 = vpop.xlane.xlu0 %1777 }
 0x28a   : > { %v5612_v24 = vpop.xlane.xlu0 %1795 }
 0x294   : > { %v1780_v36 = vpop.xlane.xlu1 %1779 }
 0x29c   : > { %v1804_v41 = vpop.xlane.xlu1 %1803 }
 0x29d   : > { %v5614_v21 = vmul.f32 0.015625, %v1804_v41 }
 0x29f   : > { %v5618_v3 = vsub.f32 %v5491_v6, %v5614_v21  ;;  %v1890_v6 = vmul.f32 %v5630_v35, %v5630_v35  ;;  %v5653_v35 = vmul.f32 0.015625, %v1772_v5 }
 0x2a1   : > { %7197 = vst [vmem:[#allocation17_spill] sm:$0xff] %v5618_v3  ;;  %v1905_v58 = vmul.f32 %v5618_v3, %v5618_v3  ;;  %v5644_v3 = vsub.f32 %v5459_v34, %v5634_v30 }
 0x2a2   : > { %7205 = vst [vmem:[#allocation13_spill] sm:$0xff] %v5653_v35 }
 0x2a3   : > { %1963 = vadd.xlane.f32.xlu0 %v1905_v58  ;;  %v5624_v49 = vpop.xlane.xlu0 %1765  ;;  %7202 = vst [vmem:[#allocation14_spill] sm:$0xff] %v5644_v3  ;;  %v1899_v34 = vmul.f32 %v5644_v3, %v5644_v3  ;;  %v5675_v3 = vsub.f32 %v5431_v0, %v5653_v35  ;;  %v5691_v0 = vmul.f32 0.015625, %v1760_v8  ;;  %v1992_v8 = vmul.f32 64.0, %v5572_v59 }
 0x2a4   : > { %v5626_v63 = vpop.xlane.xlu1 %1797 }
 0x2a5   : > { %7209 = vst [vmem:[#allocation21_spill] sm:$0xff] %v5675_v3 }
 0x2a6   : > { %v5632_v31 = vpop.xlane.xlu2 %1781 }
 0x2ab   : > { %1933 = vadd.xlane.f32.xlu0 %v1890_v6  ;;  %v1802_v52 = vpop.xlane.xlu0 %1801 }
 0x2ac   : > { %v5638_v41 = vmul.f32 0.015625, %v1802_v52  ;;  %v5640_v58 = vpop.xlane.xlu1 %1809  ;;  %v5657_v52 = vmul.f32 0.015625, %v1762_v14  ;;  %v1999_v14 = vmul.f32 64.0, %v5527_v53 }
 0x2ae   : > { %7201 = vst [vmem:[#allocation19_spill] sm:$0xff] %v5638_v41  ;;  %v1806_v39 = vpop.xlane.xlu2 %1805  ;;  %v5648_v48 = vsub.f32 %v5507_v33, %v5638_v41  ;;  %v5665_v33 = vmul.f32 0.015625, %v1776_v28 }
 0x2af   : > { %v5650_v23 = vmul.f32 0.015625, %v1806_v39  ;;  %7206 = vst [vmem:[#allocation10_spill] sm:$0xff] %v5657_v52 }
 0x2b0   : > { %7203 = vst [vmem:[#allocation18_spill] sm:$0xff] %v5648_v48  ;;  %v1904_v6 = vmul.f32 %v5648_v48, %v5648_v48  ;;  %v2007_v48 = vmul.f32 %v1975_v47, %v5512_v26  ;;  %v2031_v26 = vmul.f32 %v1999_v14, %v5527_v53  ;;  %v1983_v47 = vmul.f32 64.0, %v5546_v10 }
 0x2b1   : > { %7204 = vst [vmem:[#allocation9_spill] sm:$0xff] %v5650_v23  ;;  %v5663_v30 = vsub.f32 %v5516_v18, %v5650_v23  ;;  %v5679_v18 = vsub.f32 %v5463_v4, %v5657_v52  ;;  %v5689_v23 = vmul.f32 0.015625, %v1790_v20  ;;  %v1889_v4 = vmul.f32 %v5675_v3, %v5675_v3 }
 0x2b2   : > { %1961 = vadd.xlane.f32.xlu2 %v1904_v6  ;;  %7208 = vst [vmem:[#allocation20_spill] sm:$0xff] %v5665_v33  ;;  %v1984_v53 = vmul.f32 64.0, %v5551_v29  ;;  %v5703_v14 = vmul.f32 0.015625, %v1794_v43  ;;  %v1976_v20 = vmul.f32 64.0, %v5556_v12  ;;  %v5708_v3 = vmul.f32 0.015625, %v1764_v46 }
 0x2b3   : > { %7207 = vst [vmem:[#allocation16_spill] sm:$0xff] %v5663_v30  ;;  %1951 = vadd.xlane.f32.xlu0 %v1899_v34  ;;  %v1906_v39 = vmul.f32 %v5663_v30, %v5663_v30  ;;  %v5669_v5 = vpop.xlane.xlu0 %1807  ;;  %v5685_v30 = vsub.f32 %v5466_v55, %v5665_v33  ;;  %v1884_v55 = vmul.f32 %v5679_v18, %v5679_v18  ;;  %v1993_v43 = vmul.f32 64.0, %v5576_v2 }
 0x2b4   : > { %v1912_v41 = vpop.xlane.xlu1 %1911  ;;  %7210 = vst [vmem:[#allocation22_spill] sm:$0xff] %v5679_v18  ;;  %v5721_v33 = vsub.f32 %v5443_v42, %v5689_v23  ;;  %v2015_v46 = vmul.f32 %v1983_v47, %v5546_v10  ;;  %v2016_v35 = vmul.f32 %v1984_v53, %v5551_v29  ;;  %v5736_v42 = vsub.f32 %v5471_v40, %v5703_v14 }
 0x2b5   : > { %1965 = vadd.xlane.f32.xlu1 %v1906_v39  ;;  %v2039_v28 = vsub.f32 %v1912_v41, %v2007_v48  ;;  %7211 = vst [vmem:[#allocation23_spill] sm:$0xff] %v5685_v30  ;;  %v1991_v41 = vmul.f32 64.0, %v5532_v1  ;;  %v5696_v48 = vmul.f32 0.015625, %v1780_v36  ;;  %v1891_v36 = vmul.f32 %v5685_v30, %v5685_v30 }
 0x2b6   : > { %v5681_v6 = vpop.xlane.xlu2 %1811  ;;  %7212 = vst [vmem:[#allocation24_spill] sm:$0xff] %v5689_v23  ;;  %v2008_v10 = vmul.f32 %v1976_v20, %v5556_v12  ;;  %v5750_v29 = vmul.f32 %v1993_v43, %v5576_v2  ;;  %v1898_v12 = vmul.f32 %v5721_v33, %v5721_v33  ;;  %v5783_v20 = vmul.f32 0.015625, %v5632_v31 }
 0x2b7   : > { %v2071_v34 = vmul.f32 0.015625, %v2039_v28  ;;  %v1977_v28 = vmul.f32 64.0, %v5590_v51  ;;  %v5730_v30 = vsub.f32 %v5487_v7, %v5696_v48  ;;  %v5747_v7 = vsub.f32 %v5475_v15, %v5708_v3 }
 0x2b9   : > { %v5698_v39 = vadd.f32 1e-05, %v2071_v34  ;;  %v5743_v47 = vmul.f32 %v1977_v28, %v5590_v51  ;;  %v5761_v51 = vmul.f32 64.0, %v5594_v27  ;;  %v5791_v28 = vmul.f32 0.015625, %v5640_v58 }
 0x2ba   : > { %1931 = vadd.xlane.f32.xlu2 %v1889_v4  ;;  %v5717_v4 = vmul.f32 0.015625, %v5610_v37  ;;  %v2023_v37 = vmul.f32 %v1991_v41, %v5532_v1  ;;  %v5776_v41 = vmul.f32 0.015625, %v5624_v49  ;;  %v1885_v49 = vmul.f32 %v5747_v7, %v5747_v7 }
 0x2bb   : > { %3700 = vrsqrt.f32 %v5698_v39  ;;  %1921 = vadd.xlane.f32.xlu0 %v1884_v55  ;;  %v5713_v34 = vpop.xlane.xlu0 %1813  ;;  %v5726_v55 = vsub.f32 %v5451_v32, %v5691_v0  ;;  %v5740_v32 = vmul.f32 %v1992_v8, %v5572_v59  ;;  %vm2141_vm9 = vweird.f32 %v5698_v39 }
 0x2bc   : > { %v1960_v18 = vpop.xlane.xlu1 %1959  ;;  %v5754_v40 = vsub.f32 %v5478_v57, %v5717_v4  ;;  %v1893_v57 = vmul.f32 %v5730_v30, %v5730_v30  ;;  %7214 = vst [vmem:[#allocation26_spill] sm:$0xff] %v5776_v41 }
 0x2bd   : > { %1935 = vadd.xlane.f32.xlu1 %v1891_v36  ;;  %v2063_v52 = vsub.f32 %v1960_v18, %v2031_v26  ;;  %v1883_v59 = vmul.f32 %v5726_v55, %v5726_v55  ;;  %v5773_v26 = vmul.f32 0.015625, %v5612_v24 }
 0x2be   : > { %v1944_v23 = vpop.xlane.xlu2 %1943  ;;  %7213 = vst [vmem:[#allocation25_spill] sm:$0xff] %v5754_v40  ;;  %v5796_v31 = vmul.f32 %v5754_v40, %v5754_v40 }
 0x2bf   : > { %v2095_v1 = vmul.f32 0.015625, %v2063_v52  ;;  %v2055_v18 = vsub.f32 %v1944_v23, %v2023_v37  ;;  %v5766_v23 = vmul.f32 0.015625, %v5626_v63  ;;  %v1900_v63 = vmul.f32 %v5736_v42, %v5736_v42 }
 0x2c1   : > { %v5763_v15 = vpop.eup %3700  ;;  %v5768_v2 = vadd.f32 1e-05, %v2095_v1  ;;  %v2087_v52 = vmul.f32 0.015625, %v2055_v18  ;;  %v5800_v1 = vsub.f32 %v5498_v13, %v5766_v23  ;;  %v5803_v18 = vmul.f32 0.015625, %v5669_v5 }
 0x2c2   : > { %v2136_v53 = vmul.f32 %v5763_v15, %v5698_v39  ;;  %1949 = vadd.xlane.f32.xlu2 %v1898_v12  ;;  %v5808_v12 = vsub.f32 %v5483_v62, %v5773_v26  ;;  %v5816_v13 = vsub.f32 %v5502_v45, %v5783_v20  ;;  %v5819_v5 = vmul.f32 0.015625, %v5681_v6 }
 0x2c3   : > { %3702 = vrsqrt.f32 %v5768_v2  ;;  %v5786_v8 = vadd.f32 1e-05, %v2087_v52  ;;  %1939 = vadd.xlane.f32.xlu0 %v1893_v57  ;;  %v1928_v24 = vpop.xlane.xlu0 %1927  ;;  %v5823_v62 = vsub.f32 %v5510_v11, %v5791_v28  ;;  %vm2142_vm8 = vweird.f32 %v5763_v15 }
 0x2c4   : > { %v2137_v36 = vmul.f32 %v5763_v15, %v2136_v53  ;;  %v2047_v43 = vsub.f32 %v1928_v24, %v2015_v46  ;;  %v1930_v37 = vpop.xlane.xlu1 %1929  ;;  %v5812_v46 = vsub.f32 %v5495_v17, %v5776_v41  ;;  %7215 = vst [vmem:[#allocation27_spill] sm:$0xff] %v5816_v13  ;;  %v5832_v45 = vsub.f32 %v5525_v54, %v5803_v18  ;;  %v5848_v54 = vld [vmem:[%s7107_s4] ss:$0 sm:$0xff]  ;;  %vm2143_vm10 = vmor %vm2141_vm9, %vm2142_vm8 }
 0x2c5   : > { %3704 = vrsqrt.f32 %v5786_v8  ;;  %1953 = vadd.xlane.f32.xlu1 %v1900_v63  ;;  %v2048_v58 = vsub.f32 %v1930_v37, %v2016_v35  ;;  %7216 = vst [vmem:[#allocation28_spill] sm:$0xff] %v5823_v62  ;;  %vm2381_vm11 = vweird.f32 %v5768_v2  ;;  %vm2301_vm13 = vweird.f32 %v5786_v8 }
 0x2c6   : > { %v2138_v52 = vmul.f32 0.5, %v2137_v36  ;;  %v2079_v57 = vmul.f32 0.015625, %v2047_v43  ;;  %v1914_v53 = vpop.xlane.xlu2 %1913 }
 0x2c7   : > { %v2080_v63 = vmul.f32 0.015625, %v2048_v58  ;;  %v2040_v35 = vsub.f32 %v1914_v53, %v2008_v10  ;;  %v1902_v10 = vmul.f32 %v5800_v1, %v5800_v1 }
 0x2c8   : > { %v2139_v24 = vsub.f32 1.5, %v2138_v52  ;;  %v5826_v17 = vadd.f32 1e-05, %v2079_v57  ;;  %v5852_v52 = vsub.f32 %v5535_v50, %v5819_v5  ;;  %v1908_v50 = vmul.f32 %v5823_v62, %v5823_v62 }
 0x2c9   : > { %v5828_v36 = vpop.eup %3702  ;;  %v5834_v43 = vadd.f32 1e-05, %v2080_v63  ;;  %v2072_v6 = vmul.f32 0.015625, %v2040_v35 }
 0x2ca   : > { %v2140_v11 = vmul.f32 %v5763_v15, %v2139_v24  ;;  %v2376_v37 = vmul.f32 %v5828_v36, %v5768_v2  ;;  %3706 = vrsqrt.f32 %v5826_v17  ;;  %1919 = vadd.xlane.f32.xlu2 %v1883_v59  ;;  %v1894_v59 = vmul.f32 %v5816_v13, %v5816_v13 }
 0x2cb   : > { %v5843_v58 = vpop.eup %3704  ;;  %3708 = vrsqrt.f32 %v5834_v43  ;;  %v5855_v39 = vadd.f32 1e-05, %v2072_v6  ;;  %1957 = vadd.xlane.f32.xlu0 %v1902_v10  ;;  %v1946_v57 = vpop.xlane.xlu0 %1945  ;;  %v5868_v6 = vld [vmem:[%s7108_s5] ss:$0 sm:$0xff]  ;;  %vm2382_vm12 = vweird.f32 %v5828_v36  ;;  %vm2221_vm3 = vweird.f32 %v5826_v17 }
 0x2cc   : > { %v2144_v53 = vsel %vm2143_vm10, %v5763_v15, %v2140_v11  ;;  %v2377_v63 = vmul.f32 %v5828_v36, %v2376_v37  ;;  %v2296_v35 = vmul.f32 %v5843_v58, %v5786_v8  ;;  %v1948_v24 = vpop.xlane.xlu1 %1947  ;;  %v2056_v15 = vsub.f32 %v1946_v57, %v5740_v32  ;;  %vm2383_vm15 = vmor %vm2381_vm11, %vm2382_vm12 }
 0x2cd   : > { %v2455_v10 = vmul.f32 %v2144_v53, %v5522_v44  ;;  %3710 = vrsqrt.f32 %v5855_v39  ;;  %1923 = vadd.xlane.f32.xlu1 %v1885_v49  ;;  %v1907_v11 = vmul.f32 %v5832_v45, %v5832_v45  ;;  %v5876_v37 = vmul.f32 0.015625, %v5713_v34 }
 0x2ce   : > { %v2378_v40 = vmul.f32 0.5, %v2377_v63  ;;  %v2297_v13 = vmul.f32 %v5843_v58, %v2296_v35  ;;  %v2057_v62 = vsub.f32 %v1948_v24, %v5750_v29  ;;  %v2088_v44 = vmul.f32 0.015625, %v2056_v15 }
 0x2cf   : > { %v2491_v41 = vmul.f32 %v5848_v54, %v2455_v10  ;;  %v5884_v49 = vmul.f32 %v5852_v52, %v5852_v52  ;;  %vm2302_vm14 = vweird.f32 %v5843_v58  ;;  %vm2231_vm5 = vweird.f32 %v5834_v43 }
 0x2d0   : > { %v5886_v32 = vpop.eup %3706  ;;  %v2379_v57 = vsub.f32 1.5, %v2378_v40  ;;  %v2298_v34 = vmul.f32 0.5, %v2297_v13  ;;  %v5898_v35 = vadd.f32 1e-05, %v2088_v44  ;;  %v2089_v10 = vmul.f32 0.015625, %v2057_v62  ;;  %vm2303_vm4 = vmor %vm2301_vm13, %vm2302_vm14 }
 0x2d1   : > { %v5890_v53 = vpop.eup %3708  ;;  %v5893_v29 = vadd.f32 %v5868_v6, %v2491_v41  ;;  %v2216_v63 = vmul.f32 %v5886_v32, %v5826_v17  ;;  %vm2222_vm6 = vweird.f32 %v5886_v32  ;;  %vm2151_vm1 = vweird.f32 %v5855_v39 }
 0x2d2   : > { %v2380_v24 = vmul.f32 %v5828_v36, %v2379_v57  ;;  %v2299_v40 = vsub.f32 1.5, %v2298_v34  ;;  %v2226_v13 = vmul.f32 %v5890_v53, %v5834_v43  ;;  %1967 = vadd.xlane.f32.xlu2 %v1907_v11  ;;  %3712 = vrsqrt.f32 %v5898_v35  ;;  %vm2223_vm2 = vmor %vm2221_vm3, %vm2222_vm6 }
 0x2d3   : > { %v5903_v15 = vpop.eup %3710  ;;  %v3364_v41 = vmul.f32 -1.442695, %v5893_v29  ;;  %v2217_v44 = vmul.f32 %v5886_v32, %v2216_v63  ;;  %1969 = vadd.xlane.f32.xlu0 %v1908_v50  ;;  %vm2232_vm0 = vweird.f32 %v5890_v53  ;;  %vm2311_vm10 = vweird.f32 %v5898_v35 }
 0x2d4   : > { %v2384_v57 = vsel %vm2383_vm15, %v5828_v36, %v2380_v24  ;;  %v2300_v62 = vmul.f32 %v5843_v58, %v2299_v40  ;;  %v2227_v11 = vmul.f32 %v5890_v53, %v2226_v13  ;;  %v2146_v34 = vmul.f32 %v5903_v15, %v5855_v39  ;;  %vm2233_vm8 = vmor %vm2231_vm5, %vm2232_vm0 }
 0x2d5   : > { %3714 = vpow2.f32 %v3364_v41  ;;  %v2479_v2 = vmul.f32 %v2384_v57, %v5540_v25  ;;  %v2218_v63 = vmul.f32 0.5, %v2217_v44  ;;  %1941 = vadd.xlane.f32.xlu1 %v1894_v59  ;;  %v5926_v40 = vadd.f32 1e-05, %v2089_v10  ;;  %v1916_v59 = vpop.xlane.xlu0 %1915 }
 0x2d6   : > { %v2304_v36 = vsel %vm2303_vm4, %v5843_v58, %v2300_v62  ;;  %v2228_v50 = vmul.f32 0.5, %v2227_v11  ;;  %v2147_v24 = vmul.f32 %v5903_v15, %v2146_v34  ;;  %vm2152_vm7 = vweird.f32 %v5903_v15 }
 0x2d7   : > { %v2515_v13 = vmul.f32 %v5848_v54, %v2479_v2  ;;  %v2471_v25 = vmul.f32 %v2304_v36, %v5544_v9  ;;  %v2219_v41 = vsub.f32 1.5, %v2218_v63  ;;  %3716 = vrsqrt.f32 %v5926_v40  ;;  %vm2153_vm9 = vmor %vm2151_vm1, %vm2152_vm7 }
 0x2d8   : > { %v2229_v8 = vsub.f32 1.5, %v2228_v50  ;;  %v2148_v44 = vmul.f32 0.5, %v2147_v24  ;;  %v5933_v58 = vpop.eup %3712  ;;  %v2041_v17 = vsub.f32 %v1916_v59, %v5743_v47  ;;  %vm2321_vm12 = vweird.f32 %v5926_v40 }
 0x2d9   : > { %v5936_v57 = vadd.f32 %v5868_v6, %v2515_v13  ;;  %v2507_v10 = vmul.f32 %v5848_v54, %v2471_v25  ;;  %v2220_v62 = vmul.f32 %v5886_v32, %v2219_v41  ;;  %v2306_v34 = vmul.f32 %v5933_v58, %v5898_v35 }
 0x2da   : > { %v2230_v9 = vmul.f32 %v5890_v53, %v2229_v8  ;;  %v2149_v11 = vsub.f32 1.5, %v2148_v44  ;;  %1937 = vadd.xlane.f32.xlu2 %v5796_v31  ;;  %v2073_v59 = vmul.f32 0.015625, %v2041_v17  ;;  %vm2312_vm11 = vweird.f32 %v5933_v58 }
 0x2db   : > { %v3715_v2 = vpop.eup %3714  ;;  %v3388_v63 = vmul.f32 -1.442695, %v5936_v57  ;;  %v5950_v36 = vadd.f32 %v5868_v6, %v2507_v10  ;;  %v2224_v50 = vsel %vm2223_vm2, %v5886_v32, %v2220_v62  ;;  %v2307_v8 = vmul.f32 %v5933_v58, %v2306_v34  ;;  %vm2313_vm14 = vmor %vm2311_vm10, %vm2312_vm11 }
 0x2dc   : > { %v5958_v24 = vadd.f32 1.0, %v3715_v2  ;;  %v2463_v13 = vmul.f32 %v2224_v50, %v5562_v56  ;;  %v2234_v31 = vsel %vm2233_vm8, %v5890_v53, %v2230_v9  ;;  %v2150_v25 = vmul.f32 %v5903_v15, %v2149_v11 }
 0x2dd   : > { %3718 = vpow2.f32 %v3388_v63  ;;  %v3380_v41 = vmul.f32 -1.442695, %v5950_v36  ;;  %v2464_v32 = vmul.f32 %v2234_v31, %v5566_v16  ;;  %1971 = vadd.xlane.f32.xlu1 %v5884_v49  ;;  %v5967_v43 = vpop.eup %3716  ;;  %v5972_v56 = vsub.f32 %v5549_v19, %v5876_v37 }
 0x2de   : > { %3720 = vrcp.f32 %v5958_v24  ;;  %v5980_v16 = vmul.f32 %v5761_v51, %v5594_v27  ;;  %v2499_v47 = vmul.f32 %v5848_v54, %v2463_v13  ;;  %v2154_v53 = vsel %vm2153_vm9, %v5903_v15, %v2150_v25 }
 0x2df   : > { %3722 = vpow2.f32 %v3380_v41  ;;  %v2500_v49 = vmul.f32 %v5848_v54, %v2464_v32  ;;  %v2456_v44 = vmul.f32 %v2154_v53, %v5570_v22  ;;  %v2308_v19 = vmul.f32 0.5, %v2307_v8 }
 0x2e0   : > { %v1901_v10 = vmul.f32 %v5808_v12, %v5808_v12  ;;  %v5989_v39 = vadd.f32 %v5868_v6, %v2499_v47  ;;  %v2316_v51 = vmul.f32 %v5967_v43, %v5926_v40  ;;  %v1886_v62 = vmul.f32 %v5812_v46, %v5812_v46 }
 0x2e1   : > { %v5992_v27 = vadd.f32 %v5868_v6, %v2500_v49  ;;  %v2492_v15 = vmul.f32 %v5848_v54, %v2456_v44  ;;  %v2309_v22 = vsub.f32 1.5, %v2308_v19  ;;  %v6002_v9 = vmul.f32 %v5972_v56, %v5972_v56 }
 0x2e2   : > { %1955 = vadd.xlane.f32.xlu2 %v1901_v10  ;;  %v3372_v34 = vmul.f32 -1.442695, %v5989_v39  ;;  %v2317_v63 = vmul.f32 %v5967_v43, %v2316_v51  ;;  %v6014_v25 = vadd.f32 1e-05, %v2073_v59  ;;  %v2696_v47 = vand.u32 2147483647, %v5958_v24  ;;  %v6032_v51 = vpop.xlane.xlu1 %1917 }
 0x2e3   : > { %v3719_v11 = vpop.eup %3718  ;;  %v3373_v2 = vmul.f32 -1.442695, %v5992_v27  ;;  %v6011_v13 = vadd.f32 %v5868_v6, %v2492_v15  ;;  %v2310_v31 = vmul.f32 %v5933_v58, %v2309_v22  ;;  %v2698_v49 = vand.u32 2147483648, %v5958_v24 }
 0x2e4   : > { %v3721_v50 = vpop.eup %3720  ;;  %v6008_v17 = vadd.f32 1.0, %v3719_v11  ;;  %3724 = vpow2.f32 %v3372_v34  ;;  %v2318_v8 = vmul.f32 0.5, %v2317_v63  ;;  %vm2322_vm13 = vweird.f32 %v5967_v43 }
 0x2e5   : > { %v3723_v41 = vpop.eup %3722  ;;  %v2688_v32 = vmul.f32 %v3721_v50, %v5958_v24  ;;  %v3365_v19 = vmul.f32 -1.442695, %v6011_v13  ;;  %vm2693_vm15 = vweird.f32 %v3721_v50  ;;  %v2314_v59 = vsel %vm2313_vm14, %v5933_v58, %v2310_v31  ;;  %vm6052_vm5 = vmor %vm2321_vm12, %vm2322_vm13 }
 0x2e6   : > { %3726 = vrcp.f32 %v6008_v17  ;;  %v6022_v44 = vadd.f32 1.0, %v3723_v41  ;;  %v2319_v10 = vsub.f32 1.5, %v2318_v8  ;;  %v3056_v22 = vand.u32 2147483647, %v6008_v17 }
 0x2e7   : > { %v2689_v53 = vsub.f32 1.0, %v2688_v32  ;;  %3728 = vpow2.f32 %v3373_v2  ;;  %v3058_v11 = vand.u32 2147483648, %v6008_v17  ;;  %vm2692_vm3 = vweird.f32 %v5958_v24 }
 0x2e8   : > { %3730 = vrsqrt.f32 %v6014_v25  ;;  %v2472_v35 = vmul.f32 %v2314_v59, %v5584_v38  ;;  %v2320_v34 = vmul.f32 %v5967_v43, %v2319_v10  ;;  %vm6044_vm4 = vcmp.eq.f32.partialorder %v2696_v47, 8.507059e+37  ;;  %vm2694_vm6 = vmor %vm2692_vm3, %vm2693_vm15 }
 0x2e9   : > { %v2690_v15 = vmul.f32 %v3721_v50, %v2689_v53  ;;  %3732 = vrcp.f32 %v6022_v44  ;;  %v2699_v31 = vor.u32 1.1754944e-38, %v2698_v49  ;;  %vm3052_vm0 = vweird.f32 %v6008_v17 }
 0x2ea   : > { %3734 = vpow2.f32 %v3365_v19  ;;  %1925 = vadd.xlane.f32.xlu2 %v1886_v62  ;;  %v3725_v58 = vpop.eup %3724  ;;  %v2508_v32 = vmul.f32 %v5848_v54, %v2472_v35  ;;  %v2324_v40 = vsel %vm6052_vm5, %v5967_v43, %v2320_v34  ;;  %vm6067_vm1 = vcmp.eq.f32.partialorder %v3056_v22, 8.507059e+37 }
 0x2eb   : > { %v2691_v2 = vadd.f32 %v3721_v50, %v2690_v15  ;;  %v6060_v41 = vadd.f32 1.0, %v3725_v58  ;;  %v3059_v19 = vor.u32 1.1754944e-38, %v3058_v11  ;;  %v2936_v15 = vand.u32 2147483647, %v6022_v44 }
 0x2ec   : > { %v3727_v62 = vpop.eup %3726  ;;  %v2938_v35 = vand.u32 2147483648, %v6022_v44  ;;  %v2473_v11 = vmul.f32 %v2324_v40, %v5588_v60  ;;  %vm2932_vm7 = vweird.f32 %v6022_v44  ;;  %v6085_v63 = vadd.f32 %v5868_v6, %v2508_v32 }
 0x2ed   : > { %v3729_v8 = vpop.eup %3728  ;;  %v2695_v47 = vsel %vm2694_vm6, %v3721_v50, %v2691_v2  ;;  %v3048_v49 = vmul.f32 %v3727_v62, %v6008_v17  ;;  %3736 = vrcp.f32 %v6060_v41  ;;  %vm3053_vm2 = vweird.f32 %v3727_v62 }
 0x2ee   : > { %v6071_v59 = vpop.eup %3730  ;;  %v2700_v10 = vsel %vm6044_vm4, %v2699_v31, %v2695_v47  ;;  %v6079_v34 = vadd.f32 1.0, %v3729_v8  ;;  %v2818_v24 = vand.u32 2147483648, %v6060_v41  ;;  %vm6094_vm8 = vcmp.eq.f32.partialorder %v2936_v15, 8.507059e+37  ;;  %vm3054_vm9 = vmor %vm3052_vm0, %vm3053_vm2 }
 0x2ef   : > { %v3733_v43 = vpop.eup %3732  ;;  %v3167_v50 = vmul.f32 %v2700_v10, %v5893_v29  ;;  %v3049_v22 = vsub.f32 1.0, %v3048_v49  ;;  %v2816_v29 = vand.u32 2147483647, %v6060_v41  ;;  %v2156_v32 = vmul.f32 %v6071_v59, %v6014_v25 }
 0x2f0   : > { %v3735_v58 = vpop.eup %3734  ;;  %v2928_v2 = vmul.f32 %v3733_v43, %v6022_v44  ;;  %3738 = vrcp.f32 %v6079_v34  ;;  %v2939_v49 = vor.u32 1.1754944e-38, %v2938_v35  ;;  %v3381_v10 = vmul.f32 -1.442695, %v6085_v63 }
 0x2f1   : > { %3199 = vst [vmem:[%s6088_s11] sm:$0xff] %v3167_v50  ;;  %v3050_v31 = vmul.f32 %v3727_v62, %v3049_v22  ;;  %v6098_v8 = vadd.f32 1.0, %v3735_v58  ;;  %v2509_v50 = vmul.f32 %v5848_v54, %v2473_v11  ;;  %vm2933_vm10 = vweird.f32 %v3733_v43 }
 0x2f2   : > { %v2929_v60 = vsub.f32 1.0, %v2928_v2  ;;  %1973 = vadd.xlane.f32.xlu2 %v6002_v9  ;;  %vm2812_vm11 = vweird.f32 %v6060_v41  ;;  %vm6111_vm12 = vcmp.eq.f32.partialorder %v2816_v29, 8.507059e+37  ;;  %v2819_v2 = vor.u32 1.1754944e-38, %v2818_v24  ;;  %vm2934_vm14 = vmor %vm2932_vm7, %vm2933_vm10 }
 0x2f3   : > { %v3051_v47 = vadd.f32 %v3727_v62, %v3050_v31  ;;  %v3737_v22 = vpop.eup %3736  ;;  %3740 = vrcp.f32 %v6098_v8  ;;  %vm2162_vm13 = vweird.f32 %v6071_v59  ;;  %v2833_v31 = vand.u32 2147483648, %v6079_v34 }
 0x2f4   : > { %v2930_v15 = vmul.f32 %v3733_v43, %v2929_v60  ;;  %v2808_v9 = vmul.f32 %v3737_v22, %v6060_v41  ;;  %v2157_v60 = vmul.f32 %v6071_v59, %v2156_v32  ;;  %3742 = vpow2.f32 %v3381_v10 }
 0x2f5   : > { %v3055_v58 = vsel %vm3054_vm9, %v3727_v62, %v3051_v47  ;;  %v6124_v24 = vadd.f32 %v5868_v6, %v2509_v50  ;;  %vm2161_vm15 = vweird.f32 %v6014_v25  ;;  %vm2827_vm3 = vweird.f32 %v6079_v34 }
 0x2f6   : > { %v3060_v17 = vsel %vm6067_vm1, %v3059_v19, %v3055_v58  ;;  %v2931_v11 = vadd.f32 %v3733_v43, %v2930_v15  ;;  %v3739_v38 = vpop.eup %3738  ;;  %v2809_v29 = vsub.f32 1.0, %v2808_v9  ;;  %v2831_v32 = vand.u32 2147483647, %v6079_v34  ;;  %vm2163_vm7 = vmor %vm2161_vm15, %vm2162_vm13 }
 0x2f7   : > { %v3191_v62 = vmul.f32 %v3060_v17, %v5936_v57  ;;  %v2823_v19 = vmul.f32 %v3739_v38, %v6079_v34  ;;  %vm2813_vm4 = vweird.f32 %v3737_v22  ;;  %v3382_v47 = vmul.f32 -1.442695, %v6124_v24 }
 0x2f8   : > { %v2935_v53 = vsel %vm2934_vm14, %v3733_v43, %v2931_v11  ;;  %v2810_v44 = vmul.f32 %v3737_v22, %v2809_v29  ;;  %v2158_v43 = vmul.f32 0.5, %v2157_v60  ;;  %v7227_v58 = vsub.f32 %v6032_v51, %v5980_v16  ;;  %vm2814_vm5 = vmor %vm2812_vm11, %vm2813_vm4 }
 0x2f9   : > { %3223 = vst [vmem:[%s6088_s11 + $0xc0] sm:$0xff] %v3191_v62  ;;  %v2940_v57 = vsel %vm6094_vm8, %v2939_v49, %v2935_v53  ;;  %v3741_v10 = vpop.eup %3740  ;;  %v2824_v15 = vsub.f32 1.0, %v2823_v19  ;;  %v2834_v11 = vor.u32 1.1754944e-38, %v2833_v31  ;;  %3744 = vpow2.f32 %v3382_v47 }
 0x2fa   : > { %v3183_v50 = vmul.f32 %v2940_v57, %v5950_v36  ;;  %v2074_v9 = vmul.f32 0.015625, %v7227_v58  ;;  %v2811_v17 = vadd.f32 %v3737_v22, %v2810_v44  ;;  %v2703_v62 = vmul.f32 %v3741_v10, %v6098_v8  ;;  %v3743_v36 = vpop.eup %3742 }
 0x2fb   : > { %v2825_v40 = vmul.f32 %v3739_v38, %v2824_v15  ;;  %vm2828_vm6 = vweird.f32 %v3739_v38  ;;  %v2159_v49 = vsub.f32 1.5, %v2158_v43  ;;  %v2711_v16 = vand.u32 2147483647, %v6098_v8 }
 0x2fc   : > { %3215 = vst [vmem:[%s6088_s11 + $0x80] sm:$0xff] %v3183_v50  ;;  %v6142_v29 = vadd.f32 1e-05, %v2074_v9  ;;  %v2815_v60 = vsel %vm2814_vm5, %v3737_v22, %v2811_v17  ;;  %v2704_v53 = vsub.f32 1.0, %v2703_v62  ;;  %v2713_v51 = vand.u32 2147483648, %v6098_v8  ;;  %vm2829_vm0 = vmor %vm2827_vm3, %vm2828_vm6 }
 0x2fd   : > { %v2820_v31 = vsel %vm6111_vm12, %v2819_v2, %v2815_v60  ;;  %v2826_v19 = vadd.f32 %v3739_v38, %v2825_v40  ;;  %v2672_v57 = vadd.f32 1.0, %v3743_v36  ;;  %v2160_v41 = vmul.f32 %v6071_v59, %v2159_v49 }
 0x2fe   : > { %v3175_v44 = vmul.f32 %v2820_v31, %v5989_v39  ;;  %v2705_v47 = vmul.f32 %v3741_v10, %v2704_v53  ;;  %vm2708_vm1 = vweird.f32 %v3741_v10  ;;  %3746 = vrsqrt.f32 %v6142_v29 }
 0x2ff   : > { %v2830_v22 = vsel %vm2829_vm0, %v3739_v38, %v2826_v19  ;;  %vm2832_vm2 = vcmp.eq.f32.partialorder %v2831_v32, 8.507059e+37  ;;  %3748 = vrcp.f32 %v2672_v57  ;;  %v3745_v35 = vpop.eup %3744  ;;  %vm2707_vm8 = vweird.f32 %v6098_v8 }
 0x300   : > { %3207 = vst [vmem:[%s6088_s11 + $0x40] sm:$0xff] %v3175_v44  ;;  %v2835_v2 = vsel %vm2832_vm2, %v2834_v11, %v2830_v22  ;;  %v2706_v39 = vadd.f32 %v3741_v10, %v2705_v47  ;;  %v2164_v34 = vsel %vm2163_vm7, %v6071_v59, %v2160_v41  ;;  %vm2709_vm9 = vmor %vm2707_vm8, %vm2708_vm1  ;;  %v2714_v38 = vor.u32 1.1754944e-38, %v2713_v51 }
 0x301   : > { %v3176_v50 = vmul.f32 %v2835_v2, %v5992_v27  ;;  %v2673_v32 = vadd.f32 1.0, %v3745_v35  ;;  %v2457_v15 = vmul.f32 %v2164_v34, %v5600_v61  ;;  %vm2712_vm10 = vcmp.eq.f32.partialorder %v2711_v16, 8.507059e+37 }
 0x302   : > { %v2710_v43 = vsel %vm2709_vm9, %v3741_v10, %v2706_v39  ;;  %v2951_v49 = vand.u32 2147483647, %v2672_v57  ;;  %v2953_v36 = vand.u32 2147483648, %v2672_v57  ;;  %vm2947_vm13 = vweird.f32 %v2672_v57 }
 0x303   : > { %3208 = vst [vmem:[%s6088_s11 + $0x48] sm:$0xff] %v3176_v50  ;;  %v2715_v25 = vsel %vm2712_vm10, %v2714_v38, %v2710_v43  ;;  %3750 = vrcp.f32 %v2673_v32  ;;  %v2493_v8 = vmul.f32 %v5848_v54, %v2457_v15  ;;  %vm2171_vm14 = vweird.f32 %v6142_v29 }
 0x304   : > { %v3747_v58 = vpop.eup %3746  ;;  %v3168_v9 = vmul.f32 %v2715_v25, %v6011_v13  ;;  %vm2952_vm3 = vcmp.eq.f32.partialorder %v2951_v49, 8.507059e+37  ;;  %v2954_v19 = vor.u32 1.1754944e-38, %v2953_v36  ;;  %v2968_v41 = vand.u32 2147483648, %v2673_v32 }
 0x305   : > { %v3749_v17 = vpop.eup %3748  ;;  %v2166_v59 = vmul.f32 %v3747_v58, %v6142_v29  ;;  %v6168_v11 = vadd.f32 %v5868_v6, %v2493_v8  ;;  %vm2172_vm12 = vweird.f32 %v3747_v58  ;;  %v2966_v35 = vand.u32 2147483647, %v2673_v32  ;;  %v7228_v29 = vld [vmem:[#allocation8_spill] sm:$0xff] }
 0x306   : > { %3200 = vst [vmem:[%s6088_s11 + $0x8] sm:$0xff] %v3168_v9  ;;  %v2943_v27 = vmul.f32 %v3749_v17, %v2672_v57  ;;  %vm2948_vm11 = vweird.f32 %v3749_v17  ;;  %vm2173_vm5 = vmor %vm2171_vm14, %vm2172_vm12  ;;  %v2001_v34 = vmul.f32 64.0, %v5614_v21  ;;  %vm2962_vm6 = vweird.f32 %v2673_v32 }
 0x307   : > { %v2167_v62 = vmul.f32 %v3747_v58, %v2166_v59  ;;  %v3366_v10 = vmul.f32 -1.442695, %v6168_v11  ;;  %vm2949_vm15 = vmor %vm2947_vm13, %vm2948_vm11  ;;  %v2969_v43 = vor.u32 1.1754944e-38, %v2968_v41  ;;  %vm2967_vm1 = vcmp.eq.f32.partialorder %v2966_v35, 8.507059e+37 }
 0x308   : > { %v2944_v61 = vsub.f32 1.0, %v2943_v27 }
 0x309   : > { %v3751_v40 = vpop.eup %3750  ;;  %v2168_v60 = vmul.f32 0.5, %v2167_v62  ;;  %3752 = vpow2.f32 %v3366_v10 }
 0x30a   : > { %v2945_v53 = vmul.f32 %v3749_v17, %v2944_v61  ;;  %v2958_v13 = vmul.f32 %v3751_v40, %v2673_v32  ;;  %vm2963_vm4 = vweird.f32 %v3751_v40 }
 0x30b   : > { %v2169_v16 = vsub.f32 1.5, %v2168_v60  ;;  %vm2964_vm0 = vmor %vm2962_vm6, %vm2963_vm4  ;;  %v7229_v60 = vld [vmem:[#allocation12_spill] sm:$0xff] }
 0x30c   : > { %v2946_v51 = vadd.f32 %v3749_v17, %v2945_v53  ;;  %v2959_v31 = vsub.f32 1.0, %v2958_v13  ;;  %v1986_v53 = vmul.f32 64.0, %v7229_v60 }
 0x30d   : > { %v2170_v44 = vmul.f32 %v3747_v58, %v2169_v16 }
 0x30e   : > { %v2950_v47 = vsel %vm2949_vm15, %v3749_v17, %v2946_v51  ;;  %v2960_v22 = vmul.f32 %v3751_v40, %v2959_v31 }
 0x30f   : > { %v2955_v2 = vsel %vm2952_vm3, %v2954_v19, %v2950_v47  ;;  %v2174_v39 = vsel %vm2173_vm5, %v3747_v58, %v2170_v44  ;;  %v3753_v50 = vpop.eup %3752  ;;  %v2018_v19 = vmul.f32 %v1986_v53, %v7229_v60  ;;  %v7234_v53 = vld [vmem:[#allocation10_spill] sm:$0xff] }
 0x310   : > { %v3184_v57 = vmul.f32 %v2955_v2, %v6085_v63  ;;  %v2961_v38 = vadd.f32 %v3751_v40, %v2960_v22  ;;  %v2458_v15 = vmul.f32 %v2174_v39, %v7228_v29  ;;  %v2657_v25 = vadd.f32 1.0, %v3753_v50  ;;  %v7231_v29 = vld [vmem:[#allocation19_spill] sm:$0xff] }
 0x311   : > { %v2033_v63 = vmul.f32 %v2001_v34, %v5614_v21  ;;  %v7230_v34 = vld [vmem:[#allocation13_spill] sm:$0xff] }
 0x312   : > { %3216 = vst [vmem:[%s6088_s11 + $0x88] sm:$0xff] %v3184_v57  ;;  %v2965_v9 = vsel %vm2964_vm0, %v3751_v40, %v2961_v38  ;;  %v2494_v8 = vmul.f32 %v5848_v54, %v2458_v15  ;;  %3754 = vrcp.f32 %v2657_v25  ;;  %v2726_v51 = vand.u32 2147483647, %v2657_v25 }
 0x313   : > { %v2970_v17 = vsel %vm2967_vm1, %v2969_v43, %v2965_v9  ;;  %vm2722_vm7 = vweird.f32 %v2657_v25  ;;  %v1985_v50 = vmul.f32 64.0, %v7230_v34  ;;  %v2000_v15 = vmul.f32 64.0, %v7231_v29  ;;  %v7232_v43 = vld [vmem:[#allocation15_spill] sm:$0xff] }
 0x314   : > { %v3185_v58 = vmul.f32 %v2970_v17, %v6124_v24  ;;  %v6179_v59 = vadd.f32 %v5868_v6, %v2494_v8  ;;  %v2728_v24 = vand.u32 2147483648, %v2657_v25  ;;  %vm2727_vm9 = vcmp.eq.f32.partialorder %v2726_v51, 8.507059e+37  ;;  %v7233_v8 = vld [vmem:[#allocation9_spill] sm:$0xff] }
 0x315   : > { %v2002_v17 = vmul.f32 64.0, %v7233_v8 }
 0x316   : > { %v1964_v32 = vpop.xlane.xlu0 %1963  ;;  %3217 = vst [vmem:[%s6088_s11 + $0x90] sm:$0xff] %v3185_v58  ;;  %v3367_v27 = vmul.f32 -1.442695, %v6179_v59  ;;  %v2729_v41 = vor.u32 1.1754944e-38, %v2728_v24  ;;  %v1980_v24 = vmul.f32 64.0, %v7234_v53 }
 0x317   : > { %v2065_v62 = vsub.f32 %v1964_v32, %v2033_v63  ;;  %v2034_v60 = vmul.f32 %v2002_v17, %v7233_v8 }
 0x318   : > { %3756 = vpow2.f32 %v3367_v27  ;;  %v3755_v10 = vpop.eup %3754  ;;  %v6198_v27 = vmul.f32 %v1985_v50, %v7230_v34 }
 0x319   : > { %v2097_v61 = vmul.f32 0.015625, %v2065_v62  ;;  %v2718_v40 = vmul.f32 %v3755_v10, %v2657_v25  ;;  %vm2723_vm2 = vweird.f32 %v3755_v10  ;;  %v1995_v25 = vmul.f32 64.0, %v7232_v43 }
 0x31a   : > { %vm2724_vm8 = vmor %vm2722_vm7, %vm2723_vm2 }
 0x31b   : > { %v2129_v49 = vadd.f32 1e-05, %v2097_v61  ;;  %v2719_v36 = vsub.f32 1.0, %v2718_v40  ;;  %v2027_v61 = vmul.f32 %v1995_v25, %v7232_v43 }
 0x31d   : > { %3758 = vrsqrt.f32 %v2129_v49  ;;  %v2720_v16 = vmul.f32 %v3755_v10, %v2719_v36  ;;  %vm2401_vm11 = vweird.f32 %v2129_v49 }
 0x31e   : > { %v3757_v13 = vpop.eup %3756  ;;  %v1934_v44 = vpop.xlane.xlu0 %1933 }
 0x31f   : > { %v6185_v21 = vadd.f32 1.0, %v3757_v13  ;;  %v2721_v31 = vadd.f32 %v3755_v10, %v2720_v16  ;;  %v2050_v35 = vsub.f32 %v1934_v44, %v2018_v19 }
 0x321   : > { %3760 = vrcp.f32 %v6185_v21  ;;  %v2725_v22 = vsel %vm2724_vm8, %v3755_v10, %v2721_v31  ;;  %v2082_v38 = vmul.f32 0.015625, %v2050_v35  ;;  %v2741_v19 = vand.u32 2147483647, %v6185_v21 }
 0x322   : > { %v2730_v2 = vsel %vm2727_vm9, %v2729_v41, %v2725_v22  ;;  %v2743_v41 = vand.u32 2147483648, %v6185_v21  ;;  %vm2737_vm14 = vweird.f32 %v6185_v21 }
 0x323   : > { %v3759_v47 = vpop.eup %3758  ;;  %v3169_v57 = vmul.f32 %v2730_v2, %v6168_v11  ;;  %v6195_v58 = vadd.f32 1e-05, %v2082_v38  ;;  %v2032_v11 = vmul.f32 %v2000_v15, %v7231_v29  ;;  %v7236_v15 = vld [vmem:[#allocation17_spill] sm:$0xff]  ;;  %vm2742_vm3 = vcmp.eq.f32.partialorder %v2741_v19, 8.507059e+37 }
 0x324   : > { %v2396_v39 = vmul.f32 %v3759_v47, %v2129_v49  ;;  %vm2402_vm10 = vweird.f32 %v3759_v47  ;;  %v7235_v49 = vld [vmem:[#allocation20_spill] sm:$0xff]  ;;  %v2744_v8 = vor.u32 1.1754944e-38, %v2743_v41 }
 0x325   : > { %3201 = vst [vmem:[%s6088_s11 + $0x10] sm:$0xff] %v3169_v57  ;;  %3762 = vrsqrt.f32 %v6195_v58  ;;  %v1962_v40 = vpop.xlane.xlu2 %1961  ;;  %vm2403_vm13 = vmor %vm2401_vm11, %vm2402_vm10  ;;  %v1987_v57 = vmul.f32 64.0, %v7235_v49  ;;  %vm2251_vm5 = vweird.f32 %v6195_v58 }
 0x326   : > { %v2397_v9 = vmul.f32 %v3759_v47, %v2396_v39  ;;  %v1952_v36 = vpop.xlane.xlu0 %1951  ;;  %v2064_v16 = vsub.f32 %v1962_v40, %v2032_v11 }
 0x327   : > { %v3761_v63 = vpop.eup %3760  ;;  %v2059_v51 = vsub.f32 %v1952_v36, %v2027_v61  ;;  %v2019_v36 = vmul.f32 %v1987_v57, %v7235_v49  ;;  %v1981_v49 = vmul.f32 64.0, %v5708_v3 }
 0x328   : > { %v2398_v32 = vmul.f32 0.5, %v2397_v9  ;;  %v2733_v62 = vmul.f32 %v3761_v63, %v6185_v21  ;;  %v1966_v31 = vpop.xlane.xlu1 %1965  ;;  %vm2738_vm12 = vweird.f32 %v3761_v63  ;;  %v2096_v2 = vmul.f32 0.015625, %v2064_v16 }
 0x329   : > { %v2066_v22 = vsub.f32 %v1966_v31, %v2034_v60  ;;  %v2091_v39 = vmul.f32 0.015625, %v2059_v51  ;;  %vm2739_vm15 = vmor %vm2737_vm14, %vm2738_vm12  ;;  %v2012_v21 = vmul.f32 %v1980_v24, %v7234_v53  ;;  %v7237_v53 = vld [vmem:[#allocation24_spill] sm:$0xff] }
 0x32a   : > { %v2399_v10 = vsub.f32 1.5, %v2398_v32  ;;  %v2734_v13 = vsub.f32 1.0, %v2733_v62  ;;  %v6212_v25 = vadd.f32 1e-05, %v2096_v2  ;;  %v1994_v24 = vmul.f32 64.0, %v7237_v53 }
 0x32b   : > { %v2098_v50 = vmul.f32 0.015625, %v2066_v22  ;;  %v3763_v38 = vpop.eup %3762  ;;  %v6214_v9 = vadd.f32 1e-05, %v2091_v39 }
 0x32c   : > { %v2400_v44 = vmul.f32 %v3759_v47, %v2399_v10  ;;  %v2735_v35 = vmul.f32 %v3761_v63, %v2734_v13  ;;  %v2246_v17 = vmul.f32 %v3763_v38, %v6195_v58  ;;  %3764 = vrsqrt.f32 %v6212_v25 }
 0x32d   : > { %v6217_v32 = vadd.f32 1e-05, %v2098_v50  ;;  %3766 = vrsqrt.f32 %v6214_v9  ;;  %v1932_v10 = vpop.xlane.xlu2 %1931  ;;  %vm2252_vm4 = vweird.f32 %v3763_v38  ;;  %v6238_v50 = vmul.f32 %v1994_v24, %v7237_v53 }
 0x32e   : > { %v2404_v34 = vsel %vm2403_vm13, %v3759_v47, %v2400_v44  ;;  %v2736_v29 = vadd.f32 %v3761_v63, %v2735_v35  ;;  %v2247_v61 = vmul.f32 %v3763_v38, %v2246_v17  ;;  %v1922_v40 = vpop.xlane.xlu0 %1921  ;;  %v2049_v51 = vsub.f32 %v1932_v10, %v6198_v27  ;;  %vm2253_vm6 = vmor %vm2251_vm5, %vm2252_vm4 }
 0x32f   : > { %v2481_v43 = vmul.f32 %v2404_v34, %v7236_v15  ;;  %3768 = vrsqrt.f32 %v6217_v32  ;;  %v2044_v31 = vsub.f32 %v1922_v40, %v2012_v21  ;;  %v1996_v44 = vmul.f32 64.0, %v5703_v14  ;;  %v7238_v40 = vld [vmem:[#allocation11_spill] sm:$0xff] }
 0x330   : > { %v2740_v47 = vsel %vm2739_vm15, %v3761_v63, %v2736_v29  ;;  %v1936_v63 = vpop.xlane.xlu1 %1935  ;;  %v2248_v16 = vmul.f32 0.5, %v2247_v61  ;;  %v2081_v35 = vmul.f32 0.015625, %v2049_v51  ;;  %v1989_v27 = vmul.f32 64.0, %v5696_v48 }
 0x331   : > { %v2517_v62 = vmul.f32 %v5848_v54, %v2481_v43  ;;  %v2745_v11 = vsel %vm2742_vm3, %v2744_v8, %v2740_v47  ;;  %v2051_v19 = vsub.f32 %v1936_v63, %v2019_v36  ;;  %v2076_v2 = vmul.f32 0.015625, %v2044_v31 }
 0x332   : > { %v3170_v60 = vmul.f32 %v2745_v11, %v6179_v59  ;;  %v1979_v59 = vmul.f32 64.0, %v5691_v0  ;;  %v2249_v22 = vsub.f32 1.5, %v2248_v16  ;;  %v6235_v34 = vpop.eup %3764  ;;  %v6245_v43 = vadd.f32 1e-05, %v2081_v35 }
 0x333   : > { %v6226_v13 = vadd.f32 %v5868_v6, %v2517_v62  ;;  %v2083_v39 = vmul.f32 0.015625, %v2051_v19  ;;  %v3767_v57 = vpop.eup %3766  ;;  %v2386_v15 = vmul.f32 %v6235_v34, %v6212_v25  ;;  %v6251_v21 = vadd.f32 1e-05, %v2076_v2 }
 0x334   : > { %3202 = vst [vmem:[%s6088_s11 + $0x18] sm:$0xff] %v3170_v60  ;;  %v2250_v29 = vmul.f32 %v3763_v38, %v2249_v22  ;;  %v2336_v17 = vmul.f32 %v3767_v57, %v6214_v9  ;;  %v6256_v62 = vmul.f32 %v1979_v59, %v5691_v0  ;;  %v6262_v10 = vmul.f32 %v1996_v44, %v5703_v14 }
 0x335   : > { %v3390_v41 = vmul.f32 -1.442695, %v6226_v13  ;;  %v6247_v8 = vpop.eup %3768  ;;  %v6253_v47 = vadd.f32 1e-05, %v2083_v39  ;;  %v2387_v58 = vmul.f32 %v6235_v34, %v2386_v15  ;;  %v6267_v63 = vmul.f32 %v1981_v49, %v5708_v3  ;;  %v6285_v44 = vpop.xlane.xlu2 %1949 }
 0x336   : > { %v2254_v11 = vsel %vm2253_vm6, %v3763_v38, %v2250_v29  ;;  %v2406_v61 = vmul.f32 %v6247_v8, %v6217_v32  ;;  %v2337_v60 = vmul.f32 %v3767_v57, %v2336_v17  ;;  %v6272_v38 = vmul.f32 %v1989_v27, %v5696_v48 }
 0x337   : > { %3770 = vpow2.f32 %v3390_v41  ;;  %v2466_v36 = vmul.f32 %v2254_v11, %v7238_v40  ;;  %v2388_v53 = vmul.f32 0.5, %v2387_v58  ;;  %v6277_v51 = vmul.f32 64.0, %v5766_v23 }
 0x338   : > { %3772 = vrsqrt.f32 %v6245_v43  ;;  %v2407_v0 = vmul.f32 %v6247_v8, %v2406_v61  ;;  %v2338_v16 = vmul.f32 0.5, %v2337_v60  ;;  %vm2392_vm0 = vweird.f32 %v6235_v34  ;;  %v7240_v61 = vld [vmem:[#allocation14_spill] sm:$0xff] }
 0x339   : > { %3774 = vrsqrt.f32 %v6251_v21  ;;  %v2502_v14 = vmul.f32 %v5848_v54, %v2466_v36  ;;  %v2389_v3 = vsub.f32 1.5, %v2388_v53  ;;  %vm2342_vm1 = vweird.f32 %v3767_v57  ;;  %v6287_v54 = vpop.xlane.xlu0 %1939 }
 0x33a   : > { %3776 = vrsqrt.f32 %v6253_v47  ;;  %v2408_v19 = vmul.f32 0.5, %v2407_v0  ;;  %v2339_v48 = vsub.f32 1.5, %v2338_v16  ;;  %v6290_v59 = vmul.f32 64.0, %v5791_v28 }
 0x33b   : > { %v6283_v41 = vadd.f32 %v5868_v6, %v2502_v14  ;;  %vm2391_vm2 = vweird.f32 %v6212_v25  ;;  %vm2341_vm7 = vweird.f32 %v6214_v9  ;;  %vm2412_vm8 = vweird.f32 %v6247_v8 }
 0x33c   : > { %v2390_v35 = vmul.f32 %v6235_v34, %v2389_v3  ;;  %vm2393_vm9 = vmor %vm2391_vm2, %vm2392_vm0  ;;  %v2340_v2 = vmul.f32 %v3767_v57, %v2339_v48  ;;  %v2409_v39 = vsub.f32 1.5, %v2408_v19  ;;  %vm2411_vm11 = vweird.f32 %v6217_v32  ;;  %v7239_v32 = vld [vmem:[#allocation18_spill] sm:$0xff]  ;;  %v7241_v3 = vld [vmem:[#allocation16_spill] sm:$0xff] }
 0x33d   : > { %v3771_v24 = vpop.eup %3770  ;;  %v3375_v6 = vmul.f32 -1.442695, %v6283_v41  ;;  %vm2343_vm10 = vmor %vm2341_vm7, %vm2342_vm1  ;;  %v2058_v9 = vsub.f32 %v6285_v44, %v6238_v50  ;;  %v2053_v49 = vsub.f32 %v6287_v54, %v6272_v38  ;;  %vm2241_vm12 = vweird.f32 %v6245_v43 }
 0x33e   : > { %v6279_v31 = vadd.f32 1.0, %v3771_v24  ;;  %v6296_v22 = vpop.eup %3772  ;;  %v2394_v15 = vsel %vm2393_vm9, %v6235_v34, %v2390_v35  ;;  %v2344_v17 = vsel %vm2343_vm10, %v3767_v57, %v2340_v2  ;;  %v2410_v11 = vmul.f32 %v6247_v8, %v2409_v39  ;;  %vm2413_vm13 = vmor %vm2411_vm11, %vm2412_vm8  ;;  %v6333_v24 = vld [vmem:[%s7107_s4] ss:$0 sm:$0xff] }
 0x33f   : > { %v6302_v27 = vpop.eup %3774  ;;  %v2236_v25 = vmul.f32 %v6296_v22, %v6245_v43  ;;  %v2480_v58 = vmul.f32 %v2394_v15, %v7239_v32  ;;  %v2475_v40 = vmul.f32 %v2344_v17, %v7240_v61  ;;  %vm2191_vm15 = vweird.f32 %v6251_v21  ;;  %v6347_v35 = vld [vmem:[%s7108_s5] ss:$0 sm:$0xff]  ;;  %v7242_v43 = vld [vmem:[#allocation21_spill] sm:$0xff] }
 0x340   : > { %3778 = vrcp.f32 %v6279_v31  ;;  %v6312_v29 = vpop.eup %3776  ;;  %v2186_v36 = vmul.f32 %v6302_v27, %v6251_v21  ;;  %vm3082_vm14 = vweird.f32 %v6279_v31  ;;  %v3086_v34 = vand.u32 2147483647, %v6279_v31 }
 0x341   : > { %3780 = vpow2.f32 %v3375_v6  ;;  %v2237_v50 = vmul.f32 %v6296_v22, %v2236_v25  ;;  %v3088_v57 = vand.u32 2147483648, %v6279_v31  ;;  %v2414_v60 = vsel %vm2413_vm13, %v6247_v8, %v2410_v11 }
 0x342   : > { %v2256_v53 = vmul.f32 %v6312_v29, %v6253_v47  ;;  %v2516_v14 = vmul.f32 %v6333_v24, %v2480_v58  ;;  %v2511_v16 = vmul.f32 %v6333_v24, %v2475_v40  ;;  %v2482_v19 = vmul.f32 %v2414_v60, %v7241_v3 }
 0x343   : > { %v2238_v48 = vmul.f32 0.5, %v2237_v50  ;;  %vm2242_vm3 = vweird.f32 %v6296_v22  ;;  %v2187_v44 = vmul.f32 %v6302_v27, %v2186_v36  ;;  %vm2261_vm4 = vweird.f32 %v6253_v47  ;;  %v7243_v47 = vld [vmem:[#allocation22_spill] sm:$0xff] }
 0x344   : > { %v2257_v6 = vmul.f32 %v6312_v29, %v2256_v53  ;;  %v6350_v2 = vadd.f32 %v6347_v35, %v2516_v14  ;;  %v6353_v39 = vadd.f32 %v6347_v35, %v2511_v16  ;;  %v2518_v25 = vmul.f32 %v6333_v24, %v2482_v19  ;;  %vm2243_vm6 = vmor %vm2241_vm12, %vm2242_vm3 }
 0x345   : > { %v2239_v15 = vsub.f32 1.5, %v2238_v48  ;;  %v2188_v32 = vmul.f32 0.5, %v2187_v44  ;;  %vm2192_vm0 = vweird.f32 %v6302_v27  ;;  %vm2262_vm1 = vweird.f32 %v6312_v29 }
 0x346   : > { %v3779_v0 = vpop.eup %3778  ;;  %v2258_v58 = vmul.f32 0.5, %v2257_v6  ;;  %v3389_v40 = vmul.f32 -1.442695, %v6350_v2  ;;  %v3384_v50 = vmul.f32 -1.442695, %v6353_v39  ;;  %v6361_v36 = vadd.f32 %v6347_v35, %v2518_v25  ;;  %vm2193_vm8 = vmor %vm2191_vm15, %vm2192_vm0 }
 0x347   : > { %v3078_v8 = vmul.f32 %v3779_v0, %v6279_v31  ;;  %v3781_v17 = vpop.eup %3780  ;;  %vm3083_vm5 = vweird.f32 %v3779_v0  ;;  %v2240_v53 = vmul.f32 %v6296_v22, %v2239_v15  ;;  %v2189_v14 = vsub.f32 1.5, %v2188_v32  ;;  %vm2263_vm9 = vmor %vm2261_vm4, %vm2262_vm1 }
 0x348   : > { %v6356_v61 = vadd.f32 1.0, %v3781_v17  ;;  %v2259_v16 = vsub.f32 1.5, %v2258_v58  ;;  %v2090_v3 = vmul.f32 0.015625, %v2058_v9  ;;  %v3391_v48 = vmul.f32 -1.442695, %v6361_v36  ;;  %vm3084_vm2 = vmor %vm3082_vm14, %vm3083_vm5 }
 0x349   : > { %v3079_v11 = vsub.f32 1.0, %v3078_v8  ;;  %v2244_v8 = vsel %vm2243_vm6, %v6296_v22, %v2240_v53  ;;  %vm3087_vm7 = vcmp.eq.f32.partialorder %v3086_v34, 8.507059e+37  ;;  %v3089_v44 = vor.u32 1.1754944e-38, %v3088_v57 }
 0x34a   : > { %3782 = vrcp.f32 %v6356_v61  ;;  %v2465_v6 = vmul.f32 %v2244_v8, %v7242_v43  ;;  %v2190_v15 = vmul.f32 %v6302_v27, %v2189_v14  ;;  %v2260_v22 = vmul.f32 %v6312_v29, %v2259_v16 }
 0x34b   : > { %v3080_v60 = vmul.f32 %v3779_v0, %v3079_v11  ;;  %3784 = vpow2.f32 %v3389_v40  ;;  %v6388_v34 = vadd.f32 1e-05, %v2090_v3  ;;  %v2085_v57 = vmul.f32 0.015625, %v2053_v49 }
 0x34c   : > { %3786 = vpow2.f32 %v3384_v50  ;;  %v2501_v31 = vmul.f32 %v6333_v24, %v2465_v6  ;;  %v2264_v17 = vsel %vm2263_vm9, %v6312_v29, %v2260_v22  ;;  %v6397_v11 = vmul.f32 64.0, %v5717_v4 }
 0x34d   : > { %v3081_v19 = vadd.f32 %v3779_v0, %v3080_v60  ;;  %3788 = vpow2.f32 %v3391_v48  ;;  %v6405_v50 = vmul.f32 %v6277_v51, %v5766_v23  ;;  %v6408_v38 = vmul.f32 64.0, %v5783_v20  ;;  %v1954_v60 = vpop.xlane.xlu1 %1953 }
 0x34e   : > { %v6400_v58 = vadd.f32 %v6347_v35, %v2501_v31  ;;  %3790 = vrsqrt.f32 %v6388_v34  ;;  %v6414_v29 = vadd.f32 1e-05, %v2085_v57  ;;  %v2861_v14 = vand.u32 2147483647, %v6356_v61 }
 0x34f   : > { %v3085_v25 = vsel %vm3084_vm2, %v3779_v0, %v3081_v19  ;;  %v2194_v0 = vsel %vm2193_vm8, %v6302_v27, %v2190_v15  ;;  %v7244_v27 = vld [vmem:[#allocation23_spill] sm:$0xff]  ;;  %v6422_v51 = vmul.f32 %v6290_v59, %v5791_v28  ;;  %v2060_v43 = vsub.f32 %v1954_v60, %v6262_v10 }
 0x350   : > { %v3090_v9 = vsel %vm3087_vm7, %v3089_v44, %v3085_v25  ;;  %v3783_v32 = vpop.eup %3782  ;;  %v2460_v40 = vmul.f32 %v2194_v0, %v7243_v47  ;;  %v2467_v49 = vmul.f32 %v2264_v17, %v7244_v27  ;;  %v3374_v23 = vmul.f32 -1.442695, %v6400_v58 }
 0x351   : > { %v3193_v21 = vmul.f32 %v3090_v9, %v6226_v13  ;;  %v3785_v13 = vpop.eup %3784  ;;  %v2853_v54 = vmul.f32 %v3783_v32, %v6356_v61  ;;  %3792 = vrsqrt.f32 %v6414_v29  ;;  %v2863_v44 = vand.u32 2147483648, %v6356_v61 }
 0x352   : > { %v3787_v53 = vpop.eup %3786  ;;  %v6417_v16 = vadd.f32 1.0, %v3785_v13  ;;  %v2496_v8 = vmul.f32 %v6333_v24, %v2460_v40  ;;  %v6432_v6 = vmul.f32 64.0, %v5803_v18  ;;  %vm2858_vm10 = vweird.f32 %v3783_v32 }
 0x353   : > { %3225 = vst [vmem:[%s6088_s11 + $0xd0] sm:$0xff] %v3193_v21  ;;  %v3789_v3 = vpop.eup %3788  ;;  %v2854_v19 = vsub.f32 1.0, %v2853_v54  ;;  %v6424_v48 = vadd.f32 1.0, %v3787_v53  ;;  %v2503_v28 = vmul.f32 %v6333_v24, %v2467_v49  ;;  %vm2857_vm11 = vweird.f32 %v6356_v61 }
 0x354   : > { %3794 = vrcp.f32 %v6417_v16  ;;  %vm6437_vm12 = vcmp.eq.f32.partialorder %v2861_v14, 8.507059e+37  ;;  %v3071_v15 = vand.u32 2147483647, %v6417_v16  ;;  %v6442_v22 = vadd.f32 1.0, %v3789_v3  ;;  %v6444_v10 = vpop.eup %3790  ;;  %vm2859_vm13 = vmor %vm2857_vm11, %vm2858_vm10 }
 0x355   : > { %v2855_v25 = vmul.f32 %v3783_v32, %v2854_v19  ;;  %3796 = vrcp.f32 %v6424_v48  ;;  %v3073_v31 = vand.u32 2147483648, %v6417_v16  ;;  %v6448_v57 = vadd.f32 %v6347_v35, %v2496_v8 }
 0x356   : > { %3798 = vpow2.f32 %v3374_v23  ;;  %v2864_v21 = vor.u32 1.1754944e-38, %v2863_v44  ;;  %v2996_v61 = vand.u32 2147483647, %v6424_v48  ;;  %v2998_v0 = vand.u32 2147483648, %v6424_v48 }
 0x357   : > { %v2856_v9 = vadd.f32 %v3783_v32, %v2855_v25  ;;  %3800 = vrcp.f32 %v6442_v22  ;;  %v6453_v17 = vpop.eup %3792  ;;  %v3369_v40 = vmul.f32 -1.442695, %v6448_v57  ;;  %v6457_v13 = vadd.f32 %v6347_v35, %v2503_v28 }
 0x358   : > { %v2092_v54 = vmul.f32 0.015625, %v2060_v43  ;;  %vm3067_vm14 = vweird.f32 %v6417_v16  ;;  %vm2992_vm15 = vweird.f32 %v6424_v48  ;;  %v2326_v60 = vmul.f32 %v6444_v10, %v6388_v34 }
 0x359   : > { %v2860_v47 = vsel %vm2859_vm13, %v3783_v32, %v2856_v9  ;;  %vm6467_vm3 = vcmp.eq.f32.partialorder %v3071_v15, 8.507059e+37  ;;  %v3074_v3 = vor.u32 1.1754944e-38, %v3073_v31  ;;  %v3101_v19 = vand.u32 2147483647, %v6442_v22 }
 0x35a   : > { %v3795_v27 = vpop.eup %3794  ;;  %v2865_v49 = vsel %vm6437_vm12, %v2864_v21, %v2860_v47  ;;  %vm6473_vm4 = vcmp.eq.f32.partialorder %v2996_v61, 8.507059e+37  ;;  %v2999_v43 = vor.u32 1.1754944e-38, %v2998_v0  ;;  %3802 = vpow2.f32 %v3369_v40 }
 0x35b   : > { %v3797_v53 = vpop.eup %3796  ;;  %v3178_v32 = vmul.f32 %v2865_v49, %v6283_v41  ;;  %v3063_v14 = vmul.f32 %v3795_v27, %v6417_v16  ;;  %v3376_v25 = vmul.f32 -1.442695, %v6457_v13  ;;  %vm3097_vm5 = vweird.f32 %v6442_v22 }
 0x35c   : > { %v2988_v8 = vmul.f32 %v3797_v53, %v6424_v48  ;;  %v3799_v41 = vpop.eup %3798  ;;  %v3103_v59 = vand.u32 2147483648, %v6442_v22  ;;  %v2327_v15 = vmul.f32 %v6444_v10, %v2326_v60  ;;  %v2276_v9 = vmul.f32 %v6453_v17, %v6414_v29 }
 0x35d   : > { %3210 = vst [vmem:[%s6088_s11 + $0x58] sm:$0xff] %v3178_v32  ;;  %v3064_v28 = vsub.f32 1.0, %v3063_v14  ;;  %v3801_v31 = vpop.eup %3800  ;;  %v6484_v61 = vadd.f32 1.0, %v3799_v41  ;;  %3804 = vpow2.f32 %v3376_v25  ;;  %vm2331_vm6 = vweird.f32 %v6388_v34 }
 0x35e   : > { %v2989_v21 = vsub.f32 1.0, %v2988_v8  ;;  %v6487_v0 = vadd.f32 1e-05, %v2092_v54  ;;  %vm3068_vm0 = vweird.f32 %v3795_v27  ;;  %v3093_v40 = vmul.f32 %v3801_v31, %v6442_v22 }
 0x35f   : > { %v3065_v47 = vmul.f32 %v3795_v27, %v3064_v28  ;;  %vm6490_vm1 = vcmp.eq.f32.partialorder %v3101_v19, 8.507059e+37  ;;  %v2328_v60 = vmul.f32 0.5, %v2327_v15  ;;  %vm2993_vm2 = vweird.f32 %v3797_v53  ;;  %vm3069_vm8 = vmor %vm3067_vm14, %vm3068_vm0 }
 0x360   : > { %v2990_v32 = vmul.f32 %v3797_v53, %v2989_v21  ;;  %3806 = vrcp.f32 %v6484_v61  ;;  %vm2332_vm7 = vweird.f32 %v6444_v10  ;;  %v3094_v8 = vsub.f32 1.0, %v3093_v40  ;;  %v3803_v41 = vpop.eup %3802  ;;  %vm2994_vm10 = vmor %vm2992_vm15, %vm2993_vm2 }
 0x361   : > { %v3066_v14 = vadd.f32 %v3795_v27, %v3065_v47  ;;  %v3104_v25 = vor.u32 1.1754944e-38, %v3103_v59  ;;  %v2329_v54 = vsub.f32 1.5, %v2328_v60  ;;  %vm3098_vm9 = vweird.f32 %v3801_v31  ;;  %vm2333_vm15 = vmor %vm2331_vm6, %vm2332_vm7 }
 0x362   : > { %v2991_v28 = vadd.f32 %v3797_v53, %v2990_v32  ;;  %v2277_v19 = vmul.f32 %v6453_v17, %v2276_v9  ;;  %3808 = vrsqrt.f32 %v6487_v0  ;;  %v3095_v21 = vmul.f32 %v3801_v31, %v3094_v8  ;;  %vm3099_vm12 = vmor %vm3097_vm5, %vm3098_vm9 }
 0x363   : > { %v3070_v15 = vsel %vm3069_vm8, %v3795_v27, %v3066_v14  ;;  %v2846_v47 = vand.u32 2147483647, %v6484_v61  ;;  %v6503_v40 = vadd.f32 1.0, %v3803_v41  ;;  %v3805_v59 = vpop.eup %3804  ;;  %v2848_v32 = vand.u32 2147483648, %v6484_v61 }
 0x364   : > { %v3075_v16 = vsel %vm6467_vm3, %v3074_v3, %v3070_v15  ;;  %v2995_v60 = vsel %vm2994_vm10, %v3797_v53, %v2991_v28  ;;  %v2330_v9 = vmul.f32 %v6444_v10, %v2329_v54  ;;  %vm2281_vm11 = vweird.f32 %v6414_v29 }
 0x365   : > { %v3192_v48 = vmul.f32 %v3075_v16, %v6350_v2  ;;  %v3000_v27 = vsel %vm6473_vm4, %v2999_v43, %v2995_v60  ;;  %v3096_v14 = vadd.f32 %v3801_v31, %v3095_v21  ;;  %3810 = vrcp.f32 %v6503_v40  ;;  %v1920_v21 = vpop.xlane.xlu2 %1919  ;;  %v1958_v60 = vpop.xlane.xlu0 %1957 }
 0x366   : > { %v3807_v8 = vpop.eup %3806  ;;  %v3187_v23 = vmul.f32 %v3000_v27, %v6353_v39  ;;  %v2773_v53 = vand.u32 2147483648, %v6503_v40  ;;  %v2278_v3 = vmul.f32 0.5, %v2277_v19  ;;  %vm2282_vm13 = vweird.f32 %v6453_v17 }
 0x367   : > { %3224 = vst [vmem:[%s6088_s11 + $0xc8] sm:$0xff] %v3192_v48  ;;  %v3100_v2 = vsel %vm3099_vm12, %v3801_v31, %v3096_v14  ;;  %v2838_v44 = vmul.f32 %v3807_v8, %v6484_v61  ;;  %vm2842_vm14 = vweird.f32 %v6484_v61  ;;  %v6523_v43 = vadd.f32 1.0, %v3805_v59  ;;  %vm6562_vm7 = vmor %vm2281_vm11, %vm2282_vm13 }
 0x368   : > { %v6529_v39 = vpop.eup %3808  ;;  %3219 = vst [vmem:[%s6088_s11 + $0xa0] sm:$0xff] %v3187_v23  ;;  %v3105_v22 = vsel %vm6490_vm1, %v3104_v25, %v3100_v2  ;;  %vm6534_vm3 = vcmp.eq.f32.partialorder %v2846_v47, 8.507059e+37  ;;  %v2771_v54 = vand.u32 2147483647, %v6503_v40  ;;  %v2334_v41 = vsel %vm2333_vm15, %v6444_v10, %v2330_v9 }
 0x369   : > { %v3194_v28 = vmul.f32 %v3105_v22, %v6361_v36  ;;  %v2839_v19 = vsub.f32 1.0, %v2838_v44  ;;  %v2849_v34 = vor.u32 1.1754944e-38, %v2848_v32  ;;  %3812 = vrcp.f32 %v6523_v43  ;;  %v1924_v32 = vpop.xlane.xlu1 %1923 }
 0x36a   : > { %vm2843_vm4 = vweird.f32 %v3807_v8  ;;  %vm2767_vm5 = vweird.f32 %v6503_v40  ;;  %v2774_v49 = vor.u32 1.1754944e-38, %v2773_v53  ;;  %v2474_v25 = vmul.f32 %v2334_v41, %v5721_v33 }
 0x36b   : > { %v2279_v15 = vsub.f32 1.5, %v2278_v3  ;;  %v3811_v47 = vpop.eup %3810  ;;  %3226 = vst [vmem:[%s6088_s11 + $0xd8] sm:$0xff] %v3194_v28  ;;  %v2840_v59 = vmul.f32 %v3807_v8, %v2839_v19  ;;  %v2876_v16 = vand.u32 2147483647, %v6523_v43  ;;  %v2878_v10 = vand.u32 2147483648, %v6523_v43  ;;  %vm2844_vm8 = vmor %vm2842_vm14, %vm2843_vm4 }
 0x36c   : > { %v2346_v36 = vmul.f32 %v6529_v39, %v6487_v0  ;;  %v2763_v9 = vmul.f32 %v3811_v47, %v6503_v40  ;;  %vm2768_vm6 = vweird.f32 %v3811_v47  ;;  %vm6550_vm0 = vcmp.eq.f32.partialorder %v2771_v54, 8.507059e+37 }
 0x36d   : > { %vm2351_vm1 = vweird.f32 %v6487_v0  ;;  %vm2352_vm2 = vweird.f32 %v6529_v39  ;;  %v2841_v33 = vadd.f32 %v3807_v8, %v2840_v59  ;;  %v2510_v27 = vmul.f32 %v6333_v24, %v2474_v25  ;;  %vm2769_vm11 = vmor %vm2767_vm5, %vm2768_vm6 }
 0x36e   : > { %v2280_v14 = vmul.f32 %v6453_v17, %v2279_v15  ;;  %v2347_v53 = vmul.f32 %v6529_v39, %v2346_v36  ;;  %v2764_v3 = vsub.f32 1.0, %v2763_v9  ;;  %vm2872_vm9 = vweird.f32 %v6523_v43  ;;  %vm2353_vm12 = vmor %vm2351_vm1, %vm2352_vm2 }
 0x36f   : > { %v2043_v2 = vsub.f32 %v1920_v21, %v6256_v62  ;;  %v2062_v44 = vsub.f32 %v1958_v60, %v6405_v50  ;;  %v2045_v22 = vsub.f32 %v1924_v32, %v6267_v63  ;;  %v3813_v29 = vpop.eup %3812  ;;  %v2845_v54 = vsel %vm2844_vm8, %v3807_v8, %v2841_v33 }
 0x370   : > { %v6575_v41 = vadd.f32 %v6347_v35, %v2510_v27  ;;  %v2284_v61 = vsel %vm6562_vm7, %v6453_v17, %v2280_v14  ;;  %v2348_v28 = vmul.f32 0.5, %v2347_v53  ;;  %v2850_v19 = vsel %vm6534_vm3, %v2849_v34, %v2845_v54  ;;  %v1968_v53 = vpop.xlane.xlu2 %1967 }
 0x371   : > { %v2765_v25 = vmul.f32 %v3811_v47, %v2764_v3  ;;  %v2868_v62 = vmul.f32 %v3813_v29, %v6523_v43  ;;  %vm2873_vm10 = vweird.f32 %v3813_v29  ;;  %v3177_v63 = vmul.f32 %v2850_v19, %v6400_v58  ;;  %v1970_v3 = vpop.xlane.xlu0 %1969 }
 0x372   : > { %v3383_v50 = vmul.f32 -1.442695, %v6575_v41  ;;  %v2469_v8 = vmul.f32 %v2284_v61, %v5730_v30  ;;  %v2349_v15 = vsub.f32 1.5, %v2348_v28  ;;  %v2075_v36 = vmul.f32 0.015625, %v2043_v2  ;;  %vm2874_vm13 = vmor %vm2872_vm9, %vm2873_vm10 }
 0x373   : > { %v2766_v21 = vadd.f32 %v3811_v47, %v2765_v25  ;;  %v2869_v59 = vsub.f32 1.0, %v2868_v62  ;;  %v2094_v60 = vmul.f32 0.015625, %v2062_v44  ;;  %3209 = vst [vmem:[%s6088_s11 + $0x50] sm:$0xff] %v3177_v63  ;;  %v2077_v58 = vmul.f32 0.015625, %v2045_v22  ;;  %v1942_v63 = vpop.xlane.xlu1 %1941 }
 0x374   : > { %3814 = vpow2.f32 %v3383_v50  ;;  %v2505_v17 = vmul.f32 %v6333_v24, %v2469_v8  ;;  %v2350_v31 = vmul.f32 %v6529_v39, %v2349_v15  ;;  %v6596_v30 = vadd.f32 1e-05, %v2075_v36 }
 0x375   : > { %v2770_v34 = vsel %vm2769_vm11, %v3811_v47, %v2766_v21  ;;  %v2870_v32 = vmul.f32 %v3813_v29, %v2869_v59  ;;  %v6598_v9 = vadd.f32 1e-05, %v2094_v60  ;;  %v6606_v47 = vadd.f32 1e-05, %v2077_v58 }
 0x376   : > { %v2775_v40 = vsel %vm6550_vm0, %v2774_v49, %v2770_v34  ;;  %v6603_v33 = vadd.f32 %v6347_v35, %v2505_v17  ;;  %v2354_v27 = vsel %vm2353_vm12, %v6529_v39, %v2350_v31  ;;  %3816 = vrsqrt.f32 %v6596_v30 }
 0x377   : > { %v3172_v14 = vmul.f32 %v2775_v40, %v6448_v57  ;;  %v2871_v23 = vadd.f32 %v3813_v29, %v2870_v32  ;;  %v2476_v0 = vmul.f32 %v2354_v27, %v5736_v42  ;;  %v2879_v49 = vor.u32 1.1754944e-38, %v2878_v10 }
 0x378   : > { %v3378_v48 = vmul.f32 -1.442695, %v6603_v33  ;;  %3818 = vrsqrt.f32 %v6598_v9  ;;  %v2035_v39 = vmul.f32 %v6432_v6, %v5803_v18  ;;  %vm2877_vm14 = vcmp.eq.f32.partialorder %v2876_v16, 8.507059e+37 }
 0x379   : > { %3204 = vst [vmem:[%s6088_s11 + $0x28] sm:$0xff] %v3172_v14  ;;  %v2875_v57 = vsel %vm2874_vm13, %v3813_v29, %v2871_v23  ;;  %v2512_v42 = vmul.f32 %v6333_v24, %v2476_v0  ;;  %3820 = vrsqrt.f32 %v6606_v47  ;;  %v2068_v22 = vsub.f32 %v1970_v3, %v6422_v51 }
 0x37a   : > { %v3815_v2 = vpop.eup %3814  ;;  %v2880_v44 = vsel %vm2877_vm14, %v2879_v49, %v2875_v57  ;;  %3822 = vpow2.f32 %v3378_v48  ;;  %v2067_v10 = vsub.f32 %v1968_v53, %v2035_v39  ;;  %v2005_v6 = vmul.f32 64.0, %v5819_v5 }
 0x37b   : > { %v3179_v54 = vmul.f32 %v2880_v44, %v6457_v13  ;;  %v6625_v61 = vadd.f32 1.0, %v3815_v2  ;;  %v6628_v18 = vadd.f32 %v6347_v35, %v2512_v42  ;;  %v2022_v29 = vmul.f32 %v6408_v38, %v5783_v20  ;;  %v1972_v44 = vpop.xlane.xlu1 %1971 }
 0x37c   : > { %v2099_v43 = vmul.f32 0.015625, %v2067_v10  ;;  %v6631_v16 = vpop.eup %3816  ;;  %v6639_v51 = vmul.f32 %v6397_v11, %v5717_v4  ;;  %v2100_v62 = vmul.f32 0.015625, %v2068_v22  ;;  %vm2181_vm15 = vweird.f32 %v6596_v30  ;;  %v6696_v22 = vpop.xlane.xlu2 %1937 }
 0x37d   : > { %3211 = vst [vmem:[%s6088_s11 + $0x60] sm:$0xff] %v3179_v54  ;;  %3824 = vrcp.f32 %v6625_v61  ;;  %v3385_v28 = vmul.f32 -1.442695, %v6628_v18  ;;  %v2176_v19 = vmul.f32 %v6631_v16, %v6596_v30  ;;  %v2981_v8 = vand.u32 2147483647, %v6625_v61 }
 0x37e   : > { %v6641_v13 = vpop.eup %3818  ;;  %v6646_v25 = vadd.f32 1e-05, %v2099_v43  ;;  %v6655_v20 = vmul.f32 %v2005_v6, %v5819_v5  ;;  %v2983_v38 = vand.u32 2147483648, %v6625_v61  ;;  %v2054_v60 = vsub.f32 %v1942_v63, %v2022_v29 }
 0x37f   : > { %v6648_v50 = vpop.eup %3820  ;;  %v2366_v4 = vmul.f32 %v6641_v13, %v6598_v9  ;;  %3826 = vpow2.f32 %v3385_v28  ;;  %v2177_v15 = vmul.f32 %v6631_v16, %v2176_v19  ;;  %vm2371_vm3 = vweird.f32 %v6598_v9 }
 0x380   : > { %v3823_v11 = vpop.eup %3822  ;;  %v2196_v21 = vmul.f32 %v6648_v50, %v6606_v47  ;;  %3828 = vrsqrt.f32 %v6646_v25  ;;  %v6667_v31 = vadd.f32 1e-05, %v2100_v62  ;;  %vm2977_vm4 = vweird.f32 %v6625_v61 }
 0x381   : > { %v6661_v59 = vadd.f32 1.0, %v3823_v11  ;;  %v2367_v36 = vmul.f32 %v6641_v13, %v2366_v4  ;;  %v2178_v17 = vmul.f32 0.5, %v2177_v15  ;;  %vm2182_vm5 = vweird.f32 %v6631_v16 }
 0x382   : > { %v2197_v5 = vmul.f32 %v6648_v50, %v2196_v21  ;;  %vm2201_vm6 = vweird.f32 %v6606_v47  ;;  %vm6674_vm0 = vcmp.eq.f32.partialorder %v2981_v8, 8.507059e+37  ;;  %v2984_v40 = vor.u32 1.1754944e-38, %v2983_v38  ;;  %vm6690_vm1 = vmor %vm2181_vm15, %vm2182_vm5 }
 0x383   : > { %v3825_v58 = vpop.eup %3824  ;;  %3830 = vrcp.f32 %v6661_v59  ;;  %v2179_v27 = vsub.f32 1.5, %v2178_v17  ;;  %v2368_v14 = vmul.f32 0.5, %v2367_v36  ;;  %v2906_v23 = vand.u32 2147483647, %v6661_v59 }
 0x384   : > { %v2973_v34 = vmul.f32 %v3825_v58, %v6625_v61  ;;  %v2908_v0 = vand.u32 2147483648, %v6661_v59  ;;  %v2198_v53 = vmul.f32 0.5, %v2197_v5  ;;  %v2086_v3 = vmul.f32 0.015625, %v2054_v60 }
 0x385   : > { %v3827_v49 = vpop.eup %3826  ;;  %v2180_v39 = vmul.f32 %v6631_v16, %v2179_v27  ;;  %v2369_v57 = vsub.f32 1.5, %v2368_v14  ;;  %3832 = vrsqrt.f32 %v6667_v31  ;;  %vm2372_vm2 = vweird.f32 %v6641_v13 }
 0x386   : > { %v2974_v48 = vsub.f32 1.0, %v2973_v34  ;;  %v6682_v42 = vpop.eup %3828  ;;  %v6684_v2 = vadd.f32 1.0, %v3827_v49  ;;  %v2199_v10 = vsub.f32 1.5, %v2198_v53  ;;  %vm2202_vm7 = vweird.f32 %v6648_v50  ;;  %vm2373_vm11 = vmor %vm2371_vm3, %vm2372_vm2 }
 0x387   : > { %vm2978_vm8 = vweird.f32 %v3825_v58  ;;  %vm2902_vm9 = vweird.f32 %v6661_v59  ;;  %v2184_v6 = vsel %vm6690_vm1, %v6631_v16, %v2180_v39  ;;  %v2370_v30 = vmul.f32 %v6641_v13, %v2369_v57  ;;  %vm2203_vm14 = vmor %vm2201_vm6, %vm2202_vm7 }
 0x388   : > { %v2975_v54 = vmul.f32 %v3825_v58, %v2974_v48  ;;  %v2909_v29 = vor.u32 1.1754944e-38, %v2908_v0  ;;  %3834 = vrcp.f32 %v6684_v2  ;;  %v2416_v28 = vmul.f32 %v6682_v42, %v6646_v25  ;;  %vm2979_vm12 = vmor %vm2977_vm4, %vm2978_vm8 }
 0x389   : > { %v3831_v43 = vpop.eup %3830  ;;  %v6706_v19 = vadd.f32 1e-05, %v2086_v3  ;;  %vm6709_vm10 = vcmp.eq.f32.partialorder %v2906_v23, 8.507059e+37  ;;  %v2459_v16 = vmul.f32 %v2184_v6, %v5726_v55  ;;  %v2052_v4 = vsub.f32 %v6696_v22, %v6639_v51 }
 0x38a   : > { %v2976_v62 = vadd.f32 %v3825_v58, %v2975_v54  ;;  %v2898_v63 = vmul.f32 %v3831_v43, %v6661_v59  ;;  %v3011_v11 = vand.u32 2147483647, %v6684_v2  ;;  %v3013_v38 = vand.u32 2147483648, %v6684_v2 }
 0x38b   : > { %v2374_v15 = vsel %vm2373_vm11, %v6641_v13, %v2370_v30  ;;  %v2200_v55 = vmul.f32 %v6648_v50, %v2199_v10  ;;  %vm2421_vm13 = vweird.f32 %v6646_v25  ;;  %v6728_v21 = vpop.eup %3832  ;;  %v2495_v51 = vmul.f32 %v6333_v24, %v2459_v16 }
 0x38c   : > { %v2980_v9 = vsel %vm2979_vm12, %v3825_v58, %v2976_v62  ;;  %v2899_v36 = vsub.f32 1.0, %v2898_v63  ;;  %v2478_v60 = vmul.f32 %v2374_v15, %v5800_v1  ;;  %vm2903_vm15 = vweird.f32 %v3831_v43 }
 0x38d   : > { %v2985_v61 = vsel %vm6674_vm0, %v2984_v40, %v2980_v9  ;;  %v2204_v13 = vsel %vm2203_vm14, %v6648_v50, %v2200_v55  ;;  %v2417_v17 = vmul.f32 %v6682_v42, %v2416_v28  ;;  %vm3007_vm3 = vweird.f32 %v6684_v2  ;;  %vm2904_vm0 = vmor %vm2902_vm9, %vm2903_vm15 }
 0x38e   : > { %v3186_v5 = vmul.f32 %v2985_v61, %v6575_v41  ;;  %v2900_v58 = vmul.f32 %v3831_v43, %v2899_v36  ;;  %v6743_v1 = vadd.f32 %v6347_v35, %v2495_v51  ;;  %v2514_v47 = vmul.f32 %v6333_v24, %v2478_v60  ;;  %v3835_v34 = vpop.eup %3834 }
 0x38f   : > { %v2461_v27 = vmul.f32 %v2204_v13, %v5747_v7  ;;  %v2418_v32 = vmul.f32 0.5, %v2417_v17  ;;  %vm2422_vm4 = vweird.f32 %v6682_v42  ;;  %v2426_v50 = vmul.f32 %v6728_v21, %v6667_v31 }
 0x390   : > { %3218 = vst [vmem:[%s6088_s11 + $0x98] sm:$0xff] %v3186_v5  ;;  %v2901_v40 = vadd.f32 %v3831_v43, %v2900_v58  ;;  %v3003_v41 = vmul.f32 %v3835_v34, %v6684_v2  ;;  %v3368_v14 = vmul.f32 -1.442695, %v6743_v1  ;;  %vm2431_vm5 = vweird.f32 %v6667_v31  ;;  %vm2423_vm2 = vmor %vm2421_vm13, %vm2422_vm4  ;;  %v7265_v31 = vld [vmem:[#allocation26_spill] sm:$0xff] }
 0x391   : > { %vm2432_vm6 = vweird.f32 %v6728_v21  ;;  %v6759_v7 = vadd.f32 %v6347_v35, %v2514_v47  ;;  %v2497_v23 = vmul.f32 %v6333_v24, %v2461_v27  ;;  %v2419_v0 = vsub.f32 1.5, %v2418_v32 }
 0x392   : > { %v2427_v53 = vmul.f32 %v6728_v21, %v2426_v50  ;;  %v2905_v3 = vsel %vm2904_vm0, %v3831_v43, %v2901_v40  ;;  %v3004_v49 = vsub.f32 1.0, %v3003_v41  ;;  %vm3008_vm1 = vweird.f32 %v3835_v34  ;;  %vm2433_vm9 = vmor %vm2431_vm5, %vm2432_vm6 }
 0x393   : > { %3836 = vpow2.f32 %v3368_v14  ;;  %v2910_v48 = vsel %vm6709_vm10, %v2909_v29, %v2905_v3  ;;  %v3387_v39 = vmul.f32 -1.442695, %v6759_v7  ;;  %v6767_v59 = vadd.f32 %v6347_v35, %v2497_v23  ;;  %vm3009_vm7 = vmor %vm3007_vm3, %vm3008_vm1 }
 0x394   : > { %v2420_v57 = vmul.f32 %v6682_v42, %v2419_v0  ;;  %v3181_v10 = vmul.f32 %v2910_v48, %v6603_v33  ;;  %v3005_v22 = vmul.f32 %v3835_v34, %v3004_v49  ;;  %v2428_v54 = vmul.f32 0.5, %v2427_v53 }
 0x395   : > { %3838 = vrsqrt.f32 %v6706_v19  ;;  %v3370_v6 = vmul.f32 -1.442695, %v6767_v59  ;;  %v2084_v43 = vmul.f32 0.015625, %v2052_v4  ;;  %v2069_v62 = vsub.f32 %v1972_v44, %v6655_v20 }
 0x396   : > { %3840 = vpow2.f32 %v3387_v39  ;;  %v2424_v30 = vsel %vm2423_vm2, %v6682_v42, %v2420_v57  ;;  %3213 = vst [vmem:[%s6088_s11 + $0x70] sm:$0xff] %v3181_v10  ;;  %v3006_v29 = vadd.f32 %v3835_v34, %v3005_v22  ;;  %v2429_v33 = vsub.f32 1.5, %v2428_v54 }
 0x397   : > { %v2483_v28 = vmul.f32 %v2424_v30, %v5832_v45  ;;  %vm3012_vm8 = vcmp.eq.f32.partialorder %v3011_v11, 8.507059e+37  ;;  %v3014_v25 = vor.u32 1.1754944e-38, %v3013_v38  ;;  %3842 = vpow2.f32 %v3370_v6 }
 0x398   : > { %v6784_v63 = vadd.f32 1e-05, %v2084_v43  ;;  %v3010_v16 = vsel %vm3009_vm7, %v3835_v34, %v3006_v29  ;;  %v2430_v4 = vmul.f32 %v6728_v21, %v2429_v33  ;;  %v2101_v45 = vmul.f32 0.015625, %v2069_v62  ;;  %v6819_v34 = vpop.xlane.xlu2 %1955 }
 0x399   : > { %v3837_v8 = vpop.eup %3836  ;;  %v2519_v42 = vmul.f32 %v6333_v24, %v2483_v28  ;;  %v3015_v15 = vsel %vm3012_vm8, %v3014_v25, %v3010_v16  ;;  %v1997_v20 = vmul.f32 64.0, %v5773_v26  ;;  %v1982_v60 = vmul.f32 64.0, %v7265_v31 }
 0x39a   : > { %v6788_v55 = vadd.f32 1.0, %v3837_v8  ;;  %3844 = vrsqrt.f32 %v6784_v63  ;;  %v3188_v11 = vmul.f32 %v3015_v15, %v6628_v18  ;;  %v2434_v9 = vsel %vm2433_vm9, %v6728_v21, %v2430_v4  ;;  %v7266_v18 = vld [vmem:[#allocation28_spill] sm:$0xff] }
 0x39b   : > { %v6796_v2 = vpop.eup %3838  ;;  %v6800_v38 = vadd.f32 %v6347_v35, %v2519_v42  ;;  %v6803_v36 = vadd.f32 1e-05, %v2101_v45  ;;  %v2006_v61 = vmul.f32 64.0, %v5876_v37  ;;  %v2484_v5 = vmul.f32 %v2434_v9, %v7266_v18 }
 0x39c   : > { %v3841_v51 = vpop.eup %3840  ;;  %3846 = vrcp.f32 %v6788_v55  ;;  %3220 = vst [vmem:[%s6088_s11 + $0xa8] sm:$0xff] %v3188_v11  ;;  %v2286_v58 = vmul.f32 %v6796_v2, %v6706_v19  ;;  %v6817_v47 = vmul.f32 %v1997_v20, %v5773_v26  ;;  %v2756_v27 = vand.u32 2147483647, %v6788_v55 }
 0x39d   : > { %v6809_v13 = vadd.f32 1.0, %v3841_v51  ;;  %v3392_v17 = vmul.f32 -1.442695, %v6800_v38  ;;  %v3843_v21 = vpop.eup %3842  ;;  %3848 = vrsqrt.f32 %v6803_v36  ;;  %v2758_v32 = vand.u32 2147483648, %v6788_v55 }
 0x39e   : > { %v6827_v41 = vadd.f32 1.0, %v3843_v21  ;;  %v2520_v14 = vmul.f32 %v6333_v24, %v2484_v5  ;;  %v2287_v26 = vmul.f32 %v6796_v2, %v2286_v58  ;;  %vm2291_vm10 = vweird.f32 %v6706_v19 }
 0x39f   : > { %3850 = vrcp.f32 %v6809_v13  ;;  %v3043_v50 = vand.u32 2147483648, %v6809_v13  ;;  %v6835_v0 = vmul.f32 %v1982_v60, %v7265_v31  ;;  %v6838_v53 = vmul.f32 %v2006_v61, %v5876_v37 }
 0x3a0   : > { %v6825_v40 = vpop.eup %3844  ;;  %3852 = vpow2.f32 %v3392_v17  ;;  %vm2752_vm11 = vweird.f32 %v6788_v55  ;;  %v3041_v49 = vand.u32 2147483647, %v6809_v13  ;;  %v2061_v24 = vsub.f32 %v6819_v34, %v6817_v47  ;;  %v6873_v11 = vpop.xlane.xlu2 %1925 }
 0x3a1   : > { %v2266_v23 = vmul.f32 %v6825_v40, %v6784_v63  ;;  %3854 = vrcp.f32 %v6827_v41  ;;  %vm6846_vm12 = vcmp.eq.f32.partialorder %v2756_v27, 8.507059e+37  ;;  %v2759_v57 = vor.u32 1.1754944e-38, %v2758_v32 }
 0x3a2   : > { %v3847_v3 = vpop.eup %3846  ;;  %v6851_v37 = vadd.f32 %v6347_v35, %v2520_v14  ;;  %v2288_v44 = vmul.f32 0.5, %v2287_v26  ;;  %vm2271_vm13 = vweird.f32 %v6784_v63  ;;  %vm3037_vm14 = vweird.f32 %v6809_v13 }
 0x3a3   : > { %v2748_v48 = vmul.f32 %v3847_v3, %v6788_v55  ;;  %v6854_v10 = vpop.eup %3848  ;;  %v3044_v22 = vor.u32 1.1754944e-38, %v3043_v50  ;;  %vm2292_vm15 = vweird.f32 %v6796_v2  ;;  %v2267_v54 = vmul.f32 %v6825_v40, %v2266_v23  ;;  %v7275_v50 = vld [vmem:[#allocation27_spill] sm:$0xff] }
 0x3a4   : > { %v2786_v43 = vand.u32 2147483647, %v6827_v41  ;;  %v3393_v29 = vmul.f32 -1.442695, %v6851_v37  ;;  %v2289_v35 = vsub.f32 1.5, %v2288_v44  ;;  %vm2753_vm3 = vweird.f32 %v3847_v3  ;;  %vm6882_vm0 = vmor %vm2291_vm10, %vm2292_vm15 }
 0x3a5   : > { %v3851_v6 = vpop.eup %3850  ;;  %v2749_v30 = vsub.f32 1.0, %v2748_v48  ;;  %vm6862_vm4 = vcmp.eq.f32.partialorder %v3041_v49, 8.507059e+37  ;;  %v2268_v25 = vmul.f32 0.5, %v2267_v54  ;;  %v2436_v8 = vmul.f32 %v6854_v10, %v6803_v36  ;;  %vm2754_vm1 = vmor %vm2752_vm11, %vm2753_vm3  ;;  %v7276_v48 = vld [vmem:[#allocation25_spill] sm:$0xff] }
 0x3a6   : > { %v3853_v28 = vpop.eup %3852  ;;  %v3033_v33 = vmul.f32 %v3851_v6, %v6809_v13  ;;  %3856 = vpow2.f32 %v3393_v29  ;;  %v2290_v4 = vmul.f32 %v6796_v2, %v2289_v35  ;;  %vm2782_vm5 = vweird.f32 %v6827_v41  ;;  %v6918_v13 = vld [vmem:[%s7107_s4] ss:$0 sm:$0xff] }
 0x3a7   : > { %v2750_v16 = vmul.f32 %v3847_v3, %v2749_v30  ;;  %v6868_v42 = vadd.f32 1.0, %v3853_v28  ;;  %v3855_v45 = vpop.eup %3854  ;;  %v2269_v20 = vsub.f32 1.5, %v2268_v25  ;;  %vm2272_vm6 = vweird.f32 %v6825_v40 }
 0x3a8   : > { %v3034_v15 = vsub.f32 1.0, %v3033_v33  ;;  %v2778_v51 = vmul.f32 %v3855_v45, %v6827_v41  ;;  %v2788_v31 = vand.u32 2147483648, %v6827_v41  ;;  %vm3038_vm2 = vweird.f32 %v3851_v6  ;;  %vm2273_vm9 = vmor %vm2271_vm13, %vm2272_vm6  ;;  %v1974_v28 = vpop.xlane.xlu2 %1973 }
 0x3a9   : > { %v2751_v9 = vadd.f32 %v3847_v3, %v2750_v16  ;;  %3858 = vrcp.f32 %v6868_v42  ;;  %vm6889_vm7 = vcmp.eq.f32.partialorder %v2786_v43, 8.507059e+37  ;;  %v2437_v18 = vmul.f32 %v6854_v10, %v2436_v8  ;;  %vm3039_vm10 = vmor %vm3037_vm14, %vm3038_vm2  ;;  %v6938_v43 = vld [vmem:[%s7108_s5] ss:$0 sm:$0xff] }
 0x3aa   : > { %v3035_v61 = vmul.f32 %v3851_v6, %v3034_v15  ;;  %v2779_v58 = vsub.f32 1.0, %v2778_v51  ;;  %v2294_v19 = vsel %vm6882_vm0, %v6796_v2, %v2290_v4  ;;  %v2270_v21 = vmul.f32 %v6825_v40, %v2269_v20 }
 0x3ab   : > { %v2755_v5 = vsel %vm2754_vm1, %v3847_v3, %v2751_v9  ;;  %vm2783_vm8 = vweird.f32 %v3855_v45  ;;  %v2093_v34 = vmul.f32 0.015625, %v2061_v24  ;;  %v2470_v14 = vmul.f32 %v2294_v19, %v7275_v50 }
 0x3ac   : > { %v2760_v55 = vsel %vm6846_vm12, %v2759_v57, %v2755_v5  ;;  %v3036_v47 = vadd.f32 %v3851_v6, %v3035_v61  ;;  %v3857_v27 = vpop.eup %3856  ;;  %v2780_v2 = vmul.f32 %v3855_v45, %v2779_v58  ;;  %v2274_v26 = vsel %vm2273_vm9, %v6825_v40, %v2270_v21  ;;  %vm2784_vm11 = vmor %vm2782_vm5, %vm2783_vm8 }
 0x3ad   : > { %v3171_v32 = vmul.f32 %v2760_v55, %v6743_v1  ;;  %v2789_v3 = vor.u32 1.1754944e-38, %v2788_v31  ;;  %v6909_v49 = vadd.f32 1.0, %v3857_v27  ;;  %v2468_v39 = vmul.f32 %v2274_v26, %v7276_v48 }
 0x3ae   : > { %v3040_v23 = vsel %vm3039_vm10, %v3851_v6, %v3036_v47  ;;  %v2781_v24 = vadd.f32 %v3855_v45, %v2780_v2  ;;  %v2506_v40 = vmul.f32 %v6918_v13, %v2470_v14  ;;  %v2438_v57 = vmul.f32 0.5, %v2437_v18 }
 0x3af   : > { %v3859_v63 = vpop.eup %3858  ;;  %3203 = vst [vmem:[%s6088_s11 + $0x20] sm:$0xff] %v3171_v32  ;;  %v3045_v1 = vsel %vm6862_vm4, %v3044_v22, %v3040_v23  ;;  %3860 = vrcp.f32 %v6909_v49  ;;  %v6927_v22 = vadd.f32 1e-05, %v2093_v34  ;;  %v3116_v30 = vand.u32 2147483647, %v6868_v42 }
 0x3b0   : > { %v3190_v44 = vmul.f32 %v3045_v1, %v6759_v7  ;;  %v3108_v54 = vmul.f32 %v3859_v63, %v6868_v42  ;;  %v2785_v6 = vsel %vm2784_vm11, %v3855_v45, %v2781_v24  ;;  %vm2441_vm12 = vweird.f32 %v6803_v36 }
 0x3b1   : > { %vm2442_vm13 = vweird.f32 %v6854_v10  ;;  %v2790_v7 = vsel %vm6889_vm7, %v2789_v3, %v2785_v6  ;;  %v6941_v29 = vadd.f32 %v6938_v43, %v2506_v40  ;;  %v2504_v35 = vmul.f32 %v6918_v13, %v2468_v39 }
 0x3b2   : > { %3222 = vst [vmem:[%s6088_s11 + $0xb8] sm:$0xff] %v3190_v44  ;;  %v3109_v41 = vsub.f32 1.0, %v3108_v54  ;;  %v3173_v33 = vmul.f32 %v2790_v7, %v6767_v59  ;;  %vm3113_vm14 = vweird.f32 %v3859_v63  ;;  %v3118_v62 = vand.u32 2147483648, %v6868_v42  ;;  %vm2443_vm4 = vmor %vm2441_vm12, %vm2442_vm13 }
 0x3b3   : > { %v2439_v25 = vsub.f32 1.5, %v2438_v57  ;;  %v3379_v16 = vmul.f32 -1.442695, %v6941_v29  ;;  %v6948_v4 = vadd.f32 %v6938_v43, %v2504_v35  ;;  %3862 = vrsqrt.f32 %v6927_v22 }
 0x3b4   : > { %v3110_v8 = vmul.f32 %v3859_v63, %v3109_v41  ;;  %3205 = vst [vmem:[%s6088_s11 + $0x30] sm:$0xff] %v3173_v33  ;;  %vm3112_vm15 = vweird.f32 %v6868_v42  ;;  %v2046_v59 = vsub.f32 %v6873_v11, %v6835_v0  ;;  %v2070_v15 = vsub.f32 %v1974_v28, %v6838_v53 }
 0x3b5   : > { %v2440_v45 = vmul.f32 %v6854_v10, %v2439_v25  ;;  %v3861_v20 = vpop.eup %3860  ;;  %vm3117_vm3 = vcmp.eq.f32.partialorder %v3116_v30, 8.507059e+37  ;;  %3864 = vpow2.f32 %v3379_v16  ;;  %v3377_v51 = vmul.f32 -1.442695, %v6948_v4  ;;  %vm3114_vm5 = vmor %vm3112_vm15, %vm3113_vm14 }
 0x3b6   : > { %v3111_v9 = vadd.f32 %v3859_v63, %v3110_v8  ;;  %v3119_v42 = vor.u32 1.1754944e-38, %v3118_v62  ;;  %v3123_v31 = vmul.f32 %v3861_v20, %v6909_v49  ;;  %v2078_v11 = vmul.f32 0.015625, %v2046_v59 }
 0x3b7   : > { %v2444_v0 = vsel %vm2443_vm4, %v6854_v10, %v2440_v45  ;;  %3866 = vpow2.f32 %v3377_v51  ;;  %v2102_v61 = vmul.f32 0.015625, %v2070_v15  ;;  %v3131_v5 = vand.u32 2147483647, %v6909_v49 }
 0x3b8   : > { %v3115_v53 = vsel %vm3114_vm5, %v3859_v63, %v3111_v9  ;;  %v2485_v60 = vmul.f32 %v2444_v0, %v5852_v52  ;;  %v3124_v18 = vsub.f32 1.0, %v3123_v31  ;;  %v6967_v36 = vadd.f32 1e-05, %v2078_v11 }
 0x3b9   : > { %v3120_v17 = vsel %vm3117_vm3, %v3119_v42, %v3115_v53  ;;  %v3863_v58 = vpop.eup %3862  ;;  %v3133_v21 = vand.u32 2147483648, %v6909_v49  ;;  %v6972_v55 = vadd.f32 1e-05, %v2102_v61  ;;  %vm3128_vm6 = vweird.f32 %v3861_v20 }
 0x3ba   : > { %v3195_v19 = vmul.f32 %v3120_v17, %v6800_v38  ;;  %v2521_v10 = vmul.f32 %v6918_v13, %v2485_v60  ;;  %v3125_v47 = vmul.f32 %v3861_v20, %v3124_v18  ;;  %v2356_v52 = vmul.f32 %v3863_v58, %v6927_v22 }
 0x3bb   : > { %3868 = vrsqrt.f32 %v6967_v36  ;;  %v3865_v34 = vpop.eup %3864  ;;  %vm3127_vm0 = vweird.f32 %v6909_v49  ;;  %v3134_v14 = vor.u32 1.1754944e-38, %v3133_v21  ;;  %vm3132_vm2 = vcmp.eq.f32.partialorder %v3131_v5, 8.507059e+37 }
 0x3bc   : > { %3227 = vst [vmem:[%s6088_s11 + $0xe0] sm:$0xff] %v3195_v19  ;;  %v6978_v27 = vadd.f32 %v6938_v43, %v2521_v10  ;;  %3870 = vrsqrt.f32 %v6972_v55  ;;  %v3126_v38 = vadd.f32 %v3861_v20, %v3125_v47  ;;  %v6982_v32 = vadd.f32 1.0, %v3865_v34  ;;  %vm3129_vm1 = vmor %vm3127_vm0, %vm3128_vm6 }
 0x3bd   : > { %v2357_v2 = vmul.f32 %v3863_v58, %v2356_v52  ;;  %v3867_v50 = vpop.eup %3866  ;;  %vm2362_vm7 = vweird.f32 %v3863_v58  ;;  %vm2361_vm8 = vweird.f32 %v6927_v22  ;;  %vm2211_vm10 = vweird.f32 %v6967_v36 }
 0x3be   : > { %v3394_v26 = vmul.f32 -1.442695, %v6978_v27  ;;  %v3130_v23 = vsel %vm3129_vm1, %v3861_v20, %v3126_v38  ;;  %3872 = vrcp.f32 %v6982_v32  ;;  %v6986_v48 = vadd.f32 1.0, %v3867_v50  ;;  %vm2363_vm9 = vmor %vm2361_vm8, %vm2362_vm7 }
 0x3bf   : > { %v3135_v3 = vsel %vm3132_vm2, %v3134_v14, %v3130_v23  ;;  %v2358_v63 = vmul.f32 0.5, %v2357_v2  ;;  %v2923_v7 = vand.u32 2147483648, %v6982_v32  ;;  %vm2451_vm11 = vweird.f32 %v6972_v55 }
 0x3c0   : > { %3874 = vpow2.f32 %v3394_v26  ;;  %v3196_v49 = vmul.f32 %v3135_v3, %v6851_v37  ;;  %vm2917_vm12 = vweird.f32 %v6982_v32  ;;  %v2921_v16 = vand.u32 2147483647, %v6982_v32 }
 0x3c1   : > { %v6988_v39 = vpop.eup %3868  ;;  %3876 = vrcp.f32 %v6986_v48  ;;  %v2359_v24 = vsub.f32 1.5, %v2358_v63  ;;  %v2924_v15 = vor.u32 1.1754944e-38, %v2923_v7  ;;  %v2891_v31 = vand.u32 2147483647, %v6986_v48 }
 0x3c2   : > { %v6991_v1 = vpop.eup %3870  ;;  %3228 = vst [vmem:[%s6088_s11 + $0xe8] sm:$0xff] %v3196_v49  ;;  %v2206_v40 = vmul.f32 %v6988_v39, %v6967_v36  ;;  %vm2212_vm13 = vweird.f32 %v6988_v39  ;;  %v2893_v0 = vand.u32 2147483648, %v6986_v48  ;;  %vm2922_vm6 = vcmp.eq.f32.partialorder %v2921_v16, 8.507059e+37 }
 0x3c3   : > { %v2446_v57 = vmul.f32 %v6991_v1, %v6972_v55  ;;  %v2360_v54 = vmul.f32 %v3863_v58, %v2359_v24  ;;  %vm2452_vm15 = vweird.f32 %v6991_v1  ;;  %vm7023_vm3 = vmor %vm2211_vm10, %vm2212_vm13  ;;  %vm2887_vm0 = vweird.f32 %v6986_v48 }
 0x3c4   : > { %v3873_v44 = vpop.eup %3872  ;;  %v2207_v37 = vmul.f32 %v6988_v39, %v2206_v40  ;;  %vm2453_vm1 = vmor %vm2451_vm11, %vm2452_vm15  ;;  %v2894_v52 = vor.u32 1.1754944e-38, %v2893_v0  ;;  %vm2892_vm7 = vcmp.eq.f32.partialorder %v2891_v31, 8.507059e+37 }
 0x3c5   : > { %v2913_v30 = vmul.f32 %v3873_v44, %v6982_v32  ;;  %v2447_v41 = vmul.f32 %v6991_v1, %v2446_v57  ;;  %v2364_v28 = vsel %vm2363_vm9, %v3863_v58, %v2360_v54  ;;  %vm2918_vm14 = vweird.f32 %v3873_v44 }
 0x3c6   : > { %v3875_v6 = vpop.eup %3874  ;;  %v2208_v33 = vmul.f32 0.5, %v2207_v37  ;;  %v2477_v25 = vmul.f32 %v2364_v28, %v5808_v12  ;;  %vm2919_vm4 = vmor %vm2917_vm12, %vm2918_vm14 }
 0x3c7   : > { %v7005_v35 = vadd.f32 1.0, %v3875_v6  ;;  %v3877_v62 = vpop.eup %3876  ;;  %v2914_v22 = vsub.f32 1.0, %v2913_v30  ;;  %v2448_v8 = vmul.f32 0.5, %v2447_v41 }
 0x3c8   : > { %v2883_v45 = vmul.f32 %v3877_v62, %v6986_v48  ;;  %v2513_v20 = vmul.f32 %v6918_v13, %v2477_v25  ;;  %v2209_v51 = vsub.f32 1.5, %v2208_v33  ;;  %vm2888_vm5 = vweird.f32 %v3877_v62 }
 0x3c9   : > { %3878 = vrcp.f32 %v7005_v35  ;;  %v2915_v59 = vmul.f32 %v3873_v44, %v2914_v22  ;;  %v2449_v42 = vsub.f32 1.5, %v2448_v8  ;;  %vm2889_vm2 = vmor %vm2887_vm0, %vm2888_vm5  ;;  %v3148_v26 = vand.u32 2147483648, %v7005_v35 }
 0x3ca   : > { %v2884_v9 = vsub.f32 1.0, %v2883_v45  ;;  %v7019_v11 = vadd.f32 %v6938_v43, %v2513_v20  ;;  %v2210_v61 = vmul.f32 %v6988_v39, %v2209_v51  ;;  %v3146_v48 = vand.u32 2147483647, %v7005_v35 }
 0x3cb   : > { %v2916_v12 = vadd.f32 %v3873_v44, %v2915_v59  ;;  %v2450_v17 = vmul.f32 %v6991_v1, %v2449_v42  ;;  %vm3142_vm9 = vweird.f32 %v7005_v35  ;;  %v3149_v49 = vor.u32 1.1754944e-38, %v3148_v26 }
 0x3cc   : > { %v2885_v60 = vmul.f32 %v3877_v62, %v2884_v9  ;;  %v3386_v5 = vmul.f32 -1.442695, %v7019_v11  ;;  %v2214_v21 = vsel %vm7023_vm3, %v6988_v39, %v2210_v61  ;;  %vm3147_vm11 = vcmp.eq.f32.partialorder %v3146_v48, 8.507059e+37 }
 0x3cd   : > { %v2920_v18 = vsel %vm2919_vm4, %v3873_v44, %v2916_v12  ;;  %v2454_v10 = vsel %vm2453_vm1, %v6991_v1, %v2450_v17  ;;  %v2462_v38 = vmul.f32 %v2214_v21, %v5812_v46 }
 0x3ce   : > { %v2925_v58 = vsel %vm2922_vm6, %v2924_v15, %v2920_v18  ;;  %v2886_v19 = vadd.f32 %v3877_v62, %v2885_v60  ;;  %3880 = vpow2.f32 %v3386_v5  ;;  %v2486_v32 = vmul.f32 %v2454_v10, %v5972_v56 }
 0x3cf   : > { %v3879_v36 = vpop.eup %3878  ;;  %v3182_v47 = vmul.f32 %v2925_v58, %v6941_v29  ;;  %v2498_v29 = vmul.f32 %v6918_v13, %v2462_v38 }
 0x3d0   : > { %v3138_v34 = vmul.f32 %v3879_v36, %v7005_v35  ;;  %v2890_v55 = vsel %vm2889_vm2, %v3877_v62, %v2886_v19  ;;  %v2522_v23 = vmul.f32 %v6918_v13, %v2486_v32  ;;  %vm3143_vm8 = vweird.f32 %v3879_v36 }
 0x3d1   : > { %3214 = vst [vmem:[%s6088_s11 + $0x78] sm:$0xff] %v3182_v47  ;;  %v2895_v2 = vsel %vm2892_vm7, %v2894_v52, %v2890_v55  ;;  %v7053_v46 = vadd.f32 %v6938_v43, %v2498_v29  ;;  %vm3144_vm10 = vmor %vm3142_vm9, %vm3143_vm8 }
 0x3d2   : > { %v3139_v50 = vsub.f32 1.0, %v3138_v34  ;;  %v3180_v14 = vmul.f32 %v2895_v2, %v6948_v4  ;;  %v7056_v56 = vadd.f32 %v6938_v43, %v2522_v23 }
 0x3d3   : > { %v3371_v13 = vmul.f32 -1.442695, %v7053_v46 }
 0x3d4   : > { %v3140_v3 = vmul.f32 %v3879_v36, %v3139_v50  ;;  %3212 = vst [vmem:[%s6088_s11 + $0x68] sm:$0xff] %v3180_v14  ;;  %v3881_v39 = vpop.eup %3880  ;;  %v3395_v1 = vmul.f32 -1.442695, %v7056_v56 }
 0x3d5   : > { %v2677_v63 = vadd.f32 1.0, %v3881_v39 }
 0x3d6   : > { %v3141_v4 = vadd.f32 %v3879_v36, %v3140_v3 }
 0x3d7   : > { %3882 = vrcp.f32 %v2677_v63  ;;  %v3028_v41 = vand.u32 2147483648, %v2677_v63  ;;  %v3026_v28 = vand.u32 2147483647, %v2677_v63  ;;  %vm3022_vm13 = vweird.f32 %v2677_v63 }
 0x3d8   : > { %v3145_v24 = vsel %vm3144_vm10, %v3879_v36, %v3141_v4  ;;  %3884 = vpow2.f32 %v3371_v13 }
 0x3d9   : > { %v3150_v40 = vsel %vm3147_vm11, %v3149_v49, %v3145_v24  ;;  %3886 = vpow2.f32 %v3395_v1  ;;  %vm3027_vm15 = vcmp.eq.f32.partialorder %v3026_v28, 8.507059e+37 }
 0x3da   : > { %v3197_v57 = vmul.f32 %v3150_v40, %v6978_v27  ;;  %v3029_v27 = vor.u32 1.1754944e-38, %v3028_v41 }
 0x3dc   : > { %3229 = vst [vmem:[%s6088_s11 + $0xf0] sm:$0xff] %v3197_v57 }
 0x3dd   : > { %v3883_v43 = vpop.eup %3882 }
 0x3de   : > { %v3885_v44 = vpop.eup %3884  ;;  %v3018_v54 = vmul.f32 %v3883_v43, %v2677_v63  ;;  %vm3023_vm12 = vweird.f32 %v3883_v43 }
 0x3df   : > { %v3887_v37 = vpop.eup %3886  ;;  %v2662_v6 = vadd.f32 1.0, %v3885_v44  ;;  %vm3024_vm14 = vmor %vm3022_vm13, %vm3023_vm12 }
 0x3e0   : > { %v3019_v30 = vsub.f32 1.0, %v3018_v54  ;;  %v2686_v7 = vadd.f32 1.0, %v3887_v37 }
 0x3e1   : > { %3888 = vrcp.f32 %v2662_v6  ;;  %v2803_v20 = vand.u32 2147483648, %v2662_v6  ;;  %v2801_v42 = vand.u32 2147483647, %v2662_v6  ;;  %vm2797_vm5 = vweird.f32 %v2662_v6 }
 0x3e2   : > { %v3020_v35 = vmul.f32 %v3883_v43, %v3019_v30  ;;  %3890 = vrcp.f32 %v2686_v7  ;;  %v3163_v12 = vand.u32 2147483648, %v2686_v7  ;;  %v3161_v0 = vand.u32 2147483647, %v2686_v7 }
 0x3e3   : > { %v2804_v53 = vor.u32 1.1754944e-38, %v2803_v20  ;;  %vm3157_vm0 = vweird.f32 %v2686_v7  ;;  %vm2802_vm1 = vcmp.eq.f32.partialorder %v2801_v42, 8.507059e+37 }
 0x3e4   : > { %v3021_v33 = vadd.f32 %v3883_v43, %v3020_v35  ;;  %v3164_v17 = vor.u32 1.1754944e-38, %v3163_v12  ;;  %vm3162_vm7 = vcmp.eq.f32.partialorder %v3161_v0, 8.507059e+37 }
 0x3e6   : > { %v3025_v62 = vsel %vm3024_vm14, %v3883_v43, %v3021_v33 }
 0x3e7   : > { %v3889_v22 = vpop.eup %3888  ;;  %v3030_v25 = vsel %vm3027_vm15, %v3029_v27, %v3025_v62 }
 0x3e8   : > { %v3891_v8 = vpop.eup %3890  ;;  %v3189_v16 = vmul.f32 %v3030_v25, %v7019_v11  ;;  %v2793_v45 = vmul.f32 %v3889_v22, %v2662_v6  ;;  %vm2798_vm3 = vweird.f32 %v3889_v22 }
 0x3e9   : > { %v3153_v59 = vmul.f32 %v3891_v8, %v2686_v7  ;;  %vm3158_vm4 = vweird.f32 %v3891_v8  ;;  %vm2799_vm6 = vmor %vm2797_vm5, %vm2798_vm3 }
 0x3ea   : > { %3221 = vst [vmem:[%s6088_s11 + $0xb0] sm:$0xff] %v3189_v16  ;;  %v2794_v15 = vsub.f32 1.0, %v2793_v45  ;;  %vm3159_vm2 = vmor %vm3157_vm0, %vm3158_vm4 }
 0x3eb   : > { %v3154_v9 = vsub.f32 1.0, %v3153_v59 }
 0x3ec   : > { %v2795_v51 = vmul.f32 %v3889_v22, %v2794_v15 }
 0x3ed   : > { %v3155_v31 = vmul.f32 %v3891_v8, %v3154_v9 }
 0x3ee   : > { %v2796_v11 = vadd.f32 %v3889_v22, %v2795_v51 }
 0x3ef   : > { %v3156_v60 = vadd.f32 %v3891_v8, %v3155_v31 }
 0x3f0   : > { %v2800_v61 = vsel %vm2799_vm6, %v3889_v22, %v2796_v11 }
 0x3f1   : > { %v2805_v18 = vsel %vm2802_vm1, %v2804_v53, %v2800_v61  ;;  %v3160_v5 = vsel %vm3159_vm2, %v3891_v8, %v3156_v60 }
 0x3f2   : > { %v3174_v36 = vmul.f32 %v2805_v18, %v7053_v46  ;;  %v3165_v58 = vsel %vm3162_vm7, %v3164_v17, %v3160_v5 }
 0x3f3   : > { %v3198_v19 = vmul.f32 %v3165_v58, %v7056_v56 }
 0x3f4   : > { %3206 = vst [vmem:[%s6088_s11 + $0x38] sm:$0xff] %v3174_v36 }
 0x3f5   : > { %3230 = vst [vmem:[%s6088_s11 + $0xf8] sm:$0xff] %v3198_v19 }
 0x3f6   : > { %3954 = shalt.err (!%p3951_p8)
}
 0x3f7   : > { %s3999_s9 = smov 128   ;;  %s4000_s11 = smov 8  }
 0x3f8   : > { %3454 = dma.vmem_to_hbm [thread:$0]  (%p4074_p5), %s3245_s25, 4096, %s3247_s10, %s3232_s12, %s3999_s9, %s3999_s9, %s4000_s11  }
 0x3f9 PF: > { %p3466_p9 = scmp.ge.s32.totalorder %s3993_s24, 2  ;;  %s3261_s17 = sand.u32 1, %s3981_s21  }
 0x3fa   : > { %s3262_s28 = scalar_lea.sflag [#allocation3], %s3261_s17 }
 0x3fb   : > { %p3461_p10 = pnand %p3466_p9, %p4078_p6 }
 0x3fd   : > { %p3462_p11 = pneg %p3461_p10 }
 0x3ff   : > { %3976 = dma.done.wait (%p3462_p11), %s3262_s28, 4096  }
 0x400   : > { %3978 = vsyncadd (%p3462_p11), %s3262_s28, 4294963200  ;;  %p17_p12 = scmp.ge.s32.totalorder %s4061_s27, 4   ;;  %s7279_s21 = smov %s3985_s22 }
 0x401   : > { %s7280_s22 = smov %s3989_s23  ;;  %s7281_s23 = smov %s4072_s30 }
 0x402   : > { %s7282_s24 = smov %s4061_s27  ;;  %19 = sbr.rel (!%p17_p12) target bundleno = 4 (0x4), region = 84 }
 0x407   :  { %3268 = vsyncpa [#allocation3], 1 }
 0x408   :  { %3270 = vsyncpa [#allocation3 + $0x1], 1 }
 0x409   :  { %3271 = vsyncpa [#allocation4], 1 }
 0x40a   :  { %3273 = vsyncpa [#allocation4 + $0x1], 1 }

</bundles_post_ra>
